<compile_context>
chip_gen: v7x
topology: tpu7x:2x2x1
jax: 0.10.0
libtpu: 0.0.40
codegen_flags: <defaults>
</compile_context>

<pallas_src>
import functools

import jax
import jax.numpy as jnp
from jax.experimental import pallas as pl
from jax.experimental.pallas import tpu as pltpu

GATE_PAD = 128  # each GRU gate (r|z|n) gets its own lane-aligned 128-lane slab


def gru_encoder_kernel(x_ref, w_ih0_ref, w_ih_r_ref, w_hh_ref,
                       b_gi_ref, b_hn_ref, fc_w_ref, fc_b_ref, out_ref,
                       *, T, B, H, L):
    """Whole forward pass in one kernel invocation (everything fits in VMEM).

    Weight columns are gate-padded: [r | pad | z | pad | n | pad], 3*128 lanes total,
    real data in lanes 0..H-1 of each slab.  PyTorch gate math (gate order r|z|n):
        r = sigmoid(Wir x + bir + Whr h + bhr)
        z = sigmoid(Wiz x + biz + Whz h + bhz)
        n = tanh  (Win x + bin + r * (Whn h + bhn))
        h = (1 - z) * n + z * h
    b_gi already folds b_ih (all gates) + b_hh for r,z; b_hn stays inside r*(...).
    """
    GP = GATE_PAD
    W3 = 3 * GP
    f32 = jnp.float32
    bf16 = jnp.bfloat16

    # ---- hoisted per-layer constants (biases pre-broadcast ONCE; the unrolled loop
    #      below would otherwise re-emit broadcast_in_dim every step) ----
    w_hh = [w_hh_ref[l] for l in range(L)]                      # (H, 3*GP) bf16
    w_ih = [None] + [w_ih_r_ref[l] for l in range(L - 1)]       # layers >= 1
    b_gi = [jnp.broadcast_to(b_gi_ref[l], (B, W3)) for l in range(L)]
    b_hn = [jnp.broadcast_to(b_hn_ref[l], (B, H)) for l in range(L)]

    # ---- layer 0: ONE batched input projection for all T timesteps (off the chain) ----
    gi0_all = (jnp.dot(x_ref[...], w_ih0_ref[...], preferred_element_type=f32)
               + b_gi_ref[0])                                   # (T*B, 3*GP)
    gi0 = [gi0_all[t * B:(t + 1) * B] for t in range(T)]        # per-step (B, 3*GP)

    def cell(l, t, x_in, h):
        """One GRU cell of layer l at timestep t.  x_in is ignored for layer 0."""
        if l == 0:
            gi = gi0[t]
        else:
            gi = jnp.dot(x_in.astype(bf16), w_ih[l],
                         preferred_element_type=f32) + b_gi[l]
        if t == 0:
            # h == 0: skip the recurrent matmul and the z*h term entirely.
            r = jax.nn.sigmoid(gi[:, 0:H])
            z = jax.nn.sigmoid(gi[:, GP:GP + H])
            n = jnp.tanh(gi[:, 2 * GP:2 * GP + H] + r * b_hn[l])
            return (1.0 - z) * n
        gh = jnp.dot(h.astype(bf16), w_hh[l], preferred_element_type=f32)
        # All gate slices start at a lane multiple of 128 -> lane-0 aligned with h.
        r = jax.nn.sigmoid(gi[:, 0:H] + gh[:, 0:H])
        z = jax.nn.sigmoid(gi[:, GP:GP + H] + gh[:, GP:GP + H])
        n = jnp.tanh(gi[:, 2 * GP:2 * GP + H]
                     + r * (gh[:, 2 * GP:2 * GP + H] + b_hn[l]))
        return (1.0 - z) * n + z * h

    # ---- layer-wavefront (diagonal) schedule over the T*L cells ----
    # At super-step s, layer l processes timestep t = s - l; all cells within one
    # super-step are data-independent, so their matmuls can overlap on the MXU.
    h = [None] * L          # current hidden state per layer
    x_next = [None] * L     # input for layer l's next timestep (= layer l-1's output)
    for s in range(T + L - 1):
        for l in range(L - 1, -1, -1):      # descending: writes to x_next[l+1] happen
            t = s - l                       # only after layer l+1 read its input
            if 0 <= t < T:
                h_new = cell(l, t, x_next[l], h[l])
                h[l] = h_new
                if l + 1 < L:
                    x_next[l + 1] = h_new

    # ---- last time step of the top layer: LeakyReLU(0.01), then lane-dense Linear ----
    h_last = h[L - 1]
    h_act = jnp.where(h_last > 0, h_last, 0.01 * h_last)
    out_ref[...] = (jnp.dot(h_act.astype(bf16), fc_w_ref[...],
                            preferred_element_type=f32) + fc_b_ref[...])


def _pad_gates(w, H):
    """(..., 3H) columns in gate order r|z|n -> (..., 3*GATE_PAD) with each gate in its
    own lane-aligned 128-wide slab (real data in lanes 0..H-1, zeros elsewhere)."""
    r, z, n = w[..., :H], w[..., H:2 * H], w[..., 2 * H:]
    pad = [(0, 0)] * (w.ndim - 1) + [(0, GATE_PAD - H)]
    return jnp.concatenate([jnp.pad(r, pad), jnp.pad(z, pad), jnp.pad(n, pad)], axis=-1)


def gru_encoder_forward(x, params, *, hidden_size, num_layers, output_channels):
    B, T, C = x.shape
    H, L, O = hidden_size, num_layers, output_channels
    assert H <= GATE_PAD and L >= 2
    O_pad = ((O + 127) // 128) * 128            # 435 -> 512: lane-dense output stores

    # time-major flattened rows: row index = t * B + b  (bf16: MXU operand only)
    x_flat = jnp.transpose(x, (1, 0, 2)).reshape(T * B, C).astype(jnp.bfloat16)

    # Gate-padded, bf16 MXU weights (layer 0 + stacked layers 1..L-1).
    w_ih0 = _pad_gates(params["w_ih0"], H).astype(jnp.bfloat16)             # (C, 3*GP)
    w_ih_r = _pad_gates(params["w_ih_r"], H).astype(jnp.bfloat16)           # (L-1, H, 3*GP)
    w_hh_all = jnp.concatenate([params["w_hh0"][None], params["w_hh_r"]], 0)
    w_hh = _pad_gates(w_hh_all, H).astype(jnp.bfloat16)                     # (L, H, 3*GP)

    # Biases (f32): fold b_ih (all gates) + b_hh for r,z into the input projection;
    # b_hh_n stays separate (must remain inside the r * (...) term).
    b_ih = jnp.concatenate([params["b_ih0"][None], params["b_ih_r"]], 0)    # (L,1,3H)
    b_hh = jnp.concatenate([params["b_hh0"][None], params["b_hh_r"]], 0)    # (L,1,3H)
    b_gi = jnp.concatenate([b_ih[..., :2 * H] + b_hh[..., :2 * H],
                            b_ih[..., 2 * H:]], axis=-1)
    b_gi = _pad_gates(b_gi, H).astype(jnp.float32)                          # (L,1,3*GP)
    b_hn = b_hh[..., 2 * H:].astype(jnp.float32)                            # (L,1,H)

    fc_w = jnp.pad(params["fc_w"], ((0, 0), (0, O_pad - O))).astype(jnp.bfloat16)
    fc_b = jnp.pad(params["fc_b"], ((0, 0), (0, O_pad - O))).astype(jnp.float32)

    kernel = functools.partial(gru_encoder_kernel, T=T, B=B, H=H, L=L)
    out_pad = pl.pallas_call(
        kernel,
        out_shape=jax.ShapeDtypeStruct((B, O_pad), jnp.float32),
        in_specs=[pl.BlockSpec(memory_space=pltpu.MemorySpace.VMEM)] * 8,
        out_specs=pl.BlockSpec(memory_space=pltpu.MemorySpace.VMEM),
    )(x_flat, w_ih0, w_ih_r, w_hh, b_gi, b_hn, fc_w, fc_b)
    return out_pad[:, :O]


def init_params(key, C, H, L, O):
    """Deterministic synthetic weights, uniform(-1/sqrt(H), 1/sqrt(H)) like nn.GRU.

    NOTE: layouts here are (in, 3H)/(H, O) for x @ W; transpose when importing real
    PyTorch checkpoints (nn.GRU stores (3H, in), nn.Linear stores (O, H)).
    """
    ks = jax.random.split(key, 10)
    s = 1.0 / float(H) ** 0.5
    u = lambda k, shape: jax.random.uniform(k, shape, jnp.float32, -s, s)
    return dict(
        w_ih0=u(ks[0], (C, 3 * H)),          # layer 0 input->hidden (gates r|z|n)
        w_hh0=u(ks[1], (H, 3 * H)),
        b_ih0=u(ks[2], (1, 3 * H)),
        b_hh0=u(ks[3], (1, 3 * H)),
        w_ih_r=u(ks[4], (L - 1, H, 3 * H)),  # layers 1..L-1
        w_hh_r=u(ks[5], (L - 1, H, 3 * H)),
        b_ih_r=u(ks[6], (L - 1, 1, 3 * H)),
        b_hh_r=u(ks[7], (L - 1, 1, 3 * H)),
        fc_w=u(ks[8], (H, O)),
        fc_b=u(ks[9], (1, O)),
    )


def _reference_forward(x, params, *, hidden_size, num_layers):
    """Pure-JAX f32 reference of the same math (for correctness check)."""
    H = hidden_size
    B, T, _ = x.shape

    def cell(x_t, h, w_ih, w_hh, b_ih, b_hh):
        gi = x_t @ w_ih + b_ih
        gh = h @ w_hh + b_hh
        r = jax.nn.sigmoid(gi[:, :H] + gh[:, :H])
        z = jax.nn.sigmoid(gi[:, H:2 * H] + gh[:, H:2 * H])
        n = jnp.tanh(gi[:, 2 * H:] + r * gh[:, 2 * H:])
        return (1.0 - z) * n + z * h

    seq = x
    for l in range(num_layers):
        if l == 0:
            w_ih, w_hh = params["w_ih0"], params["w_hh0"]
            b_ih, b_hh = params["b_ih0"], params["b_hh0"]
        else:
            w_ih, w_hh = params["w_ih_r"][l - 1], params["w_hh_r"][l - 1]
            b_ih, b_hh = params["b_ih_r"][l - 1], params["b_hh_r"][l - 1]
        h = jnp.zeros((B, H), jnp.float32)
        outs = []
        for t in range(T):
            h = cell(seq[:, t, :], h, w_ih, w_hh, b_ih, b_hh)
            outs.append(h)
        seq = jnp.stack(outs, axis=1)
    h = seq[:, -1, :]
    h = jnp.where(h > 0, h, 0.01 * h)
    return h @ params["fc_w"] + params["fc_b"]


if __name__ == "__main__":
    # Small shapes consistent with the module's forward:
    B, T, C = 2, 8, 4                # x: (batch, seq, input_channels)
    H, L, O = 64, 3, 435             # hidden_size, num_layers, output_channels
    vocab_size = 100                 # unused by forward (kept for parity)

    key = jax.random.PRNGKey(0)
    kx, kp = jax.random.split(key)
    x = jax.random.normal(kx, (B, T, C), jnp.float32)
    params = init_params(kp, C, H, L, O)

    out = gru_encoder_forward(x, params, hidden_size=H, num_layers=L,
                              output_channels=O)
    out = jax.block_until_ready(out)
    assert out.shape == (B, O), out.shape

    # Kernel uses bf16 MXU operands (perf review item 2); tolerance widened vs the
    # pure-f32 reference accordingly.
    ref = _reference_forward(x, params, hidden_size=H, num_layers=L)
    assert jnp.allclose(out, ref, atol=5e-2, rtol=5e-2), float(jnp.max(jnp.abs(out - ref)))

    print("KERNEL_OK")
</pallas_src>

<mosaic_0001>
module attributes {stable_mosaic.version = 11 : i64} {
  func.func @gru_encoder_kernel(%arg0: memref<16x4xbf16, #tpu.memory_space<vmem>>, %arg1: memref<4x384xbf16, #tpu.memory_space<vmem>>, %arg2: memref<2x64x384xbf16, #tpu.memory_space<vmem>>, %arg3: memref<3x64x384xbf16, #tpu.memory_space<vmem>>, %arg4: memref<3x1x384xf32, #tpu.memory_space<vmem>>, %arg5: memref<3x1x64xf32, #tpu.memory_space<vmem>>, %arg6: memref<64x512xbf16, #tpu.memory_space<vmem>>, %arg7: memref<1x512xf32, #tpu.memory_space<vmem>>, %arg8: memref<2x512xf32, #tpu.memory_space<vmem>>) attributes {dimension_semantics = [], scalar_prefetch = 0 : i64, scratch_operands = 0 : i64, tpu.core_type = #tpu.core_type<tc>} {
    %c0 = arith.constant 0 : index
    %c0_0 = arith.constant 0 : index
    %c0_1 = arith.constant 0 : index
    %0 = vector.load %arg3[%c0, %c0_0, %c0_1] : memref<3x64x384xbf16, #tpu.memory_space<vmem>>, vector<1x64x384xbf16>
    %1 = vector.shape_cast %0 : vector<1x64x384xbf16> to vector<64x384xbf16>
    %c1 = arith.constant 1 : index
    %c0_2 = arith.constant 0 : index
    %c0_3 = arith.constant 0 : index
    %2 = vector.load %arg3[%c1, %c0_2, %c0_3] : memref<3x64x384xbf16, #tpu.memory_space<vmem>>, vector<1x64x384xbf16>
    %3 = vector.shape_cast %2 : vector<1x64x384xbf16> to vector<64x384xbf16>
    %c2 = arith.constant 2 : index
    %c0_4 = arith.constant 0 : index
    %c0_5 = arith.constant 0 : index
    %4 = vector.load %arg3[%c2, %c0_4, %c0_5] : memref<3x64x384xbf16, #tpu.memory_space<vmem>>, vector<1x64x384xbf16>
    %5 = vector.shape_cast %4 : vector<1x64x384xbf16> to vector<64x384xbf16>
    %c0_6 = arith.constant 0 : index
    %c0_7 = arith.constant 0 : index
    %c0_8 = arith.constant 0 : index
    %6 = vector.load %arg2[%c0_6, %c0_7, %c0_8] : memref<2x64x384xbf16, #tpu.memory_space<vmem>>, vector<1x64x384xbf16>
    %7 = vector.shape_cast %6 : vector<1x64x384xbf16> to vector<64x384xbf16>
    %c1_9 = arith.constant 1 : index
    %c0_10 = arith.constant 0 : index
    %c0_11 = arith.constant 0 : index
    %8 = vector.load %arg2[%c1_9, %c0_10, %c0_11] : memref<2x64x384xbf16, #tpu.memory_space<vmem>>, vector<1x64x384xbf16>
    %9 = vector.shape_cast %8 : vector<1x64x384xbf16> to vector<64x384xbf16>
    %c1_12 = arith.constant 1 : index
    %c0_13 = arith.constant 0 : index
    %c0_14 = arith.constant 0 : index
    %10 = vector.load %arg4[%c1_12, %c0_13, %c0_14] : memref<3x1x384xf32, #tpu.memory_space<vmem>>, vector<1x1x384xf32>
    %11 = vector.shape_cast %10 : vector<1x1x384xf32> to vector<1x384xf32>
    %12 = vector.shape_cast %11 : vector<1x384xf32> to vector<1x384xf32>
    %13 = vector.broadcast %12 : vector<1x384xf32> to vector<2x384xf32>
    %c2_15 = arith.constant 2 : index
    %c0_16 = arith.constant 0 : index
    %c0_17 = arith.constant 0 : index
    %14 = vector.load %arg4[%c2_15, %c0_16, %c0_17] : memref<3x1x384xf32, #tpu.memory_space<vmem>>, vector<1x1x384xf32>
    %15 = vector.shape_cast %14 : vector<1x1x384xf32> to vector<1x384xf32>
    %16 = vector.shape_cast %15 : vector<1x384xf32> to vector<1x384xf32>
    %17 = vector.broadcast %16 : vector<1x384xf32> to vector<2x384xf32>
    %c0_18 = arith.constant 0 : index
    %c0_19 = arith.constant 0 : index
    %c0_20 = arith.constant 0 : index
    %18 = vector.load %arg5[%c0_18, %c0_19, %c0_20] : memref<3x1x64xf32, #tpu.memory_space<vmem>>, vector<1x1x64xf32>
    %19 = vector.shape_cast %18 : vector<1x1x64xf32> to vector<1x64xf32>
    %20 = vector.shape_cast %19 : vector<1x64xf32> to vector<1x64xf32>
    %21 = vector.broadcast %20 : vector<1x64xf32> to vector<2x64xf32>
    %c1_21 = arith.constant 1 : index
    %c0_22 = arith.constant 0 : index
    %c0_23 = arith.constant 0 : index
    %22 = vector.load %arg5[%c1_21, %c0_22, %c0_23] : memref<3x1x64xf32, #tpu.memory_space<vmem>>, vector<1x1x64xf32>
    %23 = vector.shape_cast %22 : vector<1x1x64xf32> to vector<1x64xf32>
    %24 = vector.shape_cast %23 : vector<1x64xf32> to vector<1x64xf32>
    %25 = vector.broadcast %24 : vector<1x64xf32> to vector<2x64xf32>
    %c2_24 = arith.constant 2 : index
    %c0_25 = arith.constant 0 : index
    %c0_26 = arith.constant 0 : index
    %26 = vector.load %arg5[%c2_24, %c0_25, %c0_26] : memref<3x1x64xf32, #tpu.memory_space<vmem>>, vector<1x1x64xf32>
    %27 = vector.shape_cast %26 : vector<1x1x64xf32> to vector<1x64xf32>
    %28 = vector.shape_cast %27 : vector<1x64xf32> to vector<1x64xf32>
    %29 = vector.broadcast %28 : vector<1x64xf32> to vector<2x64xf32>
    %c0_27 = arith.constant 0 : index
    %c0_28 = arith.constant 0 : index
    %30 = vector.load %arg0[%c0_27, %c0_28] : memref<16x4xbf16, #tpu.memory_space<vmem>>, vector<16x4xbf16>
    %c0_29 = arith.constant 0 : index
    %c0_30 = arith.constant 0 : index
    %31 = vector.load %arg1[%c0_29, %c0_30] : memref<4x384xbf16, #tpu.memory_space<vmem>>, vector<4x384xbf16>
    %cst = arith.constant dense<0.000000e+00> : vector<16x384xf32>
    %32 = tpu.matmul %30, %31, %cst {dimension_numbers = #tpu.dot_dimension_numbers<[1], [0], [0], [1], [0, 0, 1, 1], [], []>} : vector<16x4xbf16>, vector<4x384xbf16>, vector<16x384xf32> -> vector<16x384xf32>
    %c0_31 = arith.constant 0 : index
    %c0_32 = arith.constant 0 : index
    %c0_33 = arith.constant 0 : index
    %33 = vector.load %arg4[%c0_31, %c0_32, %c0_33] : memref<3x1x384xf32, #tpu.memory_space<vmem>>, vector<1x1x384xf32>
    %34 = vector.shape_cast %33 : vector<1x1x384xf32> to vector<1x384xf32>
    %35 = vector.broadcast %34 : vector<1x384xf32> to vector<16x384xf32>
    %36 = arith.addf %32, %35 : vector<16x384xf32>
    %37 = vector.extract_strided_slice %36 {offsets = [0, 0], sizes = [2, 384], strides = [1, 1]} : vector<16x384xf32> to vector<2x384xf32>
    %38 = vector.extract_strided_slice %36 {offsets = [2, 0], sizes = [2, 384], strides = [1, 1]} : vector<16x384xf32> to vector<2x384xf32>
    %39 = vector.extract_strided_slice %36 {offsets = [4, 0], sizes = [2, 384], strides = [1, 1]} : vector<16x384xf32> to vector<2x384xf32>
    %40 = vector.extract_strided_slice %36 {offsets = [6, 0], sizes = [2, 384], strides = [1, 1]} : vector<16x384xf32> to vector<2x384xf32>
    %41 = vector.extract_strided_slice %36 {offsets = [8, 0], sizes = [2, 384], strides = [1, 1]} : vector<16x384xf32> to vector<2x384xf32>
    %42 = vector.extract_strided_slice %36 {offsets = [10, 0], sizes = [2, 384], strides = [1, 1]} : vector<16x384xf32> to vector<2x384xf32>
    %43 = vector.extract_strided_slice %36 {offsets = [12, 0], sizes = [2, 384], strides = [1, 1]} : vector<16x384xf32> to vector<2x384xf32>
    %44 = vector.extract_strided_slice %36 {offsets = [14, 0], sizes = [2, 384], strides = [1, 1]} : vector<16x384xf32> to vector<2x384xf32>
    %45 = vector.extract_strided_slice %37 {offsets = [0, 0], sizes = [2, 64], strides = [1, 1]} : vector<2x384xf32> to vector<2x64xf32>
    %46 = arith.negf %45 : vector<2x64xf32>
    %47 = math.exp %46 : vector<2x64xf32>
    %cst_34 = arith.constant 1.000000e+00 : f32
    %48 = vector.broadcast %cst_34 : f32 to vector<2x64xf32>
    %49 = arith.addf %48, %47 : vector<2x64xf32>
    %50 = arith.divf %48, %49 : vector<2x64xf32>
    %51 = vector.extract_strided_slice %37 {offsets = [0, 128], sizes = [2, 64], strides = [1, 1]} : vector<2x384xf32> to vector<2x64xf32>
    %52 = arith.negf %51 : vector<2x64xf32>
    %53 = math.exp %52 : vector<2x64xf32>
    %cst_35 = arith.constant 1.000000e+00 : f32
    %54 = vector.broadcast %cst_35 : f32 to vector<2x64xf32>
    %55 = arith.addf %54, %53 : vector<2x64xf32>
    %56 = arith.divf %54, %55 : vector<2x64xf32>
    %57 = vector.extract_strided_slice %37 {offsets = [0, 256], sizes = [2, 64], strides = [1, 1]} : vector<2x384xf32> to vector<2x64xf32>
    %58 = arith.mulf %50, %21 : vector<2x64xf32>
    %59 = arith.addf %57, %58 : vector<2x64xf32>
    %60 = math.tanh %59 : vector<2x64xf32>
    %cst_36 = arith.constant 1.000000e+00 : f32
    %61 = vector.broadcast %cst_36 : f32 to vector<2x64xf32>
    %62 = arith.subf %61, %56 : vector<2x64xf32>
    %63 = arith.mulf %62, %60 : vector<2x64xf32>
    %64 = arith.truncf %63 : vector<2x64xf32> to vector<2x64xbf16>
    %cst_37 = arith.constant dense<0.000000e+00> : vector<2x384xf32>
    %65 = tpu.matmul %64, %7, %cst_37 {dimension_numbers = #tpu.dot_dimension_numbers<[1], [0], [0], [1], [0, 0, 1, 1], [], []>} : vector<2x64xbf16>, vector<64x384xbf16>, vector<2x384xf32> -> vector<2x384xf32>
    %66 = arith.addf %65, %13 : vector<2x384xf32>
    %67 = vector.extract_strided_slice %66 {offsets = [0, 0], sizes = [2, 64], strides = [1, 1]} : vector<2x384xf32> to vector<2x64xf32>
    %68 = arith.negf %67 : vector<2x64xf32>
    %69 = math.exp %68 : vector<2x64xf32>
    %cst_38 = arith.constant 1.000000e+00 : f32
    %70 = vector.broadcast %cst_38 : f32 to vector<2x64xf32>
    %71 = arith.addf %70, %69 : vector<2x64xf32>
    %72 = arith.divf %70, %71 : vector<2x64xf32>
    %73 = vector.extract_strided_slice %66 {offsets = [0, 128], sizes = [2, 64], strides = [1, 1]} : vector<2x384xf32> to vector<2x64xf32>
    %74 = arith.negf %73 : vector<2x64xf32>
    %75 = math.exp %74 : vector<2x64xf32>
    %cst_39 = arith.constant 1.000000e+00 : f32
    %76 = vector.broadcast %cst_39 : f32 to vector<2x64xf32>
    %77 = arith.addf %76, %75 : vector<2x64xf32>
    %78 = arith.divf %76, %77 : vector<2x64xf32>
    %79 = vector.extract_strided_slice %66 {offsets = [0, 256], sizes = [2, 64], strides = [1, 1]} : vector<2x384xf32> to vector<2x64xf32>
    %80 = arith.mulf %72, %25 : vector<2x64xf32>
    %81 = arith.addf %79, %80 : vector<2x64xf32>
    %82 = math.tanh %81 : vector<2x64xf32>
    %cst_40 = arith.constant 1.000000e+00 : f32
    %83 = vector.broadcast %cst_40 : f32 to vector<2x64xf32>
    %84 = arith.subf %83, %78 : vector<2x64xf32>
    %85 = arith.mulf %84, %82 : vector<2x64xf32>
    %86 = arith.truncf %63 : vector<2x64xf32> to vector<2x64xbf16>
    %cst_41 = arith.constant dense<0.000000e+00> : vector<2x384xf32>
    %87 = tpu.matmul %86, %1, %cst_41 {dimension_numbers = #tpu.dot_dimension_numbers<[1], [0], [0], [1], [0, 0, 1, 1], [], []>} : vector<2x64xbf16>, vector<64x384xbf16>, vector<2x384xf32> -> vector<2x384xf32>
    %88 = vector.extract_strided_slice %38 {offsets = [0, 0], sizes = [2, 64], strides = [1, 1]} : vector<2x384xf32> to vector<2x64xf32>
    %89 = vector.extract_strided_slice %87 {offsets = [0, 0], sizes = [2, 64], strides = [1, 1]} : vector<2x384xf32> to vector<2x64xf32>
    %90 = arith.addf %88, %89 : vector<2x64xf32>
    %91 = arith.negf %90 : vector<2x64xf32>
    %92 = math.exp %91 : vector<2x64xf32>
    %cst_42 = arith.constant 1.000000e+00 : f32
    %93 = vector.broadcast %cst_42 : f32 to vector<2x64xf32>
    %94 = arith.addf %93, %92 : vector<2x64xf32>
    %95 = arith.divf %93, %94 : vector<2x64xf32>
    %96 = vector.extract_strided_slice %38 {offsets = [0, 128], sizes = [2, 64], strides = [1, 1]} : vector<2x384xf32> to vector<2x64xf32>
    %97 = vector.extract_strided_slice %87 {offsets = [0, 128], sizes = [2, 64], strides = [1, 1]} : vector<2x384xf32> to vector<2x64xf32>
    %98 = arith.addf %96, %97 : vector<2x64xf32>
    %99 = arith.negf %98 : vector<2x64xf32>
    %100 = math.exp %99 : vector<2x64xf32>
    %cst_43 = arith.constant 1.000000e+00 : f32
    %101 = vector.broadcast %cst_43 : f32 to vector<2x64xf32>
    %102 = arith.addf %101, %100 : vector<2x64xf32>
    %103 = arith.divf %101, %102 : vector<2x64xf32>
    %104 = vector.extract_strided_slice %38 {offsets = [0, 256], sizes = [2, 64], strides = [1, 1]} : vector<2x384xf32> to vector<2x64xf32>
    %105 = vector.extract_strided_slice %87 {offsets = [0, 256], sizes = [2, 64], strides = [1, 1]} : vector<2x384xf32> to vector<2x64xf32>
    %106 = arith.addf %105, %21 : vector<2x64xf32>
    %107 = arith.mulf %95, %106 : vector<2x64xf32>
    %108 = arith.addf %104, %107 : vector<2x64xf32>
    %109 = math.tanh %108 : vector<2x64xf32>
    %cst_44 = arith.constant 1.000000e+00 : f32
    %110 = vector.broadcast %cst_44 : f32 to vector<2x64xf32>
    %111 = arith.subf %110, %103 : vector<2x64xf32>
    %112 = arith.mulf %111, %109 : vector<2x64xf32>
    %113 = arith.mulf %103, %63 : vector<2x64xf32>
    %114 = arith.addf %112, %113 : vector<2x64xf32>
    %115 = arith.truncf %85 : vector<2x64xf32> to vector<2x64xbf16>
    %cst_45 = arith.constant dense<0.000000e+00> : vector<2x384xf32>
    %116 = tpu.matmul %115, %9, %cst_45 {dimension_numbers = #tpu.dot_dimension_numbers<[1], [0], [0], [1], [0, 0, 1, 1], [], []>} : vector<2x64xbf16>, vector<64x384xbf16>, vector<2x384xf32> -> vector<2x384xf32>
    %117 = arith.addf %116, %17 : vector<2x384xf32>
    %118 = vector.extract_strided_slice %117 {offsets = [0, 0], sizes = [2, 64], strides = [1, 1]} : vector<2x384xf32> to vector<2x64xf32>
    %119 = arith.negf %118 : vector<2x64xf32>
    %120 = math.exp %119 : vector<2x64xf32>
    %cst_46 = arith.constant 1.000000e+00 : f32
    %121 = vector.broadcast %cst_46 : f32 to vector<2x64xf32>
    %122 = arith.addf %121, %120 : vector<2x64xf32>
    %123 = arith.divf %121, %122 : vector<2x64xf32>
    %124 = vector.extract_strided_slice %117 {offsets = [0, 128], sizes = [2, 64], strides = [1, 1]} : vector<2x384xf32> to vector<2x64xf32>
    %125 = arith.negf %124 : vector<2x64xf32>
    %126 = math.exp %125 : vector<2x64xf32>
    %cst_47 = arith.constant 1.000000e+00 : f32
    %127 = vector.broadcast %cst_47 : f32 to vector<2x64xf32>
    %128 = arith.addf %127, %126 : vector<2x64xf32>
    %129 = arith.divf %127, %128 : vector<2x64xf32>
    %130 = vector.extract_strided_slice %117 {offsets = [0, 256], sizes = [2, 64], strides = [1, 1]} : vector<2x384xf32> to vector<2x64xf32>
    %131 = arith.mulf %123, %29 : vector<2x64xf32>
    %132 = arith.addf %130, %131 : vector<2x64xf32>
    %133 = math.tanh %132 : vector<2x64xf32>
    %cst_48 = arith.constant 1.000000e+00 : f32
    %134 = vector.broadcast %cst_48 : f32 to vector<2x64xf32>
    %135 = arith.subf %134, %129 : vector<2x64xf32>
    %136 = arith.mulf %135, %133 : vector<2x64xf32>
    %137 = arith.truncf %114 : vector<2x64xf32> to vector<2x64xbf16>
    %cst_49 = arith.constant dense<0.000000e+00> : vector<2x384xf32>
    %138 = tpu.matmul %137, %7, %cst_49 {dimension_numbers = #tpu.dot_dimension_numbers<[1], [0], [0], [1], [0, 0, 1, 1], [], []>} : vector<2x64xbf16>, vector<64x384xbf16>, vector<2x384xf32> -> vector<2x384xf32>
    %139 = arith.addf %138, %13 : vector<2x384xf32>
    %140 = arith.truncf %85 : vector<2x64xf32> to vector<2x64xbf16>
    %cst_50 = arith.constant dense<0.000000e+00> : vector<2x384xf32>
    %141 = tpu.matmul %140, %3, %cst_50 {dimension_numbers = #tpu.dot_dimension_numbers<[1], [0], [0], [1], [0, 0, 1, 1], [], []>} : vector<2x64xbf16>, vector<64x384xbf16>, vector<2x384xf32> -> vector<2x384xf32>
    %142 = vector.extract_strided_slice %139 {offsets = [0, 0], sizes = [2, 64], strides = [1, 1]} : vector<2x384xf32> to vector<2x64xf32>
    %143 = vector.extract_strided_slice %141 {offsets = [0, 0], sizes = [2, 64], strides = [1, 1]} : vector<2x384xf32> to vector<2x64xf32>
    %144 = arith.addf %142, %143 : vector<2x64xf32>
    %145 = arith.negf %144 : vector<2x64xf32>
    %146 = math.exp %145 : vector<2x64xf32>
    %cst_51 = arith.constant 1.000000e+00 : f32
    %147 = vector.broadcast %cst_51 : f32 to vector<2x64xf32>
    %148 = arith.addf %147, %146 : vector<2x64xf32>
    %149 = arith.divf %147, %148 : vector<2x64xf32>
    %150 = vector.extract_strided_slice %139 {offsets = [0, 128], sizes = [2, 64], strides = [1, 1]} : vector<2x384xf32> to vector<2x64xf32>
    %151 = vector.extract_strided_slice %141 {offsets = [0, 128], sizes = [2, 64], strides = [1, 1]} : vector<2x384xf32> to vector<2x64xf32>
    %152 = arith.addf %150, %151 : vector<2x64xf32>
    %153 = arith.negf %152 : vector<2x64xf32>
    %154 = math.exp %153 : vector<2x64xf32>
    %cst_52 = arith.constant 1.000000e+00 : f32
    %155 = vector.broadcast %cst_52 : f32 to vector<2x64xf32>
    %156 = arith.addf %155, %154 : vector<2x64xf32>
    %157 = arith.divf %155, %156 : vector<2x64xf32>
    %158 = vector.extract_strided_slice %139 {offsets = [0, 256], sizes = [2, 64], strides = [1, 1]} : vector<2x384xf32> to vector<2x64xf32>
    %159 = vector.extract_strided_slice %141 {offsets = [0, 256], sizes = [2, 64], strides = [1, 1]} : vector<2x384xf32> to vector<2x64xf32>
    %160 = arith.addf %159, %25 : vector<2x64xf32>
    %161 = arith.mulf %149, %160 : vector<2x64xf32>
    %162 = arith.addf %158, %161 : vector<2x64xf32>
    %163 = math.tanh %162 : vector<2x64xf32>
    %cst_53 = arith.constant 1.000000e+00 : f32
    %164 = vector.broadcast %cst_53 : f32 to vector<2x64xf32>
    %165 = arith.subf %164, %157 : vector<2x64xf32>
    %166 = arith.mulf %165, %163 : vector<2x64xf32>
    %167 = arith.mulf %157, %85 : vector<2x64xf32>
    %168 = arith.addf %166, %167 : vector<2x64xf32>
    %169 = arith.truncf %114 : vector<2x64xf32> to vector<2x64xbf16>
    %cst_54 = arith.constant dense<0.000000e+00> : vector<2x384xf32>
    %170 = tpu.matmul %169, %1, %cst_54 {dimension_numbers = #tpu.dot_dimension_numbers<[1], [0], [0], [1], [0, 0, 1, 1], [], []>} : vector<2x64xbf16>, vector<64x384xbf16>, vector<2x384xf32> -> vector<2x384xf32>
    %171 = vector.extract_strided_slice %39 {offsets = [0, 0], sizes = [2, 64], strides = [1, 1]} : vector<2x384xf32> to vector<2x64xf32>
    %172 = vector.extract_strided_slice %170 {offsets = [0, 0], sizes = [2, 64], strides = [1, 1]} : vector<2x384xf32> to vector<2x64xf32>
    %173 = arith.addf %171, %172 : vector<2x64xf32>
    %174 = arith.negf %173 : vector<2x64xf32>
    %175 = math.exp %174 : vector<2x64xf32>
    %cst_55 = arith.constant 1.000000e+00 : f32
    %176 = vector.broadcast %cst_55 : f32 to vector<2x64xf32>
    %177 = arith.addf %176, %175 : vector<2x64xf32>
    %178 = arith.divf %176, %177 : vector<2x64xf32>
    %179 = vector.extract_strided_slice %39 {offsets = [0, 128], sizes = [2, 64], strides = [1, 1]} : vector<2x384xf32> to vector<2x64xf32>
    %180 = vector.extract_strided_slice %170 {offsets = [0, 128], sizes = [2, 64], strides = [1, 1]} : vector<2x384xf32> to vector<2x64xf32>
    %181 = arith.addf %179, %180 : vector<2x64xf32>
    %182 = arith.negf %181 : vector<2x64xf32>
    %183 = math.exp %182 : vector<2x64xf32>
    %cst_56 = arith.constant 1.000000e+00 : f32
    %184 = vector.broadcast %cst_56 : f32 to vector<2x64xf32>
    %185 = arith.addf %184, %183 : vector<2x64xf32>
    %186 = arith.divf %184, %185 : vector<2x64xf32>
    %187 = vector.extract_strided_slice %39 {offsets = [0, 256], sizes = [2, 64], strides = [1, 1]} : vector<2x384xf32> to vector<2x64xf32>
    %188 = vector.extract_strided_slice %170 {offsets = [0, 256], sizes = [2, 64], strides = [1, 1]} : vector<2x384xf32> to vector<2x64xf32>
    %189 = arith.addf %188, %21 : vector<2x64xf32>
    %190 = arith.mulf %178, %189 : vector<2x64xf32>
    %191 = arith.addf %187, %190 : vector<2x64xf32>
    %192 = math.tanh %191 : vector<2x64xf32>
    %cst_57 = arith.constant 1.000000e+00 : f32
    %193 = vector.broadcast %cst_57 : f32 to vector<2x64xf32>
    %194 = arith.subf %193, %186 : vector<2x64xf32>
    %195 = arith.mulf %194, %192 : vector<2x64xf32>
    %196 = arith.mulf %186, %114 : vector<2x64xf32>
    %197 = arith.addf %195, %196 : vector<2x64xf32>
    %198 = arith.truncf %168 : vector<2x64xf32> to vector<2x64xbf16>
    %cst_58 = arith.constant dense<0.000000e+00> : vector<2x384xf32>
    %199 = tpu.matmul %198, %9, %cst_58 {dimension_numbers = #tpu.dot_dimension_numbers<[1], [0], [0], [1], [0, 0, 1, 1], [], []>} : vector<2x64xbf16>, vector<64x384xbf16>, vector<2x384xf32> -> vector<2x384xf32>
    %200 = arith.addf %199, %17 : vector<2x384xf32>
    %201 = arith.truncf %136 : vector<2x64xf32> to vector<2x64xbf16>
    %cst_59 = arith.constant dense<0.000000e+00> : vector<2x384xf32>
    %202 = tpu.matmul %201, %5, %cst_59 {dimension_numbers = #tpu.dot_dimension_numbers<[1], [0], [0], [1], [0, 0, 1, 1], [], []>} : vector<2x64xbf16>, vector<64x384xbf16>, vector<2x384xf32> -> vector<2x384xf32>
    %203 = vector.extract_strided_slice %200 {offsets = [0, 0], sizes = [2, 64], strides = [1, 1]} : vector<2x384xf32> to vector<2x64xf32>
    %204 = vector.extract_strided_slice %202 {offsets = [0, 0], sizes = [2, 64], strides = [1, 1]} : vector<2x384xf32> to vector<2x64xf32>
    %205 = arith.addf %203, %204 : vector<2x64xf32>
    %206 = arith.negf %205 : vector<2x64xf32>
    %207 = math.exp %206 : vector<2x64xf32>
    %cst_60 = arith.constant 1.000000e+00 : f32
    %208 = vector.broadcast %cst_60 : f32 to vector<2x64xf32>
    %209 = arith.addf %208, %207 : vector<2x64xf32>
    %210 = arith.divf %208, %209 : vector<2x64xf32>
    %211 = vector.extract_strided_slice %200 {offsets = [0, 128], sizes = [2, 64], strides = [1, 1]} : vector<2x384xf32> to vector<2x64xf32>
    %212 = vector.extract_strided_slice %202 {offsets = [0, 128], sizes = [2, 64], strides = [1, 1]} : vector<2x384xf32> to vector<2x64xf32>
    %213 = arith.addf %211, %212 : vector<2x64xf32>
    %214 = arith.negf %213 : vector<2x64xf32>
    %215 = math.exp %214 : vector<2x64xf32>
    %cst_61 = arith.constant 1.000000e+00 : f32
    %216 = vector.broadcast %cst_61 : f32 to vector<2x64xf32>
    %217 = arith.addf %216, %215 : vector<2x64xf32>
    %218 = arith.divf %216, %217 : vector<2x64xf32>
    %219 = vector.extract_strided_slice %200 {offsets = [0, 256], sizes = [2, 64], strides = [1, 1]} : vector<2x384xf32> to vector<2x64xf32>
    %220 = vector.extract_strided_slice %202 {offsets = [0, 256], sizes = [2, 64], strides = [1, 1]} : vector<2x384xf32> to vector<2x64xf32>
    %221 = arith.addf %220, %29 : vector<2x64xf32>
    %222 = arith.mulf %210, %221 : vector<2x64xf32>
    %223 = arith.addf %219, %222 : vector<2x64xf32>
    %224 = math.tanh %223 : vector<2x64xf32>
    %cst_62 = arith.constant 1.000000e+00 : f32
    %225 = vector.broadcast %cst_62 : f32 to vector<2x64xf32>
    %226 = arith.subf %225, %218 : vector<2x64xf32>
    %227 = arith.mulf %226, %224 : vector<2x64xf32>
    %228 = arith.mulf %218, %136 : vector<2x64xf32>
    %229 = arith.addf %227, %228 : vector<2x64xf32>
    %230 = arith.truncf %197 : vector<2x64xf32> to vector<2x64xbf16>
    %cst_63 = arith.constant dense<0.000000e+00> : vector<2x384xf32>
    %231 = tpu.matmul %230, %7, %cst_63 {dimension_numbers = #tpu.dot_dimension_numbers<[1], [0], [0], [1], [0, 0, 1, 1], [], []>} : vector<2x64xbf16>, vector<64x384xbf16>, vector<2x384xf32> -> vector<2x384xf32>
    %232 = arith.addf %231, %13 : vector<2x384xf32>
    %233 = arith.truncf %168 : vector<2x64xf32> to vector<2x64xbf16>
    %cst_64 = arith.constant dense<0.000000e+00> : vector<2x384xf32>
    %234 = tpu.matmul %233, %3, %cst_64 {dimension_numbers = #tpu.dot_dimension_numbers<[1], [0], [0], [1], [0, 0, 1, 1], [], []>} : vector<2x64xbf16>, vector<64x384xbf16>, vector<2x384xf32> -> vector<2x384xf32>
    %235 = vector.extract_strided_slice %232 {offsets = [0, 0], sizes = [2, 64], strides = [1, 1]} : vector<2x384xf32> to vector<2x64xf32>
    %236 = vector.extract_strided_slice %234 {offsets = [0, 0], sizes = [2, 64], strides = [1, 1]} : vector<2x384xf32> to vector<2x64xf32>
    %237 = arith.addf %235, %236 : vector<2x64xf32>
    %238 = arith.negf %237 : vector<2x64xf32>
    %239 = math.exp %238 : vector<2x64xf32>
    %cst_65 = arith.constant 1.000000e+00 : f32
    %240 = vector.broadcast %cst_65 : f32 to vector<2x64xf32>
    %241 = arith.addf %240, %239 : vector<2x64xf32>
    %242 = arith.divf %240, %241 : vector<2x64xf32>
    %243 = vector.extract_strided_slice %232 {offsets = [0, 128], sizes = [2, 64], strides = [1, 1]} : vector<2x384xf32> to vector<2x64xf32>
    %244 = vector.extract_strided_slice %234 {offsets = [0, 128], sizes = [2, 64], strides = [1, 1]} : vector<2x384xf32> to vector<2x64xf32>
    %245 = arith.addf %243, %244 : vector<2x64xf32>
    %246 = arith.negf %245 : vector<2x64xf32>
    %247 = math.exp %246 : vector<2x64xf32>
    %cst_66 = arith.constant 1.000000e+00 : f32
    %248 = vector.broadcast %cst_66 : f32 to vector<2x64xf32>
    %249 = arith.addf %248, %247 : vector<2x64xf32>
    %250 = arith.divf %248, %249 : vector<2x64xf32>
    %251 = vector.extract_strided_slice %232 {offsets = [0, 256], sizes = [2, 64], strides = [1, 1]} : vector<2x384xf32> to vector<2x64xf32>
    %252 = vector.extract_strided_slice %234 {offsets = [0, 256], sizes = [2, 64], strides = [1, 1]} : vector<2x384xf32> to vector<2x64xf32>
    %253 = arith.addf %252, %25 : vector<2x64xf32>
    %254 = arith.mulf %242, %253 : vector<2x64xf32>
    %255 = arith.addf %251, %254 : vector<2x64xf32>
    %256 = math.tanh %255 : vector<2x64xf32>
    %cst_67 = arith.constant 1.000000e+00 : f32
    %257 = vector.broadcast %cst_67 : f32 to vector<2x64xf32>
    %258 = arith.subf %257, %250 : vector<2x64xf32>
    %259 = arith.mulf %258, %256 : vector<2x64xf32>
    %260 = arith.mulf %250, %168 : vector<2x64xf32>
    %261 = arith.addf %259, %260 : vector<2x64xf32>
    %262 = arith.truncf %197 : vector<2x64xf32> to vector<2x64xbf16>
    %cst_68 = arith.constant dense<0.000000e+00> : vector<2x384xf32>
    %263 = tpu.matmul %262, %1, %cst_68 {dimension_numbers = #tpu.dot_dimension_numbers<[1], [0], [0], [1], [0, 0, 1, 1], [], []>} : vector<2x64xbf16>, vector<64x384xbf16>, vector<2x384xf32> -> vector<2x384xf32>
    %264 = vector.extract_strided_slice %40 {offsets = [0, 0], sizes = [2, 64], strides = [1, 1]} : vector<2x384xf32> to vector<2x64xf32>
    %265 = vector.extract_strided_slice %263 {offsets = [0, 0], sizes = [2, 64], strides = [1, 1]} : vector<2x384xf32> to vector<2x64xf32>
    %266 = arith.addf %264, %265 : vector<2x64xf32>
    %267 = arith.negf %266 : vector<2x64xf32>
    %268 = math.exp %267 : vector<2x64xf32>
    %cst_69 = arith.constant 1.000000e+00 : f32
    %269 = vector.broadcast %cst_69 : f32 to vector<2x64xf32>
    %270 = arith.addf %269, %268 : vector<2x64xf32>
    %271 = arith.divf %269, %270 : vector<2x64xf32>
    %272 = vector.extract_strided_slice %40 {offsets = [0, 128], sizes = [2, 64], strides = [1, 1]} : vector<2x384xf32> to vector<2x64xf32>
    %273 = vector.extract_strided_slice %263 {offsets = [0, 128], sizes = [2, 64], strides = [1, 1]} : vector<2x384xf32> to vector<2x64xf32>
    %274 = arith.addf %272, %273 : vector<2x64xf32>
    %275 = arith.negf %274 : vector<2x64xf32>
    %276 = math.exp %275 : vector<2x64xf32>
    %cst_70 = arith.constant 1.000000e+00 : f32
    %277 = vector.broadcast %cst_70 : f32 to vector<2x64xf32>
    %278 = arith.addf %277, %276 : vector<2x64xf32>
    %279 = arith.divf %277, %278 : vector<2x64xf32>
    %280 = vector.extract_strided_slice %40 {offsets = [0, 256], sizes = [2, 64], strides = [1, 1]} : vector<2x384xf32> to vector<2x64xf32>
    %281 = vector.extract_strided_slice %263 {offsets = [0, 256], sizes = [2, 64], strides = [1, 1]} : vector<2x384xf32> to vector<2x64xf32>
    %282 = arith.addf %281, %21 : vector<2x64xf32>
    %283 = arith.mulf %271, %282 : vector<2x64xf32>
    %284 = arith.addf %280, %283 : vector<2x64xf32>
    %285 = math.tanh %284 : vector<2x64xf32>
    %cst_71 = arith.constant 1.000000e+00 : f32
    %286 = vector.broadcast %cst_71 : f32 to vector<2x64xf32>
    %287 = arith.subf %286, %279 : vector<2x64xf32>
    %288 = arith.mulf %287, %285 : vector<2x64xf32>
    %289 = arith.mulf %279, %197 : vector<2x64xf32>
    %290 = arith.addf %288, %289 : vector<2x64xf32>
    %291 = arith.truncf %261 : vector<2x64xf32> to vector<2x64xbf16>
    %cst_72 = arith.constant dense<0.000000e+00> : vector<2x384xf32>
    %292 = tpu.matmul %291, %9, %cst_72 {dimension_numbers = #tpu.dot_dimension_numbers<[1], [0], [0], [1], [0, 0, 1, 1], [], []>} : vector<2x64xbf16>, vector<64x384xbf16>, vector<2x384xf32> -> vector<2x384xf32>
    %293 = arith.addf %292, %17 : vector<2x384xf32>
    %294 = arith.truncf %229 : vector<2x64xf32> to vector<2x64xbf16>
    %cst_73 = arith.constant dense<0.000000e+00> : vector<2x384xf32>
    %295 = tpu.matmul %294, %5, %cst_73 {dimension_numbers = #tpu.dot_dimension_numbers<[1], [0], [0], [1], [0, 0, 1, 1], [], []>} : vector<2x64xbf16>, vector<64x384xbf16>, vector<2x384xf32> -> vector<2x384xf32>
    %296 = vector.extract_strided_slice %293 {offsets = [0, 0], sizes = [2, 64], strides = [1, 1]} : vector<2x384xf32> to vector<2x64xf32>
    %297 = vector.extract_strided_slice %295 {offsets = [0, 0], sizes = [2, 64], strides = [1, 1]} : vector<2x384xf32> to vector<2x64xf32>
    %298 = arith.addf %296, %297 : vector<2x64xf32>
    %299 = arith.negf %298 : vector<2x64xf32>
    %300 = math.exp %299 : vector<2x64xf32>
    %cst_74 = arith.constant 1.000000e+00 : f32
    %301 = vector.broadcast %cst_74 : f32 to vector<2x64xf32>
    %302 = arith.addf %301, %300 : vector<2x64xf32>
    %303 = arith.divf %301, %302 : vector<2x64xf32>
    %304 = vector.extract_strided_slice %293 {offsets = [0, 128], sizes = [2, 64], strides = [1, 1]} : vector<2x384xf32> to vector<2x64xf32>
    %305 = vector.extract_strided_slice %295 {offsets = [0, 128], sizes = [2, 64], strides = [1, 1]} : vector<2x384xf32> to vector<2x64xf32>
    %306 = arith.addf %304, %305 : vector<2x64xf32>
    %307 = arith.negf %306 : vector<2x64xf32>
    %308 = math.exp %307 : vector<2x64xf32>
    %cst_75 = arith.constant 1.000000e+00 : f32
    %309 = vector.broadcast %cst_75 : f32 to vector<2x64xf32>
    %310 = arith.addf %309, %308 : vector<2x64xf32>
    %311 = arith.divf %309, %310 : vector<2x64xf32>
    %312 = vector.extract_strided_slice %293 {offsets = [0, 256], sizes = [2, 64], strides = [1, 1]} : vector<2x384xf32> to vector<2x64xf32>
    %313 = vector.extract_strided_slice %295 {offsets = [0, 256], sizes = [2, 64], strides = [1, 1]} : vector<2x384xf32> to vector<2x64xf32>
    %314 = arith.addf %313, %29 : vector<2x64xf32>
    %315 = arith.mulf %303, %314 : vector<2x64xf32>
    %316 = arith.addf %312, %315 : vector<2x64xf32>
    %317 = math.tanh %316 : vector<2x64xf32>
    %cst_76 = arith.constant 1.000000e+00 : f32
    %318 = vector.broadcast %cst_76 : f32 to vector<2x64xf32>
    %319 = arith.subf %318, %311 : vector<2x64xf32>
    %320 = arith.mulf %319, %317 : vector<2x64xf32>
    %321 = arith.mulf %311, %229 : vector<2x64xf32>
    %322 = arith.addf %320, %321 : vector<2x64xf32>
    %323 = arith.truncf %290 : vector<2x64xf32> to vector<2x64xbf16>
    %cst_77 = arith.constant dense<0.000000e+00> : vector<2x384xf32>
    %324 = tpu.matmul %323, %7, %cst_77 {dimension_numbers = #tpu.dot_dimension_numbers<[1], [0], [0], [1], [0, 0, 1, 1], [], []>} : vector<2x64xbf16>, vector<64x384xbf16>, vector<2x384xf32> -> vector<2x384xf32>
    %325 = arith.addf %324, %13 : vector<2x384xf32>
    %326 = arith.truncf %261 : vector<2x64xf32> to vector<2x64xbf16>
    %cst_78 = arith.constant dense<0.000000e+00> : vector<2x384xf32>
    %327 = tpu.matmul %326, %3, %cst_78 {dimension_numbers = #tpu.dot_dimension_numbers<[1], [0], [0], [1], [0, 0, 1, 1], [], []>} : vector<2x64xbf16>, vector<64x384xbf16>, vector<2x384xf32> -> vector<2x384xf32>
    %328 = vector.extract_strided_slice %325 {offsets = [0, 0], sizes = [2, 64], strides = [1, 1]} : vector<2x384xf32> to vector<2x64xf32>
    %329 = vector.extract_strided_slice %327 {offsets = [0, 0], sizes = [2, 64], strides = [1, 1]} : vector<2x384xf32> to vector<2x64xf32>
    %330 = arith.addf %328, %329 : vector<2x64xf32>
    %331 = arith.negf %330 : vector<2x64xf32>
    %332 = math.exp %331 : vector<2x64xf32>
    %cst_79 = arith.constant 1.000000e+00 : f32
    %333 = vector.broadcast %cst_79 : f32 to vector<2x64xf32>
    %334 = arith.addf %333, %332 : vector<2x64xf32>
    %335 = arith.divf %333, %334 : vector<2x64xf32>
    %336 = vector.extract_strided_slice %325 {offsets = [0, 128], sizes = [2, 64], strides = [1, 1]} : vector<2x384xf32> to vector<2x64xf32>
    %337 = vector.extract_strided_slice %327 {offsets = [0, 128], sizes = [2, 64], strides = [1, 1]} : vector<2x384xf32> to vector<2x64xf32>
    %338 = arith.addf %336, %337 : vector<2x64xf32>
    %339 = arith.negf %338 : vector<2x64xf32>
    %340 = math.exp %339 : vector<2x64xf32>
    %cst_80 = arith.constant 1.000000e+00 : f32
    %341 = vector.broadcast %cst_80 : f32 to vector<2x64xf32>
    %342 = arith.addf %341, %340 : vector<2x64xf32>
    %343 = arith.divf %341, %342 : vector<2x64xf32>
    %344 = vector.extract_strided_slice %325 {offsets = [0, 256], sizes = [2, 64], strides = [1, 1]} : vector<2x384xf32> to vector<2x64xf32>
    %345 = vector.extract_strided_slice %327 {offsets = [0, 256], sizes = [2, 64], strides = [1, 1]} : vector<2x384xf32> to vector<2x64xf32>
    %346 = arith.addf %345, %25 : vector<2x64xf32>
    %347 = arith.mulf %335, %346 : vector<2x64xf32>
    %348 = arith.addf %344, %347 : vector<2x64xf32>
    %349 = math.tanh %348 : vector<2x64xf32>
    %cst_81 = arith.constant 1.000000e+00 : f32
    %350 = vector.broadcast %cst_81 : f32 to vector<2x64xf32>
    %351 = arith.subf %350, %343 : vector<2x64xf32>
    %352 = arith.mulf %351, %349 : vector<2x64xf32>
    %353 = arith.mulf %343, %261 : vector<2x64xf32>
    %354 = arith.addf %352, %353 : vector<2x64xf32>
    %355 = arith.truncf %290 : vector<2x64xf32> to vector<2x64xbf16>
    %cst_82 = arith.constant dense<0.000000e+00> : vector<2x384xf32>
    %356 = tpu.matmul %355, %1, %cst_82 {dimension_numbers = #tpu.dot_dimension_numbers<[1], [0], [0], [1], [0, 0, 1, 1], [], []>} : vector<2x64xbf16>, vector<64x384xbf16>, vector<2x384xf32> -> vector<2x384xf32>
    %357 = vector.extract_strided_slice %41 {offsets = [0, 0], sizes = [2, 64], strides = [1, 1]} : vector<2x384xf32> to vector<2x64xf32>
    %358 = vector.extract_strided_slice %356 {offsets = [0, 0], sizes = [2, 64], strides = [1, 1]} : vector<2x384xf32> to vector<2x64xf32>
    %359 = arith.addf %357, %358 : vector<2x64xf32>
    %360 = arith.negf %359 : vector<2x64xf32>
    %361 = math.exp %360 : vector<2x64xf32>
    %cst_83 = arith.constant 1.000000e+00 : f32
    %362 = vector.broadcast %cst_83 : f32 to vector<2x64xf32>
    %363 = arith.addf %362, %361 : vector<2x64xf32>
    %364 = arith.divf %362, %363 : vector<2x64xf32>
    %365 = vector.extract_strided_slice %41 {offsets = [0, 128], sizes = [2, 64], strides = [1, 1]} : vector<2x384xf32> to vector<2x64xf32>
    %366 = vector.extract_strided_slice %356 {offsets = [0, 128], sizes = [2, 64], strides = [1, 1]} : vector<2x384xf32> to vector<2x64xf32>
    %367 = arith.addf %365, %366 : vector<2x64xf32>
    %368 = arith.negf %367 : vector<2x64xf32>
    %369 = math.exp %368 : vector<2x64xf32>
    %cst_84 = arith.constant 1.000000e+00 : f32
    %370 = vector.broadcast %cst_84 : f32 to vector<2x64xf32>
    %371 = arith.addf %370, %369 : vector<2x64xf32>
    %372 = arith.divf %370, %371 : vector<2x64xf32>
    %373 = vector.extract_strided_slice %41 {offsets = [0, 256], sizes = [2, 64], strides = [1, 1]} : vector<2x384xf32> to vector<2x64xf32>
    %374 = vector.extract_strided_slice %356 {offsets = [0, 256], sizes = [2, 64], strides = [1, 1]} : vector<2x384xf32> to vector<2x64xf32>
    %375 = arith.addf %374, %21 : vector<2x64xf32>
    %376 = arith.mulf %364, %375 : vector<2x64xf32>
    %377 = arith.addf %373, %376 : vector<2x64xf32>
    %378 = math.tanh %377 : vector<2x64xf32>
    %cst_85 = arith.constant 1.000000e+00 : f32
    %379 = vector.broadcast %cst_85 : f32 to vector<2x64xf32>
    %380 = arith.subf %379, %372 : vector<2x64xf32>
    %381 = arith.mulf %380, %378 : vector<2x64xf32>
    %382 = arith.mulf %372, %290 : vector<2x64xf32>
    %383 = arith.addf %381, %382 : vector<2x64xf32>
    %384 = arith.truncf %354 : vector<2x64xf32> to vector<2x64xbf16>
    %cst_86 = arith.constant dense<0.000000e+00> : vector<2x384xf32>
    %385 = tpu.matmul %384, %9, %cst_86 {dimension_numbers = #tpu.dot_dimension_numbers<[1], [0], [0], [1], [0, 0, 1, 1], [], []>} : vector<2x64xbf16>, vector<64x384xbf16>, vector<2x384xf32> -> vector<2x384xf32>
    %386 = arith.addf %385, %17 : vector<2x384xf32>
    %387 = arith.truncf %322 : vector<2x64xf32> to vector<2x64xbf16>
    %cst_87 = arith.constant dense<0.000000e+00> : vector<2x384xf32>
    %388 = tpu.matmul %387, %5, %cst_87 {dimension_numbers = #tpu.dot_dimension_numbers<[1], [0], [0], [1], [0, 0, 1, 1], [], []>} : vector<2x64xbf16>, vector<64x384xbf16>, vector<2x384xf32> -> vector<2x384xf32>
    %389 = vector.extract_strided_slice %386 {offsets = [0, 0], sizes = [2, 64], strides = [1, 1]} : vector<2x384xf32> to vector<2x64xf32>
    %390 = vector.extract_strided_slice %388 {offsets = [0, 0], sizes = [2, 64], strides = [1, 1]} : vector<2x384xf32> to vector<2x64xf32>
    %391 = arith.addf %389, %390 : vector<2x64xf32>
    %392 = arith.negf %391 : vector<2x64xf32>
    %393 = math.exp %392 : vector<2x64xf32>
    %cst_88 = arith.constant 1.000000e+00 : f32
    %394 = vector.broadcast %cst_88 : f32 to vector<2x64xf32>
    %395 = arith.addf %394, %393 : vector<2x64xf32>
    %396 = arith.divf %394, %395 : vector<2x64xf32>
    %397 = vector.extract_strided_slice %386 {offsets = [0, 128], sizes = [2, 64], strides = [1, 1]} : vector<2x384xf32> to vector<2x64xf32>
    %398 = vector.extract_strided_slice %388 {offsets = [0, 128], sizes = [2, 64], strides = [1, 1]} : vector<2x384xf32> to vector<2x64xf32>
    %399 = arith.addf %397, %398 : vector<2x64xf32>
    %400 = arith.negf %399 : vector<2x64xf32>
    %401 = math.exp %400 : vector<2x64xf32>
    %cst_89 = arith.constant 1.000000e+00 : f32
    %402 = vector.broadcast %cst_89 : f32 to vector<2x64xf32>
    %403 = arith.addf %402, %401 : vector<2x64xf32>
    %404 = arith.divf %402, %403 : vector<2x64xf32>
    %405 = vector.extract_strided_slice %386 {offsets = [0, 256], sizes = [2, 64], strides = [1, 1]} : vector<2x384xf32> to vector<2x64xf32>
    %406 = vector.extract_strided_slice %388 {offsets = [0, 256], sizes = [2, 64], strides = [1, 1]} : vector<2x384xf32> to vector<2x64xf32>
    %407 = arith.addf %406, %29 : vector<2x64xf32>
    %408 = arith.mulf %396, %407 : vector<2x64xf32>
    %409 = arith.addf %405, %408 : vector<2x64xf32>
    %410 = math.tanh %409 : vector<2x64xf32>
    %cst_90 = arith.constant 1.000000e+00 : f32
    %411 = vector.broadcast %cst_90 : f32 to vector<2x64xf32>
    %412 = arith.subf %411, %404 : vector<2x64xf32>
    %413 = arith.mulf %412, %410 : vector<2x64xf32>
    %414 = arith.mulf %404, %322 : vector<2x64xf32>
    %415 = arith.addf %413, %414 : vector<2x64xf32>
    %416 = arith.truncf %383 : vector<2x64xf32> to vector<2x64xbf16>
    %cst_91 = arith.constant dense<0.000000e+00> : vector<2x384xf32>
    %417 = tpu.matmul %416, %7, %cst_91 {dimension_numbers = #tpu.dot_dimension_numbers<[1], [0], [0], [1], [0, 0, 1, 1], [], []>} : vector<2x64xbf16>, vector<64x384xbf16>, vector<2x384xf32> -> vector<2x384xf32>
    %418 = arith.addf %417, %13 : vector<2x384xf32>
    %419 = arith.truncf %354 : vector<2x64xf32> to vector<2x64xbf16>
    %cst_92 = arith.constant dense<0.000000e+00> : vector<2x384xf32>
    %420 = tpu.matmul %419, %3, %cst_92 {dimension_numbers = #tpu.dot_dimension_numbers<[1], [0], [0], [1], [0, 0, 1, 1], [], []>} : vector<2x64xbf16>, vector<64x384xbf16>, vector<2x384xf32> -> vector<2x384xf32>
    %421 = vector.extract_strided_slice %418 {offsets = [0, 0], sizes = [2, 64], strides = [1, 1]} : vector<2x384xf32> to vector<2x64xf32>
    %422 = vector.extract_strided_slice %420 {offsets = [0, 0], sizes = [2, 64], strides = [1, 1]} : vector<2x384xf32> to vector<2x64xf32>
    %423 = arith.addf %421, %422 : vector<2x64xf32>
    %424 = arith.negf %423 : vector<2x64xf32>
    %425 = math.exp %424 : vector<2x64xf32>
    %cst_93 = arith.constant 1.000000e+00 : f32
    %426 = vector.broadcast %cst_93 : f32 to vector<2x64xf32>
    %427 = arith.addf %426, %425 : vector<2x64xf32>
    %428 = arith.divf %426, %427 : vector<2x64xf32>
    %429 = vector.extract_strided_slice %418 {offsets = [0, 128], sizes = [2, 64], strides = [1, 1]} : vector<2x384xf32> to vector<2x64xf32>
    %430 = vector.extract_strided_slice %420 {offsets = [0, 128], sizes = [2, 64], strides = [1, 1]} : vector<2x384xf32> to vector<2x64xf32>
    %431 = arith.addf %429, %430 : vector<2x64xf32>
    %432 = arith.negf %431 : vector<2x64xf32>
    %433 = math.exp %432 : vector<2x64xf32>
    %cst_94 = arith.constant 1.000000e+00 : f32
    %434 = vector.broadcast %cst_94 : f32 to vector<2x64xf32>
    %435 = arith.addf %434, %433 : vector<2x64xf32>
    %436 = arith.divf %434, %435 : vector<2x64xf32>
    %437 = vector.extract_strided_slice %418 {offsets = [0, 256], sizes = [2, 64], strides = [1, 1]} : vector<2x384xf32> to vector<2x64xf32>
    %438 = vector.extract_strided_slice %420 {offsets = [0, 256], sizes = [2, 64], strides = [1, 1]} : vector<2x384xf32> to vector<2x64xf32>
    %439 = arith.addf %438, %25 : vector<2x64xf32>
    %440 = arith.mulf %428, %439 : vector<2x64xf32>
    %441 = arith.addf %437, %440 : vector<2x64xf32>
    %442 = math.tanh %441 : vector<2x64xf32>
    %cst_95 = arith.constant 1.000000e+00 : f32
    %443 = vector.broadcast %cst_95 : f32 to vector<2x64xf32>
    %444 = arith.subf %443, %436 : vector<2x64xf32>
    %445 = arith.mulf %444, %442 : vector<2x64xf32>
    %446 = arith.mulf %436, %354 : vector<2x64xf32>
    %447 = arith.addf %445, %446 : vector<2x64xf32>
    %448 = arith.truncf %383 : vector<2x64xf32> to vector<2x64xbf16>
    %cst_96 = arith.constant dense<0.000000e+00> : vector<2x384xf32>
    %449 = tpu.matmul %448, %1, %cst_96 {dimension_numbers = #tpu.dot_dimension_numbers<[1], [0], [0], [1], [0, 0, 1, 1], [], []>} : vector<2x64xbf16>, vector<64x384xbf16>, vector<2x384xf32> -> vector<2x384xf32>
    %450 = vector.extract_strided_slice %42 {offsets = [0, 0], sizes = [2, 64], strides = [1, 1]} : vector<2x384xf32> to vector<2x64xf32>
    %451 = vector.extract_strided_slice %449 {offsets = [0, 0], sizes = [2, 64], strides = [1, 1]} : vector<2x384xf32> to vector<2x64xf32>
    %452 = arith.addf %450, %451 : vector<2x64xf32>
    %453 = arith.negf %452 : vector<2x64xf32>
    %454 = math.exp %453 : vector<2x64xf32>
    %cst_97 = arith.constant 1.000000e+00 : f32
    %455 = vector.broadcast %cst_97 : f32 to vector<2x64xf32>
    %456 = arith.addf %455, %454 : vector<2x64xf32>
    %457 = arith.divf %455, %456 : vector<2x64xf32>
    %458 = vector.extract_strided_slice %42 {offsets = [0, 128], sizes = [2, 64], strides = [1, 1]} : vector<2x384xf32> to vector<2x64xf32>
    %459 = vector.extract_strided_slice %449 {offsets = [0, 128], sizes = [2, 64], strides = [1, 1]} : vector<2x384xf32> to vector<2x64xf32>
    %460 = arith.addf %458, %459 : vector<2x64xf32>
    %461 = arith.negf %460 : vector<2x64xf32>
    %462 = math.exp %461 : vector<2x64xf32>
    %cst_98 = arith.constant 1.000000e+00 : f32
    %463 = vector.broadcast %cst_98 : f32 to vector<2x64xf32>
    %464 = arith.addf %463, %462 : vector<2x64xf32>
    %465 = arith.divf %463, %464 : vector<2x64xf32>
    %466 = vector.extract_strided_slice %42 {offsets = [0, 256], sizes = [2, 64], strides = [1, 1]} : vector<2x384xf32> to vector<2x64xf32>
    %467 = vector.extract_strided_slice %449 {offsets = [0, 256], sizes = [2, 64], strides = [1, 1]} : vector<2x384xf32> to vector<2x64xf32>
    %468 = arith.addf %467, %21 : vector<2x64xf32>
    %469 = arith.mulf %457, %468 : vector<2x64xf32>
    %470 = arith.addf %466, %469 : vector<2x64xf32>
    %471 = math.tanh %470 : vector<2x64xf32>
    %cst_99 = arith.constant 1.000000e+00 : f32
    %472 = vector.broadcast %cst_99 : f32 to vector<2x64xf32>
    %473 = arith.subf %472, %465 : vector<2x64xf32>
    %474 = arith.mulf %473, %471 : vector<2x64xf32>
    %475 = arith.mulf %465, %383 : vector<2x64xf32>
    %476 = arith.addf %474, %475 : vector<2x64xf32>
    %477 = arith.truncf %447 : vector<2x64xf32> to vector<2x64xbf16>
    %cst_100 = arith.constant dense<0.000000e+00> : vector<2x384xf32>
    %478 = tpu.matmul %477, %9, %cst_100 {dimension_numbers = #tpu.dot_dimension_numbers<[1], [0], [0], [1], [0, 0, 1, 1], [], []>} : vector<2x64xbf16>, vector<64x384xbf16>, vector<2x384xf32> -> vector<2x384xf32>
    %479 = arith.addf %478, %17 : vector<2x384xf32>
    %480 = arith.truncf %415 : vector<2x64xf32> to vector<2x64xbf16>
    %cst_101 = arith.constant dense<0.000000e+00> : vector<2x384xf32>
    %481 = tpu.matmul %480, %5, %cst_101 {dimension_numbers = #tpu.dot_dimension_numbers<[1], [0], [0], [1], [0, 0, 1, 1], [], []>} : vector<2x64xbf16>, vector<64x384xbf16>, vector<2x384xf32> -> vector<2x384xf32>
    %482 = vector.extract_strided_slice %479 {offsets = [0, 0], sizes = [2, 64], strides = [1, 1]} : vector<2x384xf32> to vector<2x64xf32>
    %483 = vector.extract_strided_slice %481 {offsets = [0, 0], sizes = [2, 64], strides = [1, 1]} : vector<2x384xf32> to vector<2x64xf32>
    %484 = arith.addf %482, %483 : vector<2x64xf32>
    %485 = arith.negf %484 : vector<2x64xf32>
    %486 = math.exp %485 : vector<2x64xf32>
    %cst_102 = arith.constant 1.000000e+00 : f32
    %487 = vector.broadcast %cst_102 : f32 to vector<2x64xf32>
    %488 = arith.addf %487, %486 : vector<2x64xf32>
    %489 = arith.divf %487, %488 : vector<2x64xf32>
    %490 = vector.extract_strided_slice %479 {offsets = [0, 128], sizes = [2, 64], strides = [1, 1]} : vector<2x384xf32> to vector<2x64xf32>
    %491 = vector.extract_strided_slice %481 {offsets = [0, 128], sizes = [2, 64], strides = [1, 1]} : vector<2x384xf32> to vector<2x64xf32>
    %492 = arith.addf %490, %491 : vector<2x64xf32>
    %493 = arith.negf %492 : vector<2x64xf32>
    %494 = math.exp %493 : vector<2x64xf32>
    %cst_103 = arith.constant 1.000000e+00 : f32
    %495 = vector.broadcast %cst_103 : f32 to vector<2x64xf32>
    %496 = arith.addf %495, %494 : vector<2x64xf32>
    %497 = arith.divf %495, %496 : vector<2x64xf32>
    %498 = vector.extract_strided_slice %479 {offsets = [0, 256], sizes = [2, 64], strides = [1, 1]} : vector<2x384xf32> to vector<2x64xf32>
    %499 = vector.extract_strided_slice %481 {offsets = [0, 256], sizes = [2, 64], strides = [1, 1]} : vector<2x384xf32> to vector<2x64xf32>
    %500 = arith.addf %499, %29 : vector<2x64xf32>
    %501 = arith.mulf %489, %500 : vector<2x64xf32>
    %502 = arith.addf %498, %501 : vector<2x64xf32>
    %503 = math.tanh %502 : vector<2x64xf32>
    %cst_104 = arith.constant 1.000000e+00 : f32
    %504 = vector.broadcast %cst_104 : f32 to vector<2x64xf32>
    %505 = arith.subf %504, %497 : vector<2x64xf32>
    %506 = arith.mulf %505, %503 : vector<2x64xf32>
    %507 = arith.mulf %497, %415 : vector<2x64xf32>
    %508 = arith.addf %506, %507 : vector<2x64xf32>
    %509 = arith.truncf %476 : vector<2x64xf32> to vector<2x64xbf16>
    %cst_105 = arith.constant dense<0.000000e+00> : vector<2x384xf32>
    %510 = tpu.matmul %509, %7, %cst_105 {dimension_numbers = #tpu.dot_dimension_numbers<[1], [0], [0], [1], [0, 0, 1, 1], [], []>} : vector<2x64xbf16>, vector<64x384xbf16>, vector<2x384xf32> -> vector<2x384xf32>
    %511 = arith.addf %510, %13 : vector<2x384xf32>
    %512 = arith.truncf %447 : vector<2x64xf32> to vector<2x64xbf16>
    %cst_106 = arith.constant dense<0.000000e+00> : vector<2x384xf32>
    %513 = tpu.matmul %512, %3, %cst_106 {dimension_numbers = #tpu.dot_dimension_numbers<[1], [0], [0], [1], [0, 0, 1, 1], [], []>} : vector<2x64xbf16>, vector<64x384xbf16>, vector<2x384xf32> -> vector<2x384xf32>
    %514 = vector.extract_strided_slice %511 {offsets = [0, 0], sizes = [2, 64], strides = [1, 1]} : vector<2x384xf32> to vector<2x64xf32>
    %515 = vector.extract_strided_slice %513 {offsets = [0, 0], sizes = [2, 64], strides = [1, 1]} : vector<2x384xf32> to vector<2x64xf32>
    %516 = arith.addf %514, %515 : vector<2x64xf32>
    %517 = arith.negf %516 : vector<2x64xf32>
    %518 = math.exp %517 : vector<2x64xf32>
    %cst_107 = arith.constant 1.000000e+00 : f32
    %519 = vector.broadcast %cst_107 : f32 to vector<2x64xf32>
    %520 = arith.addf %519, %518 : vector<2x64xf32>
    %521 = arith.divf %519, %520 : vector<2x64xf32>
    %522 = vector.extract_strided_slice %511 {offsets = [0, 128], sizes = [2, 64], strides = [1, 1]} : vector<2x384xf32> to vector<2x64xf32>
    %523 = vector.extract_strided_slice %513 {offsets = [0, 128], sizes = [2, 64], strides = [1, 1]} : vector<2x384xf32> to vector<2x64xf32>
    %524 = arith.addf %522, %523 : vector<2x64xf32>
    %525 = arith.negf %524 : vector<2x64xf32>
    %526 = math.exp %525 : vector<2x64xf32>
    %cst_108 = arith.constant 1.000000e+00 : f32
    %527 = vector.broadcast %cst_108 : f32 to vector<2x64xf32>
    %528 = arith.addf %527, %526 : vector<2x64xf32>
    %529 = arith.divf %527, %528 : vector<2x64xf32>
    %530 = vector.extract_strided_slice %511 {offsets = [0, 256], sizes = [2, 64], strides = [1, 1]} : vector<2x384xf32> to vector<2x64xf32>
    %531 = vector.extract_strided_slice %513 {offsets = [0, 256], sizes = [2, 64], strides = [1, 1]} : vector<2x384xf32> to vector<2x64xf32>
    %532 = arith.addf %531, %25 : vector<2x64xf32>
    %533 = arith.mulf %521, %532 : vector<2x64xf32>
    %534 = arith.addf %530, %533 : vector<2x64xf32>
    %535 = math.tanh %534 : vector<2x64xf32>
    %cst_109 = arith.constant 1.000000e+00 : f32
    %536 = vector.broadcast %cst_109 : f32 to vector<2x64xf32>
    %537 = arith.subf %536, %529 : vector<2x64xf32>
    %538 = arith.mulf %537, %535 : vector<2x64xf32>
    %539 = arith.mulf %529, %447 : vector<2x64xf32>
    %540 = arith.addf %538, %539 : vector<2x64xf32>
    %541 = arith.truncf %476 : vector<2x64xf32> to vector<2x64xbf16>
    %cst_110 = arith.constant dense<0.000000e+00> : vector<2x384xf32>
    %542 = tpu.matmul %541, %1, %cst_110 {dimension_numbers = #tpu.dot_dimension_numbers<[1], [0], [0], [1], [0, 0, 1, 1], [], []>} : vector<2x64xbf16>, vector<64x384xbf16>, vector<2x384xf32> -> vector<2x384xf32>
    %543 = vector.extract_strided_slice %43 {offsets = [0, 0], sizes = [2, 64], strides = [1, 1]} : vector<2x384xf32> to vector<2x64xf32>
    %544 = vector.extract_strided_slice %542 {offsets = [0, 0], sizes = [2, 64], strides = [1, 1]} : vector<2x384xf32> to vector<2x64xf32>
    %545 = arith.addf %543, %544 : vector<2x64xf32>
    %546 = arith.negf %545 : vector<2x64xf32>
    %547 = math.exp %546 : vector<2x64xf32>
    %cst_111 = arith.constant 1.000000e+00 : f32
    %548 = vector.broadcast %cst_111 : f32 to vector<2x64xf32>
    %549 = arith.addf %548, %547 : vector<2x64xf32>
    %550 = arith.divf %548, %549 : vector<2x64xf32>
    %551 = vector.extract_strided_slice %43 {offsets = [0, 128], sizes = [2, 64], strides = [1, 1]} : vector<2x384xf32> to vector<2x64xf32>
    %552 = vector.extract_strided_slice %542 {offsets = [0, 128], sizes = [2, 64], strides = [1, 1]} : vector<2x384xf32> to vector<2x64xf32>
    %553 = arith.addf %551, %552 : vector<2x64xf32>
    %554 = arith.negf %553 : vector<2x64xf32>
    %555 = math.exp %554 : vector<2x64xf32>
    %cst_112 = arith.constant 1.000000e+00 : f32
    %556 = vector.broadcast %cst_112 : f32 to vector<2x64xf32>
    %557 = arith.addf %556, %555 : vector<2x64xf32>
    %558 = arith.divf %556, %557 : vector<2x64xf32>
    %559 = vector.extract_strided_slice %43 {offsets = [0, 256], sizes = [2, 64], strides = [1, 1]} : vector<2x384xf32> to vector<2x64xf32>
    %560 = vector.extract_strided_slice %542 {offsets = [0, 256], sizes = [2, 64], strides = [1, 1]} : vector<2x384xf32> to vector<2x64xf32>
    %561 = arith.addf %560, %21 : vector<2x64xf32>
    %562 = arith.mulf %550, %561 : vector<2x64xf32>
    %563 = arith.addf %559, %562 : vector<2x64xf32>
    %564 = math.tanh %563 : vector<2x64xf32>
    %cst_113 = arith.constant 1.000000e+00 : f32
    %565 = vector.broadcast %cst_113 : f32 to vector<2x64xf32>
    %566 = arith.subf %565, %558 : vector<2x64xf32>
    %567 = arith.mulf %566, %564 : vector<2x64xf32>
    %568 = arith.mulf %558, %476 : vector<2x64xf32>
    %569 = arith.addf %567, %568 : vector<2x64xf32>
    %570 = arith.truncf %540 : vector<2x64xf32> to vector<2x64xbf16>
    %cst_114 = arith.constant dense<0.000000e+00> : vector<2x384xf32>
    %571 = tpu.matmul %570, %9, %cst_114 {dimension_numbers = #tpu.dot_dimension_numbers<[1], [0], [0], [1], [0, 0, 1, 1], [], []>} : vector<2x64xbf16>, vector<64x384xbf16>, vector<2x384xf32> -> vector<2x384xf32>
    %572 = arith.addf %571, %17 : vector<2x384xf32>
    %573 = arith.truncf %508 : vector<2x64xf32> to vector<2x64xbf16>
    %cst_115 = arith.constant dense<0.000000e+00> : vector<2x384xf32>
    %574 = tpu.matmul %573, %5, %cst_115 {dimension_numbers = #tpu.dot_dimension_numbers<[1], [0], [0], [1], [0, 0, 1, 1], [], []>} : vector<2x64xbf16>, vector<64x384xbf16>, vector<2x384xf32> -> vector<2x384xf32>
    %575 = vector.extract_strided_slice %572 {offsets = [0, 0], sizes = [2, 64], strides = [1, 1]} : vector<2x384xf32> to vector<2x64xf32>
    %576 = vector.extract_strided_slice %574 {offsets = [0, 0], sizes = [2, 64], strides = [1, 1]} : vector<2x384xf32> to vector<2x64xf32>
    %577 = arith.addf %575, %576 : vector<2x64xf32>
    %578 = arith.negf %577 : vector<2x64xf32>
    %579 = math.exp %578 : vector<2x64xf32>
    %cst_116 = arith.constant 1.000000e+00 : f32
    %580 = vector.broadcast %cst_116 : f32 to vector<2x64xf32>
    %581 = arith.addf %580, %579 : vector<2x64xf32>
    %582 = arith.divf %580, %581 : vector<2x64xf32>
    %583 = vector.extract_strided_slice %572 {offsets = [0, 128], sizes = [2, 64], strides = [1, 1]} : vector<2x384xf32> to vector<2x64xf32>
    %584 = vector.extract_strided_slice %574 {offsets = [0, 128], sizes = [2, 64], strides = [1, 1]} : vector<2x384xf32> to vector<2x64xf32>
    %585 = arith.addf %583, %584 : vector<2x64xf32>
    %586 = arith.negf %585 : vector<2x64xf32>
    %587 = math.exp %586 : vector<2x64xf32>
    %cst_117 = arith.constant 1.000000e+00 : f32
    %588 = vector.broadcast %cst_117 : f32 to vector<2x64xf32>
    %589 = arith.addf %588, %587 : vector<2x64xf32>
    %590 = arith.divf %588, %589 : vector<2x64xf32>
    %591 = vector.extract_strided_slice %572 {offsets = [0, 256], sizes = [2, 64], strides = [1, 1]} : vector<2x384xf32> to vector<2x64xf32>
    %592 = vector.extract_strided_slice %574 {offsets = [0, 256], sizes = [2, 64], strides = [1, 1]} : vector<2x384xf32> to vector<2x64xf32>
    %593 = arith.addf %592, %29 : vector<2x64xf32>
    %594 = arith.mulf %582, %593 : vector<2x64xf32>
    %595 = arith.addf %591, %594 : vector<2x64xf32>
    %596 = math.tanh %595 : vector<2x64xf32>
    %cst_118 = arith.constant 1.000000e+00 : f32
    %597 = vector.broadcast %cst_118 : f32 to vector<2x64xf32>
    %598 = arith.subf %597, %590 : vector<2x64xf32>
    %599 = arith.mulf %598, %596 : vector<2x64xf32>
    %600 = arith.mulf %590, %508 : vector<2x64xf32>
    %601 = arith.addf %599, %600 : vector<2x64xf32>
    %602 = arith.truncf %569 : vector<2x64xf32> to vector<2x64xbf16>
    %cst_119 = arith.constant dense<0.000000e+00> : vector<2x384xf32>
    %603 = tpu.matmul %602, %7, %cst_119 {dimension_numbers = #tpu.dot_dimension_numbers<[1], [0], [0], [1], [0, 0, 1, 1], [], []>} : vector<2x64xbf16>, vector<64x384xbf16>, vector<2x384xf32> -> vector<2x384xf32>
    %604 = arith.addf %603, %13 : vector<2x384xf32>
    %605 = arith.truncf %540 : vector<2x64xf32> to vector<2x64xbf16>
    %cst_120 = arith.constant dense<0.000000e+00> : vector<2x384xf32>
    %606 = tpu.matmul %605, %3, %cst_120 {dimension_numbers = #tpu.dot_dimension_numbers<[1], [0], [0], [1], [0, 0, 1, 1], [], []>} : vector<2x64xbf16>, vector<64x384xbf16>, vector<2x384xf32> -> vector<2x384xf32>
    %607 = vector.extract_strided_slice %604 {offsets = [0, 0], sizes = [2, 64], strides = [1, 1]} : vector<2x384xf32> to vector<2x64xf32>
    %608 = vector.extract_strided_slice %606 {offsets = [0, 0], sizes = [2, 64], strides = [1, 1]} : vector<2x384xf32> to vector<2x64xf32>
    %609 = arith.addf %607, %608 : vector<2x64xf32>
    %610 = arith.negf %609 : vector<2x64xf32>
    %611 = math.exp %610 : vector<2x64xf32>
    %cst_121 = arith.constant 1.000000e+00 : f32
    %612 = vector.broadcast %cst_121 : f32 to vector<2x64xf32>
    %613 = arith.addf %612, %611 : vector<2x64xf32>
    %614 = arith.divf %612, %613 : vector<2x64xf32>
    %615 = vector.extract_strided_slice %604 {offsets = [0, 128], sizes = [2, 64], strides = [1, 1]} : vector<2x384xf32> to vector<2x64xf32>
    %616 = vector.extract_strided_slice %606 {offsets = [0, 128], sizes = [2, 64], strides = [1, 1]} : vector<2x384xf32> to vector<2x64xf32>
    %617 = arith.addf %615, %616 : vector<2x64xf32>
    %618 = arith.negf %617 : vector<2x64xf32>
    %619 = math.exp %618 : vector<2x64xf32>
    %cst_122 = arith.constant 1.000000e+00 : f32
    %620 = vector.broadcast %cst_122 : f32 to vector<2x64xf32>
    %621 = arith.addf %620, %619 : vector<2x64xf32>
    %622 = arith.divf %620, %621 : vector<2x64xf32>
    %623 = vector.extract_strided_slice %604 {offsets = [0, 256], sizes = [2, 64], strides = [1, 1]} : vector<2x384xf32> to vector<2x64xf32>
    %624 = vector.extract_strided_slice %606 {offsets = [0, 256], sizes = [2, 64], strides = [1, 1]} : vector<2x384xf32> to vector<2x64xf32>
    %625 = arith.addf %624, %25 : vector<2x64xf32>
    %626 = arith.mulf %614, %625 : vector<2x64xf32>
    %627 = arith.addf %623, %626 : vector<2x64xf32>
    %628 = math.tanh %627 : vector<2x64xf32>
    %cst_123 = arith.constant 1.000000e+00 : f32
    %629 = vector.broadcast %cst_123 : f32 to vector<2x64xf32>
    %630 = arith.subf %629, %622 : vector<2x64xf32>
    %631 = arith.mulf %630, %628 : vector<2x64xf32>
    %632 = arith.mulf %622, %540 : vector<2x64xf32>
    %633 = arith.addf %631, %632 : vector<2x64xf32>
    %634 = arith.truncf %569 : vector<2x64xf32> to vector<2x64xbf16>
    %cst_124 = arith.constant dense<0.000000e+00> : vector<2x384xf32>
    %635 = tpu.matmul %634, %1, %cst_124 {dimension_numbers = #tpu.dot_dimension_numbers<[1], [0], [0], [1], [0, 0, 1, 1], [], []>} : vector<2x64xbf16>, vector<64x384xbf16>, vector<2x384xf32> -> vector<2x384xf32>
    %636 = vector.extract_strided_slice %44 {offsets = [0, 0], sizes = [2, 64], strides = [1, 1]} : vector<2x384xf32> to vector<2x64xf32>
    %637 = vector.extract_strided_slice %635 {offsets = [0, 0], sizes = [2, 64], strides = [1, 1]} : vector<2x384xf32> to vector<2x64xf32>
    %638 = arith.addf %636, %637 : vector<2x64xf32>
    %639 = arith.negf %638 : vector<2x64xf32>
    %640 = math.exp %639 : vector<2x64xf32>
    %cst_125 = arith.constant 1.000000e+00 : f32
    %641 = vector.broadcast %cst_125 : f32 to vector<2x64xf32>
    %642 = arith.addf %641, %640 : vector<2x64xf32>
    %643 = arith.divf %641, %642 : vector<2x64xf32>
    %644 = vector.extract_strided_slice %44 {offsets = [0, 128], sizes = [2, 64], strides = [1, 1]} : vector<2x384xf32> to vector<2x64xf32>
    %645 = vector.extract_strided_slice %635 {offsets = [0, 128], sizes = [2, 64], strides = [1, 1]} : vector<2x384xf32> to vector<2x64xf32>
    %646 = arith.addf %644, %645 : vector<2x64xf32>
    %647 = arith.negf %646 : vector<2x64xf32>
    %648 = math.exp %647 : vector<2x64xf32>
    %cst_126 = arith.constant 1.000000e+00 : f32
    %649 = vector.broadcast %cst_126 : f32 to vector<2x64xf32>
    %650 = arith.addf %649, %648 : vector<2x64xf32>
    %651 = arith.divf %649, %650 : vector<2x64xf32>
    %652 = vector.extract_strided_slice %44 {offsets = [0, 256], sizes = [2, 64], strides = [1, 1]} : vector<2x384xf32> to vector<2x64xf32>
    %653 = vector.extract_strided_slice %635 {offsets = [0, 256], sizes = [2, 64], strides = [1, 1]} : vector<2x384xf32> to vector<2x64xf32>
    %654 = arith.addf %653, %21 : vector<2x64xf32>
    %655 = arith.mulf %643, %654 : vector<2x64xf32>
    %656 = arith.addf %652, %655 : vector<2x64xf32>
    %657 = math.tanh %656 : vector<2x64xf32>
    %cst_127 = arith.constant 1.000000e+00 : f32
    %658 = vector.broadcast %cst_127 : f32 to vector<2x64xf32>
    %659 = arith.subf %658, %651 : vector<2x64xf32>
    %660 = arith.mulf %659, %657 : vector<2x64xf32>
    %661 = arith.mulf %651, %569 : vector<2x64xf32>
    %662 = arith.addf %660, %661 : vector<2x64xf32>
    %663 = arith.truncf %633 : vector<2x64xf32> to vector<2x64xbf16>
    %cst_128 = arith.constant dense<0.000000e+00> : vector<2x384xf32>
    %664 = tpu.matmul %663, %9, %cst_128 {dimension_numbers = #tpu.dot_dimension_numbers<[1], [0], [0], [1], [0, 0, 1, 1], [], []>} : vector<2x64xbf16>, vector<64x384xbf16>, vector<2x384xf32> -> vector<2x384xf32>
    %665 = arith.addf %664, %17 : vector<2x384xf32>
    %666 = arith.truncf %601 : vector<2x64xf32> to vector<2x64xbf16>
    %cst_129 = arith.constant dense<0.000000e+00> : vector<2x384xf32>
    %667 = tpu.matmul %666, %5, %cst_129 {dimension_numbers = #tpu.dot_dimension_numbers<[1], [0], [0], [1], [0, 0, 1, 1], [], []>} : vector<2x64xbf16>, vector<64x384xbf16>, vector<2x384xf32> -> vector<2x384xf32>
    %668 = vector.extract_strided_slice %665 {offsets = [0, 0], sizes = [2, 64], strides = [1, 1]} : vector<2x384xf32> to vector<2x64xf32>
    %669 = vector.extract_strided_slice %667 {offsets = [0, 0], sizes = [2, 64], strides = [1, 1]} : vector<2x384xf32> to vector<2x64xf32>
    %670 = arith.addf %668, %669 : vector<2x64xf32>
    %671 = arith.negf %670 : vector<2x64xf32>
    %672 = math.exp %671 : vector<2x64xf32>
    %cst_130 = arith.constant 1.000000e+00 : f32
    %673 = vector.broadcast %cst_130 : f32 to vector<2x64xf32>
    %674 = arith.addf %673, %672 : vector<2x64xf32>
    %675 = arith.divf %673, %674 : vector<2x64xf32>
    %676 = vector.extract_strided_slice %665 {offsets = [0, 128], sizes = [2, 64], strides = [1, 1]} : vector<2x384xf32> to vector<2x64xf32>
    %677 = vector.extract_strided_slice %667 {offsets = [0, 128], sizes = [2, 64], strides = [1, 1]} : vector<2x384xf32> to vector<2x64xf32>
    %678 = arith.addf %676, %677 : vector<2x64xf32>
    %679 = arith.negf %678 : vector<2x64xf32>
    %680 = math.exp %679 : vector<2x64xf32>
    %cst_131 = arith.constant 1.000000e+00 : f32
    %681 = vector.broadcast %cst_131 : f32 to vector<2x64xf32>
    %682 = arith.addf %681, %680 : vector<2x64xf32>
    %683 = arith.divf %681, %682 : vector<2x64xf32>
    %684 = vector.extract_strided_slice %665 {offsets = [0, 256], sizes = [2, 64], strides = [1, 1]} : vector<2x384xf32> to vector<2x64xf32>
    %685 = vector.extract_strided_slice %667 {offsets = [0, 256], sizes = [2, 64], strides = [1, 1]} : vector<2x384xf32> to vector<2x64xf32>
    %686 = arith.addf %685, %29 : vector<2x64xf32>
    %687 = arith.mulf %675, %686 : vector<2x64xf32>
    %688 = arith.addf %684, %687 : vector<2x64xf32>
    %689 = math.tanh %688 : vector<2x64xf32>
    %cst_132 = arith.constant 1.000000e+00 : f32
    %690 = vector.broadcast %cst_132 : f32 to vector<2x64xf32>
    %691 = arith.subf %690, %683 : vector<2x64xf32>
    %692 = arith.mulf %691, %689 : vector<2x64xf32>
    %693 = arith.mulf %683, %601 : vector<2x64xf32>
    %694 = arith.addf %692, %693 : vector<2x64xf32>
    %695 = arith.truncf %662 : vector<2x64xf32> to vector<2x64xbf16>
    %cst_133 = arith.constant dense<0.000000e+00> : vector<2x384xf32>
    %696 = tpu.matmul %695, %7, %cst_133 {dimension_numbers = #tpu.dot_dimension_numbers<[1], [0], [0], [1], [0, 0, 1, 1], [], []>} : vector<2x64xbf16>, vector<64x384xbf16>, vector<2x384xf32> -> vector<2x384xf32>
    %697 = arith.addf %696, %13 : vector<2x384xf32>
    %698 = arith.truncf %633 : vector<2x64xf32> to vector<2x64xbf16>
    %cst_134 = arith.constant dense<0.000000e+00> : vector<2x384xf32>
    %699 = tpu.matmul %698, %3, %cst_134 {dimension_numbers = #tpu.dot_dimension_numbers<[1], [0], [0], [1], [0, 0, 1, 1], [], []>} : vector<2x64xbf16>, vector<64x384xbf16>, vector<2x384xf32> -> vector<2x384xf32>
    %700 = vector.extract_strided_slice %697 {offsets = [0, 0], sizes = [2, 64], strides = [1, 1]} : vector<2x384xf32> to vector<2x64xf32>
    %701 = vector.extract_strided_slice %699 {offsets = [0, 0], sizes = [2, 64], strides = [1, 1]} : vector<2x384xf32> to vector<2x64xf32>
    %702 = arith.addf %700, %701 : vector<2x64xf32>
    %703 = arith.negf %702 : vector<2x64xf32>
    %704 = math.exp %703 : vector<2x64xf32>
    %cst_135 = arith.constant 1.000000e+00 : f32
    %705 = vector.broadcast %cst_135 : f32 to vector<2x64xf32>
    %706 = arith.addf %705, %704 : vector<2x64xf32>
    %707 = arith.divf %705, %706 : vector<2x64xf32>
    %708 = vector.extract_strided_slice %697 {offsets = [0, 128], sizes = [2, 64], strides = [1, 1]} : vector<2x384xf32> to vector<2x64xf32>
    %709 = vector.extract_strided_slice %699 {offsets = [0, 128], sizes = [2, 64], strides = [1, 1]} : vector<2x384xf32> to vector<2x64xf32>
    %710 = arith.addf %708, %709 : vector<2x64xf32>
    %711 = arith.negf %710 : vector<2x64xf32>
    %712 = math.exp %711 : vector<2x64xf32>
    %cst_136 = arith.constant 1.000000e+00 : f32
    %713 = vector.broadcast %cst_136 : f32 to vector<2x64xf32>
    %714 = arith.addf %713, %712 : vector<2x64xf32>
    %715 = arith.divf %713, %714 : vector<2x64xf32>
    %716 = vector.extract_strided_slice %697 {offsets = [0, 256], sizes = [2, 64], strides = [1, 1]} : vector<2x384xf32> to vector<2x64xf32>
    %717 = vector.extract_strided_slice %699 {offsets = [0, 256], sizes = [2, 64], strides = [1, 1]} : vector<2x384xf32> to vector<2x64xf32>
    %718 = arith.addf %717, %25 : vector<2x64xf32>
    %719 = arith.mulf %707, %718 : vector<2x64xf32>
    %720 = arith.addf %716, %719 : vector<2x64xf32>
    %721 = math.tanh %720 : vector<2x64xf32>
    %cst_137 = arith.constant 1.000000e+00 : f32
    %722 = vector.broadcast %cst_137 : f32 to vector<2x64xf32>
    %723 = arith.subf %722, %715 : vector<2x64xf32>
    %724 = arith.mulf %723, %721 : vector<2x64xf32>
    %725 = arith.mulf %715, %633 : vector<2x64xf32>
    %726 = arith.addf %724, %725 : vector<2x64xf32>
    %727 = arith.truncf %726 : vector<2x64xf32> to vector<2x64xbf16>
    %cst_138 = arith.constant dense<0.000000e+00> : vector<2x384xf32>
    %728 = tpu.matmul %727, %9, %cst_138 {dimension_numbers = #tpu.dot_dimension_numbers<[1], [0], [0], [1], [0, 0, 1, 1], [], []>} : vector<2x64xbf16>, vector<64x384xbf16>, vector<2x384xf32> -> vector<2x384xf32>
    %729 = arith.addf %728, %17 : vector<2x384xf32>
    %730 = arith.truncf %694 : vector<2x64xf32> to vector<2x64xbf16>
    %cst_139 = arith.constant dense<0.000000e+00> : vector<2x384xf32>
    %731 = tpu.matmul %730, %5, %cst_139 {dimension_numbers = #tpu.dot_dimension_numbers<[1], [0], [0], [1], [0, 0, 1, 1], [], []>} : vector<2x64xbf16>, vector<64x384xbf16>, vector<2x384xf32> -> vector<2x384xf32>
    %732 = vector.extract_strided_slice %729 {offsets = [0, 0], sizes = [2, 64], strides = [1, 1]} : vector<2x384xf32> to vector<2x64xf32>
    %733 = vector.extract_strided_slice %731 {offsets = [0, 0], sizes = [2, 64], strides = [1, 1]} : vector<2x384xf32> to vector<2x64xf32>
    %734 = arith.addf %732, %733 : vector<2x64xf32>
    %735 = arith.negf %734 : vector<2x64xf32>
    %736 = math.exp %735 : vector<2x64xf32>
    %cst_140 = arith.constant 1.000000e+00 : f32
    %737 = vector.broadcast %cst_140 : f32 to vector<2x64xf32>
    %738 = arith.addf %737, %736 : vector<2x64xf32>
    %739 = arith.divf %737, %738 : vector<2x64xf32>
    %740 = vector.extract_strided_slice %729 {offsets = [0, 128], sizes = [2, 64], strides = [1, 1]} : vector<2x384xf32> to vector<2x64xf32>
    %741 = vector.extract_strided_slice %731 {offsets = [0, 128], sizes = [2, 64], strides = [1, 1]} : vector<2x384xf32> to vector<2x64xf32>
    %742 = arith.addf %740, %741 : vector<2x64xf32>
    %743 = arith.negf %742 : vector<2x64xf32>
    %744 = math.exp %743 : vector<2x64xf32>
    %cst_141 = arith.constant 1.000000e+00 : f32
    %745 = vector.broadcast %cst_141 : f32 to vector<2x64xf32>
    %746 = arith.addf %745, %744 : vector<2x64xf32>
    %747 = arith.divf %745, %746 : vector<2x64xf32>
    %748 = vector.extract_strided_slice %729 {offsets = [0, 256], sizes = [2, 64], strides = [1, 1]} : vector<2x384xf32> to vector<2x64xf32>
    %749 = vector.extract_strided_slice %731 {offsets = [0, 256], sizes = [2, 64], strides = [1, 1]} : vector<2x384xf32> to vector<2x64xf32>
    %750 = arith.addf %749, %29 : vector<2x64xf32>
    %751 = arith.mulf %739, %750 : vector<2x64xf32>
    %752 = arith.addf %748, %751 : vector<2x64xf32>
    %753 = math.tanh %752 : vector<2x64xf32>
    %cst_142 = arith.constant 1.000000e+00 : f32
    %754 = vector.broadcast %cst_142 : f32 to vector<2x64xf32>
    %755 = arith.subf %754, %747 : vector<2x64xf32>
    %756 = arith.mulf %755, %753 : vector<2x64xf32>
    %757 = arith.mulf %747, %694 : vector<2x64xf32>
    %758 = arith.addf %756, %757 : vector<2x64xf32>
    %cst_143 = arith.constant 0.000000e+00 : f32
    %759 = vector.broadcast %cst_143 : f32 to vector<2x64xf32>
    %760 = arith.cmpf ogt, %758, %759 : vector<2x64xf32>
    %cst_144 = arith.constant 0.00999999977 : f32
    %761 = vector.broadcast %cst_144 : f32 to vector<2x64xf32>
    %762 = arith.mulf %761, %758 : vector<2x64xf32>
    %763 = arith.select %760, %758, %762 : vector<2x64xi1>, vector<2x64xf32>
    %764 = arith.truncf %763 : vector<2x64xf32> to vector<2x64xbf16>
    %c0_145 = arith.constant 0 : index
    %c0_146 = arith.constant 0 : index
    %765 = vector.load %arg6[%c0_145, %c0_146] : memref<64x512xbf16, #tpu.memory_space<vmem>>, vector<64x512xbf16>
    %cst_147 = arith.constant dense<0.000000e+00> : vector<2x512xf32>
    %766 = tpu.matmul %764, %765, %cst_147 {dimension_numbers = #tpu.dot_dimension_numbers<[1], [0], [0], [1], [0, 0, 1, 1], [], []>} : vector<2x64xbf16>, vector<64x512xbf16>, vector<2x512xf32> -> vector<2x512xf32>
    %c0_148 = arith.constant 0 : index
    %c0_149 = arith.constant 0 : index
    %767 = vector.load %arg7[%c0_148, %c0_149] : memref<1x512xf32, #tpu.memory_space<vmem>>, vector<1x512xf32>
    %768 = vector.broadcast %767 : vector<1x512xf32> to vector<2x512xf32>
    %769 = arith.addf %766, %768 : vector<2x512xf32>
    %c0_150 = arith.constant 0 : index
    %c0_151 = arith.constant 0 : index
    %770 = vector.load %arg8[%c0_150, %c0_151] : memref<2x512xf32, #tpu.memory_space<vmem>>, vector<2x512xf32>
    tpu.vector_store %arg8[%c0_150, %c0_151], %769 {strides = array<i32>} : memref<2x512xf32, #tpu.memory_space<vmem>>, vector<2x512xf32>,
    return
  }
}

</mosaic_0001>

<bundles_post_ra>
// kernel: tpu_custom_call.1
= control target key start
LH: loop header
LB: loop body
LE: loop exit
PB: predicated region body
PF: predicated region fallthrough
CT: control target
= control target key end

     0   :  { %13 = vsyncpa [#allocation3], 0  ;;  %s7630_s0 = inlined_call_operand.vmem [shape: bf16[16,4], index: 0, kind: input, shape index: {}]   ;;  %s7631_s1 = inlined_call_operand.vmem [shape: bf16[4,384], index: 1, kind: input, shape index: {}]   ;;  %s7632_s2 = inlined_call_operand.hbm [shape: bf16[2,64,384], index: 2, kind: input, shape index: {}]   ;;  %s7633_s3 = inlined_call_operand.hbm [shape: bf16[3,64,384], index: 3, kind: input, shape index: {}]   ;;  %s7634_s4 = inlined_call_operand.vmem [shape: f32[3,1,384], index: 4, kind: input, shape index: {}]   ;;  %s7635_s5 = inlined_call_operand.vmem [shape: f32[3,1,64], index: 5, kind: input, shape index: {}]   ;;  %s7636_s6 = inlined_call_operand.hbm [shape: bf16[64,512], index: 6, kind: input, shape index: {}]   ;;  %s7637_s7 = inlined_call_operand.vmem [shape: f32[1,512], index: 7, kind: input, shape index: {}]   ;;  %s7638_s8 = inlined_call_operand.hbm [shape: f32[2,512], index: 8, kind: output, shape index: {}]  }
   0x1   :  { %14 = vsyncpa [#allocation6], 0 }
   0x2   :  { %15 = vsyncpa [#allocation4], 0  ;;  %s6120_s27 = smov [#allocation5]   ;;  %s6121_s29 = smov [#allocation2]  }
   0x3   :  { %s37_s28 = sshll.u32 %s6120_s27, 4  ;;  %s25_s30 = sshll.u32 %s6121_s29, 4  ;;  %s38_s28 = int_to_ptr.vmem [resolvable:$true] %s37_s28  ;;  %s6177_s30 = int_to_ptr.vmem [resolvable:$true] %s25_s30 }
   0x4   :  { %s6026_s11 = scalar_lea.hbm %s7633_s3, 4608 }
   0x5   :  { %p6027_p0 = scmp.ne.s32.totalorder %s7633_s3, %s6026_s11  ;;  %p6030_p1 = scmp.lt.u32.totalorder %s6026_s11, %s7633_s3 }
   0x7   :  { %p6032_p2 = pnand %p6030_p1, %p6027_p0 }
   0x9   :  { %6035 = shalt.err (!%p6032_p2)
}
   0xa   :  { %s6036_s16 = scalar_lea.vmem %s38_s28, 4608  ;;  %p6041_p4 = scmp.lt.s32.totalorder %s38_s28, %s38_s28 }
   0xb   :  { %p6037_p3 = scmp.ne.s32.totalorder %s38_s28, %s6036_s16  ;;  %p6042_p5 = scmp.lt.s32.totalorder %s6036_s16, %s6036_s16 }
   0xd   :  { %p6043_p6 = por %p6042_p5, %p6041_p4 }
   0xf   :  { %p6044_p7 = pnand %p6043_p6, %p6037_p3 }
  0x11   :  { %6047 = shalt.err (!%p6044_p7)
}
  0x12   :  { %s6122_s17 = smov 192   ;;  %s6123_s18 = smov 12  }
  0x13   :  { %43 = dma.hbm_to_vmem [thread:$0]  %s7633_s3, 4608, %s38_s28, [#allocation6], %s6122_s17, %s6122_s17, %s6123_s18  }
  0x14   :  { %s6048_s23 = scalar_lea.hbm %s7632_s2, 3072 }
  0x15   :  { %p6049_p8 = scmp.ne.s32.totalorder %s7632_s2, %s6048_s23  ;;  %p6052_p9 = scmp.lt.u32.totalorder %s6048_s23, %s7632_s2 }
  0x17   :  { %p6054_p10 = pnand %p6052_p9, %p6049_p8 }
  0x19   :  { %6057 = shalt.err (!%p6054_p10)
}
  0x1a   :  { %s6058_s29 = scalar_lea.vmem %s6177_s30, 3072  ;;  %p6063_p12 = scmp.lt.s32.totalorder %s6177_s30, %s6177_s30 }
  0x1b   :  { %p6059_p11 = scmp.ne.s32.totalorder %s6177_s30, %s6058_s29  ;;  %p6064_p13 = scmp.lt.s32.totalorder %s6058_s29, %s6058_s29 }
  0x1d   :  { %p6065_p0 = por %p6064_p13, %p6063_p12 }
  0x1f   :  { %p6066_p1 = pnand %p6065_p0, %p6059_p11 }
  0x21   :  { %6069 = shalt.err (!%p6066_p1)
}
  0x22   :  { %31 = dma.hbm_to_vmem [thread:$0]  %s7632_s2, 3072, %s6177_s30, [#allocation3], %s6122_s17, %s6122_s17, %s6123_s18  }
  0x23   :  { %s6124_s9 = smov [#allocation7]   ;;  %s6070_s13 = scalar_lea.hbm %s7636_s6, 2048 }
  0x24   :  { %s53_s10 = sshll.u32 %s6124_s9, 4  ;;  %p6071_p2 = scmp.ne.s32.totalorder %s7636_s6, %s6070_s13  ;;  %s54_s10 = int_to_ptr.vmem [resolvable:$true] %s53_s10 }
  0x25   :  { %p6074_p3 = scmp.lt.u32.totalorder %s6070_s13, %s7636_s6 }
  0x27   :  { %p6076_p4 = pnand %p6074_p3, %p6071_p2 }
  0x29   :  { %6079 = shalt.err (!%p6076_p4)
}
  0x2a   :  { %s6080_s20 = scalar_lea.vmem %s54_s10, 2048  ;;  %p6085_p6 = scmp.lt.s32.totalorder %s54_s10, %s54_s10 }
  0x2b   :  { %p6081_p5 = scmp.ne.s32.totalorder %s54_s10, %s6080_s20  ;;  %p6086_p7 = scmp.lt.s32.totalorder %s6080_s20, %s6080_s20 }
  0x2d   :  { %p6087_p8 = por %p6086_p7, %p6085_p6 }
  0x2f   :  { %p6088_p9 = pnand %p6087_p8, %p6081_p5 }
  0x31   :  { %6091 = shalt.err (!%p6088_p9)
}
  0x32   :  { %s6125_s2 = smov 256   ;;  %s6126_s30 = smov 16  }
  0x33   :  { %59 = dma.hbm_to_vmem [thread:$0]  %s7636_s6, 2048, %s54_s10, [#allocation6], %s6125_s2, %s6125_s2, %s6126_s30  }
  0x34   :  { %6114 = dma.done.wait [#allocation3], 3072  }
  0x35   :  { %6115 = vsyncadd [#allocation3], 4294964224 }
  0x36   :  { %6116 = dma.done.wait [#allocation6], 6656  }
  0x37   :  { %6117 = vsyncadd [#allocation6], 4294960640  ;;  %v158_v0 = vlaneseq  ;;  %v6127_v1 = vmov 1983009808   ;;  %v7639_v3 = vmov 0   ;;  %v7641_v5 = vmov 0.0  }
  0x38   :  { %v242_v2 = vunpack.c.l.s4 %v6127_v1  ;;  %302 = vmatprep.mubr.bf16.mxu0 %v7639_v3  ;;  %5008 = vmatprep.subr.bf16.mxu1 %v7641_v5  ;;  %vm6130_vm0 = vmmov 0   ;;  %vm260_vm1 = vcmask 1041408   ;;  %v216_v8 = vld [vmem:[%s7631_s1] sm:$0x3f]  ;;  %vm256_vm2 = vcmask 31744  }
  0x39   :  { %v6221_v4 = vshrl.u32 %v158_v0, 7  ;;  %5010 = vmatprep.mubr.msk.bf16.mxu1 %vm6130_vm0, %v7641_v5  ;;  %v240_v10 = vcombine.high %v216_v8, %v216_v8  ;;  %v5554_v13 = vld [vmem:[%s7630_s0] sm:$0xff]   ;;  %v6241_v16 = vld [vmem:[#allocation2 + $0x4] ss:$12 sps:$4 sm:$0xff]   ;;  %v6243_v17 = vld [vmem:[#allocation2] ss:$12 sps:$4 sm:$0xff]  }
  0x3a   :  { %v243_v6 = vunpack.c.0.s8 %v242_v2  ;;  %7732 = vst [vmem:[#allocation14_spill] sm:$0xff] %v6241_v16  ;;  %v6245_v18 = vld [vmem:[#allocation2 + $0x8] ss:$12 sps:$4 sm:$0xff]   ;;  %v6253_v20 = vld [vmem:[#allocation2 + $0x18] ss:$12 sps:$4 sm:$0xff]   ;;  %vm436_vm3 = vcmask 523264  }
  0x3b   :  { %7730 = vst [vmem:[#allocation12_spill] sm:$0xff] %v6221_v4  ;;  %v6250_v19 = vld [vmem:[#allocation2 + $0x1c] ss:$12 sps:$4 sm:$0xff]   ;;  %v6255_v21 = vld [vmem:[#allocation2 + $0x20] ss:$12 sps:$4 sm:$0xff]   ;;  %v6285_v29 = vsub.s32 0, %v6221_v4 }
  0x3c   :  { %v6227_v7 = vsub.s32 %v243_v6, %v6221_v4  ;;  %v6257_v22 = vld [vmem:[#allocation2 + $0x34] ss:$12 sps:$4 sm:$0xff]   ;;  %v6262_v23 = vld [vmem:[#allocation2 + $0x30] ss:$12 sps:$4 sm:$0xff]   ;;  %v6264_v24 = vld [vmem:[#allocation2 + $0x38] ss:$12 sps:$4 sm:$0xff]  }
  0x3d   :  { %v6268_v25 = vld [vmem:[#allocation2 + $0x4c] ss:$12 sps:$4 sm:$0xff]   ;;  %v6272_v26 = vld [vmem:[#allocation2 + $0x48] ss:$12 sps:$4 sm:$0xff]   ;;  %v6274_v27 = vld [vmem:[#allocation2 + $0x50] ss:$12 sps:$4 sm:$0xff]  }
  0x3e   :  { %7731 = vst [vmem:[#allocation13_spill] sm:$0xff] %v6227_v7  ;;  %v247_v9 = vrot.slane %v216_v8, %v6227_v7  ;;  %v254_v14 = vrot.slane %v240_v10, %v6227_v7  ;;  %v6278_v28 = vld [vmem:[#allocation5 + $0x4] ss:$12 sps:$4 sm:$0xff]   ;;  %7733 = vst [vmem:[#allocation15_spill] sm:$0xff] %v6285_v29  ;;  %v217_v30 = vld [vmem:[%s7634_s4] sm:$0x7] }
  0x3f   :  { %v6291_v31 = vsub.s32 2, %v6221_v4  ;;  %v6294_v32 = vsub.s32 1, %v6221_v4  ;;  %v222_v33 = vrot.slane %v217_v30, %v6285_v29  ;;  %v6314_v55 = vld [vmem:[%s7635_s5] ss:$0 sm:$0xff]  ;;  %v6322_v0 = vld [vmem:[#allocation5] ss:$12 sps:$4 sm:$0xff]  }
  0x40   :  { %v255_v11 = vcombine.high %v247_v9, %v247_v9  ;;  %v262_v12 = vsel %vm260_vm1, %v247_v9, 0  ;;  %v268_v15 = vsel %vm260_vm1, %v254_v14, 0  ;;  %v6324_v1 = vld [vmem:[#allocation5 + $0x8] ss:$12 sps:$4 sm:$0xff]   ;;  %v6334_v8 = vld [vmem:[#allocation5 + $0x18] ss:$12 sps:$4 sm:$0xff]  }
  0x41   :  { %5009 = vmatpush3.bf16.msra.mxu1 %v268_v15  ;;  %7734 = vst [vmem:[#allocation16_spill] sm:$0xff] %v6291_v31  ;;  %7735 = vst [vmem:[#allocation17_spill] sm:$0xff] %v6294_v32  ;;  %v230_v34 = vrot.slane %v217_v30, %v6291_v31  ;;  %v226_v36 = vrot.slane %v217_v30, %v6294_v32  ;;  %v6328_v6 = vld [vmem:[#allocation5 + $0x1c] ss:$12 sps:$4 sm:$0xff]   ;;  %v6336_v9 = vld [vmem:[#allocation5 + $0x20] ss:$12 sps:$4 sm:$0xff]  }
  0x42   :  { %4618 = vmatprep.subr.msk.bf16.mxu0 %vm260_vm1, %v255_v11  ;;  %5014 = vmatprep.subr.bf16.mxu1 %v7641_v5  ;;  %v6340_v10 = vld [vmem:[#allocation5 + $0x34] ss:$12 sps:$4 sm:$0xff]   ;;  %v6347_v11 = vld [vmem:[#allocation5 + $0x30] ss:$12 sps:$4 sm:$0xff]  }
  0x43   :  { %271 = vmatpush1.bf16.msra.mxu0 %v262_v12  ;;  %7739 = vst [vmem:[#allocation21_spill] sm:$0xff] %v6347_v11  ;;  %v6349_v12 = vld [vmem:[#allocation5 + $0x38] ss:$12 sps:$4 sm:$0xff]   ;;  %v6357_v14 = vld [vmem:[#allocation5 + $0x48] ss:$12 sps:$4 sm:$0xff]  }
  0x44   :  { %5011 = vmatmul.mubr.msk.bf16.vlgmr.msra.gmra.mrb[0].mxu1 %vm256_vm2, %v5554_v13  ;;  %440 = vmatprep.subr.bf16.mxu0 %v6241_v16  ;;  %7740 = vst [vmem:[#allocation22_spill] sm:$0xff] %v6349_v12  ;;  %7742 = vst [vmem:[#allocation24_spill] sm:$0xff] %v6357_v14  ;;  %v6359_v15 = vld [vmem:[#allocation5 + $0x50] ss:$12 sps:$4 sm:$0xff]  }
  0x45   :  { %5022 = vmatprep.mubr.msk.bf16.mxu1 %vm6130_vm0, %v7641_v5  ;;  %5015 = vmatpush3.bf16.msra.mxu1 %v6245_v18  ;;  %7743 = vst [vmem:[#allocation25_spill] sm:$0xff] %v6359_v15  ;;  %v6371_v30 = vld [vmem:[#allocation2 + $0x64] ss:$12 sps:$4 sm:$0xff]  }
  0x46   :  { %4619 = vmatmul.mubr.msk.bf16.vlgmr.msra.gmra.mrb[0].mxu0 %vm256_vm2, %v5554_v13  ;;  %5016 = vmatprep.subr.bf16.mxu1 %v7641_v5  ;;  %v6353_v13 = vld [vmem:[#allocation5 + $0x4c] ss:$12 sps:$4 sm:$0xff]   ;;  %7744 = vst [vmem:[#allocation26_spill] sm:$0xff] %v6371_v30 }
  0x47   :  { %472 = vmatprep.mubr.bf16.mxu0 %v7639_v3  ;;  %441 = vmatpush1.bf16.msra.mxu0 %v6243_v17  ;;  %7741 = vst [vmem:[#allocation23_spill] sm:$0xff] %v6353_v13 }
  0x48   :  { %442 = vmatprep.subr.bf16.mxu0 %v6250_v19 }
  0x49   :  { %5017 = vmatpush3.bf16.msra.mxu1 %v6255_v21 }
  0x4a   :  { %5018 = vmatprep.subr.bf16.mxu1 %v7641_v5 }
  0x4b   :  { %443 = vmatpush1.bf16.msra.mxu0 %v6253_v20 }
  0x4c   :  { %444 = vmatprep.subr.bf16.mxu0 %v6257_v22 }
  0x4d   :  { %5019 = vmatpush3.bf16.msra.mxu1 %v6264_v24 }
  0x4e   :  { %5020 = vmatprep.subr.bf16.mxu1 %v7641_v5 }
  0x4f   :  { %445 = vmatpush1.bf16.msra.mxu0 %v6262_v23 }
  0x50   :  { %446 = vmatprep.subr.bf16.mxu0 %v6268_v25 }
  0x51   :  { %5021 = vmatpush3.bf16.msra.mxu1 %v6274_v27 }
  0x52   :  { %5026 = vmatprep.subr.bf16.mxu1 %v7641_v5 }
  0x53   :  { %447 = vmatpush1.bf16.msra.mxu0 %v6272_v26 }
  0x54   :  { %602 = vmatprep.subr.bf16.mxu0 %v6278_v28 }
 0x117   :  { %v347_v37 = vpop.f32.mrb[0].mxu1 }
 0x118   :  { %v5012_v40 = vpop.f32.mrb[1].mxu1  ;;  %v6316_v56 = vadd.f32 %v347_v37, %v230_v34  ;;  %v6385_v37 = vld [vmem:[#allocation2 + $0x80] ss:$12 sps:$4 sm:$0xff]  }
 0x119   :  { %v304_v35 = vpop.f32.mrb[0].mxu0  ;;  %v350_v42 = vpop.f32.mrb[2].mxu1  ;;  %7749 = vst [vmem:[#allocation31_spill] sm:$0xff] %v6385_v37  ;;  %v6393_v40 = vld [vmem:[#allocation2 + $0x90] ss:$12 sps:$4 sm:$0xff]  }
 0x11a   :  { %v6299_v38 = vadd.f32 %v304_v35, %v222_v33  ;;  %v306_v39 = vpop.f32.mrb[1].mxu0  ;;  %v6304_v46 = vadd.f32 %v350_v42, %v230_v34  ;;  %v5013_v47 = vpop.f32.mrb[3].mxu1  ;;  %v6375_v34 = vld [vmem:[#allocation2 + $0x68] ss:$12 sps:$4 sm:$0xff]   ;;  %7751 = vst [vmem:[#allocation33_spill] sm:$0xff] %v6393_v40 }
 0x11b   :  { %v308_v41 = vpop.f32.mrb[2].mxu0  ;;  %v6306_v48 = vadd.f32 %v306_v39, %v226_v36  ;;  %7746 = vst [vmem:[#allocation28_spill] sm:$0xff] %v6375_v34  ;;  %v6380_v35 = vld [vmem:[#allocation2 + $0x7c] ss:$12 sps:$4 sm:$0xff]   ;;  %v6390_v39 = vld [vmem:[#allocation2 + $0x94] ss:$12 sps:$4 sm:$0xff]  }
 0x11c   :  { %v4621_v43 = vmul.f32 -1.442695, %v6299_v38  ;;  %v6302_v44 = vadd.f32 %v308_v41, %v222_v33  ;;  %v310_v45 = vpop.f32.mrb[3].mxu0  ;;  %7737 = vst [vmem:[#allocation19_spill] sm:$0xff] %v6304_v46  ;;  %v6373_v33 = vld [vmem:[#allocation2 + $0x60] ss:$12 sps:$4 sm:$0xff]  }
 0x11d   :  { %v6308_v49 = vadd.f32 %v310_v45, %v226_v36  ;;  %v4622_v50 = vmul.f32 -1.442695, %v6306_v48  ;;  %7745 = vst [vmem:[#allocation27_spill] sm:$0xff] %v6373_v33  ;;  %7747 = vst [vmem:[#allocation29_spill] sm:$0xff] %v6380_v35  ;;  %v6383_v36 = vld [vmem:[#allocation2 + $0x78] ss:$12 sps:$4 sm:$0xff]  }
 0x11e   :  { %7736 = vst [vmem:[#allocation18_spill] sm:$0xff] %v6302_v44  ;;  %5660 = vpow2.f32 %v4621_v43  ;;  %7748 = vst [vmem:[#allocation30_spill] sm:$0xff] %v6383_v36  ;;  %v6395_v41 = vld [vmem:[#allocation2 + $0x98] ss:$12 sps:$4 sm:$0xff]   ;;  %v6403_v43 = vld [vmem:[#allocation2 + $0xa8] ss:$12 sps:$4 sm:$0xff]  }
 0x11f   :  { %7738 = vst [vmem:[#allocation20_spill] sm:$0xff] %v6308_v49  ;;  %5662 = vpow2.f32 %v4622_v50  ;;  %7750 = vst [vmem:[#allocation32_spill] sm:$0xff] %v6390_v39  ;;  %v6400_v42 = vld [vmem:[#allocation2 + $0xac] ss:$12 sps:$4 sm:$0xff]   ;;  %v6405_v45 = vld [vmem:[#allocation2 + $0xb0] ss:$12 sps:$4 sm:$0xff]  }
 0x120   :  { %7752 = vst [vmem:[#allocation34_spill] sm:$0xff] %v6395_v41  ;;  %7753 = vst [vmem:[#allocation35_spill] sm:$0xff] %v6400_v42  ;;  %v4610_v47 = vld [vmem:[%s7634_s4 + $0x3] sm:$0x7] }
 0x121   :  { %7754 = vst [vmem:[#allocation36_spill] sm:$0xff] %v6403_v43  ;;  %7755 = vst [vmem:[#allocation37_spill] sm:$0xff] %v6405_v45  ;;  %v6416_v50 = vrot.slane %v4610_v47, %v6285_v29 }
 0x123   :  { %7756 = vst [vmem:[#allocation38_spill] sm:$0xff] %v6416_v50 }
 0x128   :  { %v5661_v51 = vpop.eup %5660 }
 0x129   :  { %v357_v52 = vadd.f32 1.0, %v5661_v51  ;;  %v5663_v53 = vpop.eup %5662  ;;  %v6419_v51 = vrot.slane %v4610_v47, %v6294_v32 }
 0x12a   :  { %v363_v54 = vadd.f32 1.0, %v5663_v53 }
 0x12b   :  { %5664 = vrcp.f32 %v357_v52  ;;  %7757 = vst [vmem:[#allocation39_spill] sm:$0xff] %v6419_v51 }
 0x12c   :  { %5666 = vrcp.f32 %v363_v54 }
 0x135   :  { %v5665_v57 = vpop.eup %5664 }
 0x136   :  { %v366_v58 = vmul.f32 %v5665_v57, %v6314_v55  ;;  %v5667_v60 = vpop.eup %5666 }
 0x137   :  { %v369_v61 = vsub.f32 1.0, %v5667_v60 }
 0x138   :  { %v367_v59 = vadd.f32 %v366_v58, %v6316_v56 }
 0x13a   :  { %5668 = vtanh.f32 %v367_v59 }
 0x144   :  { %v5669_v62 = vpop.eup %5668 }
 0x145   :  { %v6320_v63 = vmul.f32 %v5669_v62, %v369_v61 }
 0x147   :  { %v371_v2 = vpack.c.bf16 %v6320_v63, %v6320_v63 }
 0x149   :  { %4635 = vmatmul.mubr.msk.bf16.vlgmr.msra.gmra.mrb[4].mxu0 %vm436_vm3, %v371_v2  ;;  %5023 = vmatmul.mubr.msk.bf16.vlgmr.msra.gmra.mrb[4].mxu1 %vm436_vm3, %v371_v2 }
 0x14a   :  { %603 = vmatpush1.bf16.msra.mxu0 %v6322_v0  ;;  %5027 = vmatpush3.bf16.msra.mxu1 %v6324_v1 }
 0x14b   :  { %604 = vmatprep.subr.bf16.mxu0 %v6328_v6  ;;  %5028 = vmatprep.subr.bf16.mxu1 %v7641_v5 }
 0x14c   :  { %634 = vmatprep.mubr.bf16.mxu0 %v7639_v3  ;;  %5034 = vmatprep.mubr.msk.bf16.mxu1 %vm6130_vm0, %v7641_v5 }
 0x14e   :  { %605 = vmatpush1.bf16.msra.mxu0 %v6334_v8  ;;  %5029 = vmatpush3.bf16.msra.mxu1 %v6336_v9 }
 0x14f   :  { %606 = vmatprep.subr.bf16.mxu0 %v6340_v10  ;;  %5030 = vmatprep.subr.bf16.mxu1 %v7641_v5 }
 0x152   :  { %607 = vmatpush1.bf16.msra.mxu0 %v6347_v11  ;;  %5031 = vmatpush3.bf16.msra.mxu1 %v6349_v12 }
 0x153   :  { %608 = vmatprep.subr.bf16.mxu0 %v6353_v13  ;;  %5032 = vmatprep.subr.bf16.mxu1 %v7641_v5 }
 0x156   :  { %609 = vmatpush1.bf16.msra.mxu0 %v6357_v14  ;;  %5033 = vmatpush3.bf16.msra.mxu1 %v6359_v15 }
 0x157   :  { %5038 = vmatprep.subr.bf16.mxu1 %v7641_v5  ;;  %785 = vmatprep.subr.bf16.mxu0 %v6371_v30 }
 0x159   :  { %4651 = vmatmul.mubr.msk.bf16.vlgmr.msra.gmra.mrb[8].mxu0 %vm436_vm3, %v371_v2  ;;  %5035 = vmatmul.mubr.msk.bf16.vlgmr.msra.gmra.mrb[8].mxu1 %vm436_vm3, %v371_v2 }
 0x15a   :  { %817 = vmatprep.mubr.bf16.mxu0 %v7639_v3  ;;  %5046 = vmatprep.mubr.msk.bf16.mxu1 %vm6130_vm0, %v7641_v5 }
 0x15b   :  { %786 = vmatpush1.bf16.msra.mxu0 %v6373_v33  ;;  %5039 = vmatpush3.bf16.msra.mxu1 %v6375_v34 }
 0x15c   :  { %5040 = vmatprep.subr.bf16.mxu1 %v7641_v5  ;;  %787 = vmatprep.subr.bf16.mxu0 %v6380_v35 }
 0x15f   :  { %788 = vmatpush1.bf16.msra.mxu0 %v6383_v36  ;;  %5041 = vmatpush3.bf16.msra.mxu1 %v6385_v37 }
 0x160   :  { %5042 = vmatprep.subr.bf16.mxu1 %v7641_v5  ;;  %789 = vmatprep.subr.bf16.mxu0 %v6390_v39 }
 0x163   :  { %790 = vmatpush1.bf16.msra.mxu0 %v6393_v40  ;;  %5043 = vmatpush3.bf16.msra.mxu1 %v6395_v41 }
 0x164   :  { %5044 = vmatprep.subr.bf16.mxu1 %v7641_v5  ;;  %791 = vmatprep.subr.bf16.mxu0 %v6400_v42 }
 0x167   :  { %792 = vmatpush1.bf16.msra.mxu0 %v6403_v43  ;;  %5045 = vmatpush3.bf16.msra.mxu1 %v6405_v45 }
 0x168   :  { %889 = vmatprep.subr.bf16.mxu0 %v6241_v16  ;;  %5050 = vmatprep.subr.bf16.mxu1 %v7641_v5 }
 0x21c   :  { %v474_v52 = vpop.f32.mrb[4].mxu0  ;;  %v515_v53 = vpop.f32.mrb[4].mxu1 }
 0x21d   :  { %v475_v54 = vadd.f32 %v474_v52, %v6416_v50  ;;  %v476_v57 = vpop.f32.mrb[5].mxu0  ;;  %v5024_v58 = vpop.f32.mrb[5].mxu1 }
 0x21e   :  { %v478_v59 = vpop.f32.mrb[6].mxu0  ;;  %v518_v60 = vpop.f32.mrb[6].mxu1  ;;  %v477_v3 = vadd.f32 %v476_v57, %v6419_v51 }
 0x21f   :  { %v4637_v61 = vmul.f32 -1.442695, %v475_v54  ;;  %v479_v62 = vpop.f32.mrb[7].mxu0  ;;  %v5025_v2 = vpop.f32.mrb[7].mxu1 }
 0x220   :  { %v4638_v5 = vmul.f32 -1.442695, %v477_v3 }
 0x221   :  { %5670 = vpow2.f32 %v4637_v61 }
 0x222   :  { %5672 = vpow2.f32 %v4638_v5 }
 0x22b   :  { %v5671_v7 = vpop.eup %5670 }
 0x22c   :  { %v524_v4 = vadd.f32 1.0, %v5671_v7  ;;  %v636_v46 = vpop.f32.mrb[8].mxu0  ;;  %v677_v49 = vpop.f32.mrb[8].mxu1  ;;  %v6426_v7 = vrot.slane %v4610_v47, %v6291_v31 }
 0x22d   :  { %v684_v44 = vrot.slane %v636_v46, 6  ;;  %v638_v16 = vpop.f32.mrb[9].mxu0  ;;  %v5036_v32 = vpop.f32.mrb[9].mxu1 }
 0x22e   :  { %5674 = vrcp.f32 %v524_v4  ;;  %v694_v52 = vrot.slane %v638_v16, 6  ;;  %v640_v58 = vpop.f32.mrb[10].mxu0  ;;  %v680_v59 = vpop.f32.mrb[10].mxu1  ;;  %v6431_v4 = vld [vmem:[%s7635_s5 + $0x1] ss:$0 sm:$0xff]  ;;  %v516_v32 = vadd.f32 %v515_v53, %v6426_v7 }
 0x22f   :  { %v686_v54 = vadd.f32 %v684_v44, %v6299_v38  ;;  %v641_v60 = vpop.f32.mrb[11].mxu0  ;;  %v5037_v62 = vpop.f32.mrb[11].mxu1 }
 0x230   :  { %v696_v57 = vadd.f32 %v694_v52, %v6306_v48  ;;  %v5673_v3 = vpop.eup %5672  ;;  %v703_v60 = vadd.f32 %v6314_v55, %v677_v49 }
 0x231   :  { %v4653_v61 = vmul.f32 -1.442695, %v686_v54  ;;  %v530_v46 = vadd.f32 1.0, %v5673_v3 }
 0x232   :  { %v4654_v5 = vmul.f32 -1.442695, %v696_v57  ;;  %v705_v3 = vrot.slane %v703_v60, 6 }
 0x233   :  { %5676 = vpow2.f32 %v4653_v61 }
 0x234   :  { %5678 = vpow2.f32 %v4654_v5  ;;  %v713_v5 = vrot.slane %v6320_v63, 6  ;;  %v7758_v63 = vmov 0.0  }
 0x235   :  { %5680 = vrcp.f32 %v530_v46 }
 0x238   :  { %v5675_v16 = vpop.eup %5674 }
 0x239   :  { %v533_v44 = vmul.f32 %v5675_v16, %v6431_v4 }
 0x23b   :  { %v534_v2 = vadd.f32 %v533_v44, %v516_v32 }
 0x23d   :  { %v5677_v52 = vpop.eup %5676  ;;  %5682 = vtanh.f32 %v534_v2  ;;  %v7759_v2 = vmov 0  }
 0x23e   :  { %v5679_v58 = vpop.eup %5678  ;;  %v690_v59 = vadd.f32 1.0, %v5677_v52  ;;  %v6463_v52 = vld [vmem:[#allocation5 + $0x64] ss:$12 sps:$4 sm:$0xff]  }
 0x23f   :  { %v700_v54 = vadd.f32 1.0, %v5679_v58  ;;  %v5681_v47 = vpop.eup %5680 }
 0x240   :  { %5684 = vrcp.f32 %v690_v59  ;;  %v536_v62 = vsub.f32 1.0, %v5681_v47 }
 0x241   :  { %5686 = vrcp.f32 %v700_v54 }
 0x247   :  { %v5683_v57 = vpop.eup %5682 }
 0x248   :  { %v6436_v61 = vmul.f32 %v5683_v57, %v536_v62  ;;  %v6473_v62 = vld [vmem:[#allocation5 + $0x60] ss:$12 sps:$4 sm:$0xff]   ;;  %v6475_v57 = vld [vmem:[#allocation5 + $0x68] ss:$12 sps:$4 sm:$0xff]  }
 0x24a   :  { %v5685_v53 = vpop.eup %5684  ;;  %v6441_v46 = vpack.c.bf16 %v6436_v61, %v6436_v61 }
 0x24b   :  { %v5687_v16 = vpop.eup %5686  ;;  %v707_v32 = vmul.f32 %v5685_v53, %v705_v3  ;;  %v6477_v53 = vld [vmem:[#allocation5 + $0x7c] ss:$12 sps:$4 sm:$0xff]  }
 0x24c   :  { %4667 = vmatmul.mubr.msk.bf16.vlgmr.msra.gmra.mrb[12].mxu0 %vm436_vm3, %v6441_v46  ;;  %5047 = vmatmul.mubr.msk.bf16.vlgmr.msra.gmra.mrb[12].mxu1 %vm436_vm3, %v6441_v46  ;;  %v715_v49 = vmul.f32 %v5687_v16, %v713_v5  ;;  %v710_v58 = vsub.f32 1.0, %v5687_v16  ;;  %v6483_v5 = vld [vmem:[#allocation5 + $0x78] ss:$12 sps:$4 sm:$0xff]   ;;  %v6485_v16 = vld [vmem:[#allocation5 + $0x80] ss:$12 sps:$4 sm:$0xff]  }
 0x24d   :  { %v708_v44 = vadd.f32 %v707_v32, %v6316_v56  ;;  %890 = vmatpush1.bf16.msra.mxu0 %v6243_v17  ;;  %5051 = vmatpush3.bf16.msra.mxu1 %v6245_v18  ;;  %v6489_v32 = vld [vmem:[#allocation5 + $0x94] ss:$12 sps:$4 sm:$0xff]  }
 0x24e   :  { %891 = vmatprep.subr.bf16.mxu0 %v6250_v19  ;;  %5052 = vmatprep.subr.bf16.mxu1 %v7758_v63 }
 0x24f   :  { %5688 = vtanh.f32 %v708_v44  ;;  %921 = vmatprep.mubr.bf16.mxu0 %v7759_v2  ;;  %5058 = vmatprep.mubr.msk.bf16.mxu1 %vm6130_vm0, %v7758_v63  ;;  %v6498_v44 = vld [vmem:[#allocation5 + $0x98] ss:$12 sps:$4 sm:$0xff]  }
 0x251   :  { %892 = vmatpush1.bf16.msra.mxu0 %v6253_v20  ;;  %5053 = vmatpush3.bf16.msra.mxu1 %v6255_v21 }
 0x252   :  { %893 = vmatprep.subr.bf16.mxu0 %v6257_v22  ;;  %5054 = vmatprep.subr.bf16.mxu1 %v7758_v63 }
 0x255   :  { %894 = vmatpush1.bf16.msra.mxu0 %v6262_v23  ;;  %5055 = vmatpush3.bf16.msra.mxu1 %v6264_v24 }
 0x256   :  { %895 = vmatprep.subr.bf16.mxu0 %v6268_v25  ;;  %5056 = vmatprep.subr.bf16.mxu1 %v7758_v63 }
 0x259   :  { %v5689_v59 = vpop.eup %5688  ;;  %896 = vmatpush1.bf16.msra.mxu0 %v6272_v26  ;;  %5057 = vmatpush3.bf16.msra.mxu1 %v6274_v27 }
 0x25a   :  { %1034 = vmatprep.subr.bf16.mxu0 %v6463_v52  ;;  %5062 = vmatprep.subr.bf16.mxu1 %v7758_v63  ;;  %v711_v54 = vmul.f32 %v5689_v59, %v710_v58  ;;  %v6502_v58 = vld [vmem:[#allocation5 + $0xac] ss:$12 sps:$4 sm:$0xff]   ;;  %v6506_v59 = vld [vmem:[#allocation5 + $0xa8] ss:$12 sps:$4 sm:$0xff]  }
 0x25c   :  { %v6469_v47 = vadd.f32 %v715_v49, %v711_v54  ;;  %v6496_v49 = vld [vmem:[#allocation5 + $0x90] ss:$12 sps:$4 sm:$0xff]  }
 0x25d   :  { %v6508_v54 = vld [vmem:[#allocation5 + $0xb0] ss:$12 sps:$4 sm:$0xff]  }
 0x25e   :  { %v883_v60 = vpack.c.bf16 %v6469_v47, %v6469_v47 }
 0x260   :  { %v885_v3 = vrot.slane %v883_v60, 1  ;;  %v4611_v60 = vld [vmem:[%s7634_s4 + $0x6] sm:$0x7] }
 0x262   :  { %4671 = vmatmul.mubr.msk.bf16.vlgmr.msra.gmra.mrb[16].mxu0 %vm436_vm3, %v885_v3  ;;  %5059 = vmatmul.mubr.msk.bf16.vlgmr.msra.gmra.mrb[16].mxu1 %vm436_vm3, %v885_v3 }
 0x263   :  { %1035 = vmatpush1.bf16.msra.mxu0 %v6473_v62  ;;  %5063 = vmatpush3.bf16.msra.mxu1 %v6475_v57 }
 0x264   :  { %1036 = vmatprep.subr.bf16.mxu0 %v6477_v53  ;;  %5064 = vmatprep.subr.bf16.mxu1 %v7758_v63 }
 0x265   :  { %1066 = vmatprep.mubr.bf16.mxu0 %v7759_v2  ;;  %5070 = vmatprep.mubr.msk.bf16.mxu1 %vm6130_vm0, %v7758_v63 }
 0x267   :  { %1037 = vmatpush1.bf16.msra.mxu0 %v6483_v5  ;;  %5065 = vmatpush3.bf16.msra.mxu1 %v6485_v16 }
 0x268   :  { %1038 = vmatprep.subr.bf16.mxu0 %v6489_v32  ;;  %5066 = vmatprep.subr.bf16.mxu1 %v7758_v63 }
 0x26b   :  { %1039 = vmatpush1.bf16.msra.mxu0 %v6496_v49  ;;  %5067 = vmatpush3.bf16.msra.mxu1 %v6498_v44 }
 0x26c   :  { %1040 = vmatprep.subr.bf16.mxu0 %v6502_v58  ;;  %5068 = vmatprep.subr.bf16.mxu1 %v7758_v63 }
 0x26f   :  { %1041 = vmatpush1.bf16.msra.mxu0 %v6506_v59  ;;  %5069 = vmatpush3.bf16.msra.mxu1 %v6508_v54 }
 0x270   :  { %1137 = vmatprep.subr.bf16.mxu0 %v6278_v28  ;;  %5074 = vmatprep.subr.bf16.mxu1 %v7758_v63 }
 0x272   :  { %4685 = vmatmul.mubr.msk.bf16.vlgmr.msra.gmra.mrb[16].mxu0 %vm436_vm3, %v6441_v46  ;;  %5071 = vmatmul.mubr.msk.bf16.vlgmr.msra.gmra.mrb[20].mxu1 %vm436_vm3, %v6441_v46  ;;  %v6559_v46 = vld [vmem:[#allocation5 + $0xc4] ss:$12 sps:$4 sm:$0xff]  }
 0x273   :  { %1138 = vmatpush1.bf16.msra.mxu0 %v6322_v0  ;;  %5075 = vmatpush3.bf16.msra.mxu1 %v6324_v1  ;;  %7760 = vst [vmem:[#allocation40_spill] sm:$0xff] %v6559_v46 }
 0x274   :  { %1139 = vmatprep.subr.bf16.mxu0 %v6328_v6  ;;  %5076 = vmatprep.subr.bf16.mxu1 %v7758_v63 }
 0x275   :  { %1169 = vmatprep.mubr.bf16.mxu0 %v7759_v2  ;;  %5082 = vmatprep.mubr.msk.bf16.mxu1 %vm6130_vm0, %v7758_v63 }
 0x277   :  { %1140 = vmatpush1.bf16.msra.mxu0 %v6334_v8  ;;  %5077 = vmatpush3.bf16.msra.mxu1 %v6336_v9 }
 0x278   :  { %1141 = vmatprep.subr.bf16.mxu0 %v6340_v10  ;;  %5078 = vmatprep.subr.bf16.mxu1 %v7758_v63 }
 0x27b   :  { %1142 = vmatpush1.bf16.msra.mxu0 %v6347_v11  ;;  %5079 = vmatpush3.bf16.msra.mxu1 %v6349_v12 }
 0x27c   :  { %1143 = vmatprep.subr.bf16.mxu0 %v6353_v13  ;;  %5080 = vmatprep.subr.bf16.mxu1 %v7758_v63 }
 0x27f   :  { %1144 = vmatpush1.bf16.msra.mxu0 %v6357_v14  ;;  %5081 = vmatpush3.bf16.msra.mxu1 %v6359_v15 }
 0x280   :  { %1256 = vmatprep.subr.bf16.mxu0 %v6371_v30  ;;  %5086 = vmatprep.subr.bf16.mxu1 %v7758_v63 }
 0x282   :  { %4689 = vmatmul.mubr.msk.bf16.vlgmr.msra.gmra.mrb[20].mxu0 %vm436_vm3, %v885_v3  ;;  %5083 = vmatmul.mubr.msk.bf16.vlgmr.msra.gmra.mrb[24].mxu1 %vm436_vm3, %v885_v3  ;;  %v6566_v3 = vrot.slane %v4611_v60, %v6285_v29 }
 0x283   :  { %1257 = vmatpush1.bf16.msra.mxu0 %v6373_v33  ;;  %5087 = vmatpush3.bf16.msra.mxu1 %v6375_v34 }
 0x284   :  { %1258 = vmatprep.subr.bf16.mxu0 %v6380_v35  ;;  %5088 = vmatprep.subr.bf16.mxu1 %v7758_v63  ;;  %7761 = vst [vmem:[#allocation41_spill] sm:$0xff] %v6566_v3 }
 0x285   :  { %1288 = vmatprep.mubr.bf16.mxu0 %v7759_v2  ;;  %5094 = vmatprep.mubr.msk.bf16.mxu1 %vm6130_vm0, %v7758_v63 }
 0x287   :  { %1259 = vmatpush1.bf16.msra.mxu0 %v6383_v36  ;;  %5089 = vmatpush3.bf16.msra.mxu1 %v6385_v37 }
 0x288   :  { %1260 = vmatprep.subr.bf16.mxu0 %v6390_v39  ;;  %5090 = vmatprep.subr.bf16.mxu1 %v7758_v63 }
 0x28b   :  { %1261 = vmatpush1.bf16.msra.mxu0 %v6393_v40  ;;  %5091 = vmatpush3.bf16.msra.mxu1 %v6395_v41 }
 0x28c   :  { %1262 = vmatprep.subr.bf16.mxu0 %v6400_v42  ;;  %5092 = vmatprep.subr.bf16.mxu1 %v7758_v63  ;;  %v7762_v42 = vld [vmem:[#allocation17_spill] sm:$0xff] }
 0x28d   :  { %v6569_v41 = vrot.slane %v4611_v60, %v7762_v42 }
 0x28f   :  { %1263 = vmatpush1.bf16.msra.mxu0 %v6403_v43  ;;  %5093 = vmatpush3.bf16.msra.mxu1 %v6405_v45  ;;  %7763 = vst [vmem:[#allocation42_spill] sm:$0xff] %v6569_v41 }
 0x290   :  { %5098 = vmatprep.subr.bf16.mxu1 %v7758_v63  ;;  %1405 = vmatprep.subr.bf16.mxu0 %v6559_v46 }
 0x31f   :  { %v819_v40 = vpop.f32.mrb[12].mxu0  ;;  %v860_v43 = vpop.f32.mrb[12].mxu1 }
 0x320   :  { %v820_v45 = vadd.f32 %v819_v40, %v6566_v3  ;;  %v821_v39 = vpop.f32.mrb[13].mxu0  ;;  %v5048_v37 = vpop.f32.mrb[13].mxu1  ;;  %v6574_v40 = vrot.slane %v4611_v60, %v6291_v31 }
 0x321   :  { %v823_v36 = vpop.f32.mrb[14].mxu0  ;;  %v863_v35 = vpop.f32.mrb[14].mxu1  ;;  %v822_v30 = vadd.f32 %v821_v39, %v6569_v41 }
 0x322   :  { %v4669_v34 = vmul.f32 -1.442695, %v820_v45  ;;  %v824_v46 = vpop.f32.mrb[15].mxu0  ;;  %v5049_v33 = vpop.f32.mrb[15].mxu1  ;;  %7764 = vst [vmem:[#allocation43_spill] sm:$0xff] %v6574_v40 }
 0x323   :  { %v4670_v15 = vmul.f32 -1.442695, %v822_v30  ;;  %v6579_v33 = vld [vmem:[%s7635_s5 + $0x2] ss:$0 sm:$0xff] }
 0x324   :  { %5690 = vpow2.f32 %v4669_v34 }
 0x325   :  { %5692 = vpow2.f32 %v4670_v15  ;;  %v861_v15 = vadd.f32 %v860_v43, %v6574_v40 }
 0x32e   :  { %v5691_v29 = vpop.eup %5690 }
 0x32f   :  { %v869_v14 = vadd.f32 1.0, %v5691_v29  ;;  %v5693_v42 = vpop.eup %5692 }
 0x330   :  { %v875_v36 = vadd.f32 1.0, %v5693_v42 }
 0x331   :  { %5694 = vrcp.f32 %v869_v14 }
 0x332   :  { %5696 = vrcp.f32 %v875_v36 }
 0x335   :  { %v964_v13 = vpop.f32.mrb[16].mxu1 }
 0x336   :  { %v5060_v12 = vpop.f32.mrb[17].mxu1 }
 0x337   :  { %v967_v11 = vpop.f32.mrb[18].mxu1 }
 0x338   :  { %v5061_v35 = vpop.f32.mrb[19].mxu1 }
 0x33b   :  { %v5695_v34 = vpop.eup %5694 }
 0x33c   :  { %v878_v29 = vmul.f32 %v5695_v34, %v6579_v33  ;;  %v5697_v30 = vpop.eup %5696 }
 0x33d   :  { %v881_v41 = vsub.f32 1.0, %v5697_v30 }
 0x33e   :  { %v879_v14 = vadd.f32 %v878_v29, %v861_v15 }
 0x340   :  { %5698 = vtanh.f32 %v879_v14 }
 0x345   :  { %v1068_v12 = vpop.f32.mrb[16].mxu0  ;;  %v1109_v11 = vpop.f32.mrb[20].mxu1 }
 0x346   :  { %v5458_v37 = vadd.f32 %v1068_v12, %v6416_v50  ;;  %v1070_v39 = vpop.f32.mrb[17].mxu0  ;;  %v5072_v42 = vpop.f32.mrb[21].mxu1 }
 0x347   :  { %v1072_v45 = vpop.f32.mrb[18].mxu0  ;;  %v1112_v46 = vpop.f32.mrb[22].mxu1  ;;  %v5459_v43 = vadd.f32 %v1070_v39, %v6419_v51 }
 0x348   :  { %v4687_v60 = vmul.f32 -1.442695, %v5458_v37  ;;  %v1073_v35 = vpop.f32.mrb[19].mxu0  ;;  %v5073_v31 = vpop.f32.mrb[23].mxu1 }
 0x349   :  { %v4688_v34 = vmul.f32 -1.442695, %v5459_v43 }
 0x34a   :  { %v5699_v40 = vpop.eup %5698  ;;  %5700 = vpow2.f32 %v4687_v60 }
 0x34b   :  { %v6585_v36 = vmul.f32 %v5699_v40, %v881_v41  ;;  %5702 = vpow2.f32 %v4688_v34 }
 0x354   :  { %v5701_v15 = vpop.eup %5700 }
 0x355   :  { %v1119_v29 = vadd.f32 1.0, %v5701_v15  ;;  %v1171_v14 = vpop.f32.mrb[20].mxu0  ;;  %v1212_v12 = vpop.f32.mrb[24].mxu1  ;;  %v1129_v15 = vadd.f32 %v6431_v4, %v1109_v11 }
 0x356   :  { %v1219_v50 = vrot.slane %v1171_v14, 4  ;;  %v1173_v42 = vpop.f32.mrb[21].mxu0  ;;  %v5084_v45 = vpop.f32.mrb[25].mxu1 }
 0x357   :  { %5704 = vrcp.f32 %v1119_v29  ;;  %v1229_v37 = vrot.slane %v1173_v42, 4  ;;  %v1175_v46 = vpop.f32.mrb[22].mxu0  ;;  %v1215_v31 = vpop.f32.mrb[26].mxu1  ;;  %v965_v29 = vadd.f32 %v964_v13, %v6426_v7 }
 0x358   :  { %v1221_v30 = vadd.f32 %v1219_v50, %v6299_v38  ;;  %v1176_v39 = vpop.f32.mrb[23].mxu0  ;;  %v5085_v35 = vpop.f32.mrb[27].mxu1 }
 0x359   :  { %v1231_v41 = vadd.f32 %v1229_v37, %v6306_v48  ;;  %v5703_v60 = vpop.eup %5702 }
 0x35a   :  { %v4691_v40 = vmul.f32 -1.442695, %v1221_v30  ;;  %v1126_v34 = vadd.f32 1.0, %v5703_v60  ;;  %v1238_v30 = vadd.f32 %v6314_v55, %v1212_v12  ;;  %v6604_v12 = vld [vmem:[#allocation5 + $0xdc] ss:$12 sps:$4 sm:$0xff]  }
 0x35b   :  { %v4692_v43 = vmul.f32 -1.442695, %v1231_v41 }
 0x35c   :  { %5706 = vpow2.f32 %v4691_v40  ;;  %v1240_v60 = vrot.slane %v1238_v30, 4  ;;  %v6636_v30 = vld [vmem:[#allocation5 + $0x108] ss:$12 sps:$4 sm:$0xff]  }
 0x35d   :  { %5708 = vpow2.f32 %v4692_v43  ;;  %v1248_v43 = vrot.slane %v6469_v47, 6  ;;  %v6613_v47 = vld [vmem:[#allocation5 + $0xd8] ss:$12 sps:$4 sm:$0xff]  }
 0x35e   :  { %5710 = vrcp.f32 %v1126_v34 }
 0x361   :  { %v5705_v14 = vpop.eup %5704 }
 0x362   :  { %v1130_v42 = vmul.f32 %v5705_v14, %v1129_v15 }
 0x364   :  { %v1131_v45 = vadd.f32 %v1130_v42, %v965_v29  ;;  %v6596_v29 = vld [vmem:[#allocation5 + $0xc0] ss:$12 sps:$4 sm:$0xff]   ;;  %v6598_v42 = vld [vmem:[#allocation5 + $0xc8] ss:$12 sps:$4 sm:$0xff]  }
 0x366   :  { %v5707_v46 = vpop.eup %5706  ;;  %5712 = vtanh.f32 %v1131_v45 }
 0x367   :  { %v5709_v50 = vpop.eup %5708  ;;  %v1225_v31 = vadd.f32 1.0, %v5707_v46  ;;  %v6615_v46 = vld [vmem:[#allocation5 + $0xe0] ss:$12 sps:$4 sm:$0xff]  }
 0x368   :  { %v1235_v39 = vadd.f32 1.0, %v5709_v50  ;;  %v5711_v37 = vpop.eup %5710  ;;  %v6619_v50 = vld [vmem:[#allocation5 + $0xf4] ss:$12 sps:$4 sm:$0xff]  }
 0x369   :  { %5714 = vrcp.f32 %v1225_v31  ;;  %v1133_v35 = vsub.f32 1.0, %v5711_v37  ;;  %v1135_v11 = vmul.f32 %v5711_v37, %v6436_v61  ;;  %v6626_v31 = vld [vmem:[#allocation5 + $0xf0] ss:$12 sps:$4 sm:$0xff]   ;;  %v6632_v37 = vld [vmem:[#allocation5 + $0x10c] ss:$12 sps:$4 sm:$0xff]  }
 0x36a   :  { %5716 = vrcp.f32 %v1235_v39  ;;  %v6628_v39 = vld [vmem:[#allocation5 + $0xf8] ss:$12 sps:$4 sm:$0xff]  }
 0x370   :  { %v5713_v41 = vpop.eup %5712 }
 0x371   :  { %v1134_v40 = vmul.f32 %v5713_v41, %v1133_v35  ;;  %v6638_v35 = vld [vmem:[#allocation5 + $0x110] ss:$12 sps:$4 sm:$0xff]  }
 0x373   :  { %v5715_v13 = vpop.eup %5714  ;;  %v6594_v34 = vadd.f32 %v1135_v11, %v1134_v40 }
 0x374   :  { %v5717_v15 = vpop.eup %5716  ;;  %v1242_v14 = vmul.f32 %v5715_v13, %v1240_v60  ;;  %v1337_v60 = vpack.c.bf16 %v6585_v36, %v6585_v36  ;;  %v7765_v13 = vld [vmem:[#allocation14_spill] sm:$0xff] }
 0x375   :  { %v6602_v55 = vpack.c.bf16 %v6594_v34, %v6594_v34  ;;  %v1250_v61 = vmul.f32 %v5717_v15, %v1248_v43  ;;  %v1245_v41 = vsub.f32 1.0, %v5717_v15  ;;  %v7782_v15 = vld [vmem:[#allocation37_spill] sm:$0xff] }
 0x376   :  { %v1243_v45 = vadd.f32 %v1242_v14, %v6316_v56  ;;  %v7783_v14 = vld [vmem:[#allocation40_spill] sm:$0xff] }
 0x377   :  { %4693 = vmatmul.mubr.msk.bf16.vlgmr.msra.gmra.mrb[24].mxu0 %vm436_vm3, %v6602_v55  ;;  %5095 = vmatmul.mubr.msk.bf16.vlgmr.msra.gmra.mrb[28].mxu1 %vm436_vm3, %v6602_v55 }
 0x378   :  { %5718 = vtanh.f32 %v1243_v45  ;;  %1406 = vmatpush1.bf16.msra.mxu0 %v6596_v29  ;;  %5099 = vmatpush3.bf16.msra.mxu1 %v6598_v42 }
 0x379   :  { %1407 = vmatprep.subr.bf16.mxu0 %v6604_v12  ;;  %5100 = vmatprep.subr.bf16.mxu1 %v7758_v63 }
 0x37a   :  { %1437 = vmatprep.mubr.bf16.mxu0 %v7759_v2  ;;  %5106 = vmatprep.mubr.msk.bf16.mxu1 %vm6130_vm0, %v7758_v63 }
 0x37c   :  { %1408 = vmatpush1.bf16.msra.mxu0 %v6613_v47  ;;  %5101 = vmatpush3.bf16.msra.mxu1 %v6615_v46 }
 0x37d   :  { %1409 = vmatprep.subr.bf16.mxu0 %v6619_v50  ;;  %5102 = vmatprep.subr.bf16.mxu1 %v7758_v63 }
 0x380   :  { %1410 = vmatpush1.bf16.msra.mxu0 %v6626_v31  ;;  %5103 = vmatpush3.bf16.msra.mxu1 %v6628_v39 }
 0x381   :  { %1411 = vmatprep.subr.bf16.mxu0 %v6632_v37  ;;  %5104 = vmatprep.subr.bf16.mxu1 %v7758_v63 }
 0x382   :  { %v5719_v11 = vpop.eup %5718 }
 0x383   :  { %v1246_v40 = vmul.f32 %v5719_v11, %v1245_v41 }
 0x384   :  { %1412 = vmatpush1.bf16.msra.mxu0 %v6636_v30  ;;  %5105 = vmatpush3.bf16.msra.mxu1 %v6638_v35 }
 0x385   :  { %1514 = vmatprep.subr.bf16.mxu0 %v7765_v13  ;;  %5110 = vmatprep.subr.bf16.mxu1 %v7758_v63  ;;  %v6648_v43 = vadd.f32 %v1250_v61, %v1246_v40 }
 0x387   :  { %4707 = vmatmul.mubr.msk.bf16.vlgmr.msra.gmra.mrb[24].mxu0 %vm436_vm3, %v1337_v60  ;;  %5107 = vmatmul.mubr.msk.bf16.vlgmr.msra.gmra.mrb[32].mxu1 %vm436_vm3, %v1337_v60 }
 0x388   :  { %1515 = vmatpush1.bf16.msra.mxu0 %v6243_v17  ;;  %5111 = vmatpush3.bf16.msra.mxu1 %v6245_v18  ;;  %v1508_v17 = vpack.c.bf16 %v6648_v43, %v6648_v43 }
 0x389   :  { %1516 = vmatprep.subr.bf16.mxu0 %v6250_v19  ;;  %5112 = vmatprep.subr.bf16.mxu1 %v7758_v63  ;;  %v7766_v19 = vld [vmem:[#allocation21_spill] sm:$0xff] }
 0x38a   :  { %1546 = vmatprep.mubr.bf16.mxu0 %v7759_v2  ;;  %5118 = vmatprep.mubr.msk.bf16.mxu1 %vm6130_vm0, %v7758_v63  ;;  %v1510_v18 = vrot.slane %v1508_v17, 2 }
 0x38c   :  { %1517 = vmatpush1.bf16.msra.mxu0 %v6253_v20  ;;  %5113 = vmatpush3.bf16.msra.mxu1 %v6255_v21  ;;  %v7767_v20 = vld [vmem:[#allocation22_spill] sm:$0xff]  ;;  %v7768_v21 = vld [vmem:[#allocation23_spill] sm:$0xff] }
 0x38d   :  { %1518 = vmatprep.subr.bf16.mxu0 %v6257_v22  ;;  %5114 = vmatprep.subr.bf16.mxu1 %v7758_v63  ;;  %v7769_v22 = vld [vmem:[#allocation24_spill] sm:$0xff] }
 0x390   :  { %1519 = vmatpush1.bf16.msra.mxu0 %v6262_v23  ;;  %5115 = vmatpush3.bf16.msra.mxu1 %v6264_v24  ;;  %v7770_v23 = vld [vmem:[#allocation25_spill] sm:$0xff]  ;;  %v7771_v24 = vld [vmem:[#allocation26_spill] sm:$0xff] }
 0x391   :  { %1520 = vmatprep.subr.bf16.mxu0 %v6268_v25  ;;  %5116 = vmatprep.subr.bf16.mxu1 %v7758_v63  ;;  %v7772_v25 = vld [vmem:[#allocation27_spill] sm:$0xff] }
 0x394   :  { %1521 = vmatpush1.bf16.msra.mxu0 %v6272_v26  ;;  %5117 = vmatpush3.bf16.msra.mxu1 %v6274_v27  ;;  %v7773_v26 = vld [vmem:[#allocation28_spill] sm:$0xff]  ;;  %v7774_v27 = vld [vmem:[#allocation29_spill] sm:$0xff] }
 0x395   :  { %1595 = vmatprep.subr.bf16.mxu0 %v6463_v52  ;;  %5122 = vmatprep.subr.bf16.mxu1 %v7758_v63 }
 0x397   :  { %4711 = vmatmul.mubr.msk.bf16.vlgmr.msra.gmra.mrb[28].mxu0 %vm436_vm3, %v1510_v18  ;;  %5119 = vmatmul.mubr.msk.bf16.vlgmr.msra.gmra.mrb[36].mxu1 %vm436_vm3, %v1510_v18 }
 0x398   :  { %1596 = vmatpush1.bf16.msra.mxu0 %v6473_v62  ;;  %5123 = vmatpush3.bf16.msra.mxu1 %v6475_v57 }
 0x399   :  { %1597 = vmatprep.subr.bf16.mxu0 %v6477_v53  ;;  %5124 = vmatprep.subr.bf16.mxu1 %v7758_v63 }
 0x39a   :  { %1627 = vmatprep.mubr.bf16.mxu0 %v7759_v2  ;;  %5130 = vmatprep.mubr.msk.bf16.mxu1 %vm6130_vm0, %v7758_v63 }
 0x39c   :  { %1598 = vmatpush1.bf16.msra.mxu0 %v6483_v5  ;;  %5125 = vmatpush3.bf16.msra.mxu1 %v6485_v16 }
 0x39d   :  { %1599 = vmatprep.subr.bf16.mxu0 %v6489_v32  ;;  %5126 = vmatprep.subr.bf16.mxu1 %v7758_v63 }
 0x3a0   :  { %1600 = vmatpush1.bf16.msra.mxu0 %v6496_v49  ;;  %5127 = vmatpush3.bf16.msra.mxu1 %v6498_v44 }
 0x3a1   :  { %1601 = vmatprep.subr.bf16.mxu0 %v6502_v58  ;;  %5128 = vmatprep.subr.bf16.mxu1 %v7758_v63 }
 0x3a4   :  { %1602 = vmatpush1.bf16.msra.mxu0 %v6506_v59  ;;  %5129 = vmatpush3.bf16.msra.mxu1 %v6508_v54 }
 0x3a5   :  { %1698 = vmatprep.subr.bf16.mxu0 %v6278_v28  ;;  %5134 = vmatprep.subr.bf16.mxu1 %v7758_v63  ;;  %v7775_v28 = vld [vmem:[#allocation30_spill] sm:$0xff] }
 0x3a7   :  { %4713 = vmatmul.mubr.msk.bf16.vlgmr.msra.gmra.mrb[28].mxu0 %vm436_vm3, %v6602_v55  ;;  %5131 = vmatmul.mubr.msk.bf16.vlgmr.msra.gmra.mrb[40].mxu1 %vm436_vm3, %v6602_v55 }
 0x3a8   :  { %1699 = vmatpush1.bf16.msra.mxu0 %v6322_v0  ;;  %5135 = vmatpush3.bf16.msra.mxu1 %v6324_v1  ;;  %v7776_v0 = vld [vmem:[#allocation31_spill] sm:$0xff]  ;;  %v7777_v1 = vld [vmem:[#allocation32_spill] sm:$0xff] }
 0x3a9   :  { %1700 = vmatprep.subr.bf16.mxu0 %v6328_v6  ;;  %5136 = vmatprep.subr.bf16.mxu1 %v7758_v63  ;;  %v7778_v6 = vld [vmem:[#allocation33_spill] sm:$0xff] }
 0x3aa   :  { %1730 = vmatprep.mubr.bf16.mxu0 %v7759_v2  ;;  %5142 = vmatprep.mubr.msk.bf16.mxu1 %vm6130_vm0, %v7758_v63 }
 0x3ac   :  { %1701 = vmatpush1.bf16.msra.mxu0 %v6334_v8  ;;  %5137 = vmatpush3.bf16.msra.mxu1 %v6336_v9  ;;  %v7779_v8 = vld [vmem:[#allocation34_spill] sm:$0xff]  ;;  %v7780_v9 = vld [vmem:[#allocation35_spill] sm:$0xff] }
 0x3ad   :  { %1702 = vmatprep.subr.bf16.mxu0 %v6340_v10  ;;  %5138 = vmatprep.subr.bf16.mxu1 %v7758_v63  ;;  %v7781_v10 = vld [vmem:[#allocation36_spill] sm:$0xff] }
 0x3b0   :  { %1703 = vmatpush1.bf16.msra.mxu0 %v7766_v19  ;;  %5139 = vmatpush3.bf16.msra.mxu1 %v7767_v20 }
 0x3b1   :  { %1704 = vmatprep.subr.bf16.mxu0 %v7768_v21  ;;  %5140 = vmatprep.subr.bf16.mxu1 %v7758_v63 }
 0x3b4   :  { %1705 = vmatpush1.bf16.msra.mxu0 %v7769_v22  ;;  %5141 = vmatpush3.bf16.msra.mxu1 %v7770_v23  ;;  %v7784_v23 = vld [vmem:[#allocation42_spill] sm:$0xff] }
 0x3b5   :  { %1817 = vmatprep.subr.bf16.mxu0 %v7771_v24  ;;  %5146 = vmatprep.subr.bf16.mxu1 %v7758_v63 }
 0x3b7   :  { %4717 = vmatmul.mubr.msk.bf16.vlgmr.msra.gmra.mrb[32].mxu0 %vm436_vm3, %v1510_v18  ;;  %5143 = vmatmul.mubr.msk.bf16.vlgmr.msra.gmra.mrb[44].mxu1 %vm436_vm3, %v1510_v18 }
 0x3b8   :  { %1818 = vmatpush1.bf16.msra.mxu0 %v7772_v25  ;;  %5147 = vmatpush3.bf16.msra.mxu1 %v7773_v26 }
 0x3b9   :  { %1819 = vmatprep.subr.bf16.mxu0 %v7774_v27  ;;  %5148 = vmatprep.subr.bf16.mxu1 %v7758_v63 }
 0x3ba   :  { %1849 = vmatprep.mubr.bf16.mxu0 %v7759_v2  ;;  %5154 = vmatprep.mubr.msk.bf16.mxu1 %vm6130_vm0, %v7758_v63 }
 0x3bc   :  { %1820 = vmatpush1.bf16.msra.mxu0 %v7775_v28  ;;  %5149 = vmatpush3.bf16.msra.mxu1 %v7776_v0 }
 0x3bd   :  { %1821 = vmatprep.subr.bf16.mxu0 %v7777_v1  ;;  %5150 = vmatprep.subr.bf16.mxu1 %v7758_v63 }
 0x3c0   :  { %1822 = vmatpush1.bf16.msra.mxu0 %v7778_v6  ;;  %5151 = vmatpush3.bf16.msra.mxu1 %v7779_v8 }
 0x3c1   :  { %1823 = vmatprep.subr.bf16.mxu0 %v7780_v9  ;;  %5152 = vmatprep.subr.bf16.mxu1 %v7758_v63 }
 0x3c4   :  { %1824 = vmatpush1.bf16.msra.mxu0 %v7781_v10  ;;  %5153 = vmatpush3.bf16.msra.mxu1 %v7782_v15 }
 0x3c5   :  { %1902 = vmatprep.subr.bf16.mxu0 %v7783_v14  ;;  %5158 = vmatprep.subr.bf16.mxu1 %v7758_v63 }
 0x44a   :  { %v1331_v55 = vpop.f32.mrb[28].mxu1 }
 0x44b   :  { %v5096_v61 = vpop.f32.mrb[29].mxu1 }
 0x44c   :  { %v1334_v45 = vpop.f32.mrb[30].mxu1  ;;  %v7785_v61 = vld [vmem:[#allocation43_spill] sm:$0xff] }
 0x44d   :  { %v5097_v41 = vpop.f32.mrb[31].mxu1  ;;  %v1332_v45 = vadd.f32 %v1331_v55, %v7785_v61 }
 0x45a   :  { %v1439_v11 = vpop.f32.mrb[24].mxu0  ;;  %v1480_v40 = vpop.f32.mrb[32].mxu1 }
 0x45b   :  { %v5460_v60 = vadd.f32 %v1439_v11, %v6566_v3  ;;  %v1441_v13 = vpop.f32.mrb[25].mxu0  ;;  %v5108_v17 = vpop.f32.mrb[33].mxu1  ;;  %v1500_v10 = vadd.f32 %v6579_v33, %v1480_v40 }
 0x45c   :  { %v1443_v18 = vpop.f32.mrb[26].mxu0  ;;  %v1483_v19 = vpop.f32.mrb[34].mxu1  ;;  %v5461_v24 = vadd.f32 %v1441_v13, %v7784_v23  ;;  %v7786_v17 = vld [vmem:[#allocation38_spill] sm:$0xff] }
 0x45d   :  { %v4709_v20 = vmul.f32 -1.442695, %v5460_v60  ;;  %v1444_v21 = vpop.f32.mrb[27].mxu0  ;;  %v5109_v22 = vpop.f32.mrb[35].mxu1 }
 0x45e   :  { %v4710_v25 = vmul.f32 -1.442695, %v5461_v24 }
 0x45f   :  { %5720 = vpow2.f32 %v4709_v20 }
 0x460   :  { %5722 = vpow2.f32 %v4710_v25 }
 0x469   :  { %v5721_v26 = vpop.eup %5720 }
 0x46a   :  { %v1490_v27 = vadd.f32 1.0, %v5721_v26  ;;  %v1589_v28 = vpop.f32.mrb[36].mxu1  ;;  %v5723_v8 = vpop.eup %5722 }
 0x46b   :  { %v5120_v0 = vpop.f32.mrb[37].mxu1  ;;  %v1497_v9 = vadd.f32 1.0, %v5723_v8 }
 0x46c   :  { %5724 = vrcp.f32 %v1490_v27  ;;  %v1592_v1 = vpop.f32.mrb[38].mxu1 }
 0x46d   :  { %v5121_v6 = vpop.f32.mrb[39].mxu1  ;;  %5726 = vrcp.f32 %v1497_v9 }
 0x476   :  { %v5725_v15 = vpop.eup %5724 }
 0x477   :  { %v1501_v41 = vmul.f32 %v5725_v15, %v1500_v10  ;;  %v5727_v27 = vpop.eup %5726 }
 0x478   :  { %v1504_v0 = vsub.f32 1.0, %v5727_v27  ;;  %v1506_v6 = vmul.f32 %v5727_v27, %v6585_v36 }
 0x479   :  { %v1502_v11 = vadd.f32 %v1501_v41, %v1332_v45 }
 0x47a   :  { %v1629_v60 = vpop.f32.mrb[28].mxu0  ;;  %v1670_v13 = vpop.f32.mrb[40].mxu1 }
 0x47b   :  { %5728 = vtanh.f32 %v1502_v11  ;;  %v5462_v18 = vadd.f32 %v1629_v60, %v7786_v17  ;;  %v1631_v19 = vpop.f32.mrb[29].mxu0  ;;  %v5132_v20 = vpop.f32.mrb[41].mxu1 }
 0x47c   :  { %v1633_v21 = vpop.f32.mrb[30].mxu0  ;;  %v1673_v22 = vpop.f32.mrb[42].mxu1  ;;  %v5463_v40 = vadd.f32 %v1631_v19, %v6419_v51 }
 0x47d   :  { %v4715_v24 = vmul.f32 -1.442695, %v5462_v18  ;;  %v1634_v25 = vpop.f32.mrb[31].mxu0  ;;  %v5133_v26 = vpop.f32.mrb[43].mxu1 }
 0x47e   :  { %v4716_v55 = vmul.f32 -1.442695, %v5463_v40 }
 0x47f   :  { %5730 = vpow2.f32 %v4715_v24 }
 0x480   :  { %5732 = vpow2.f32 %v4716_v55 }
 0x485   :  { %v5729_v1 = vpop.eup %5728 }
 0x486   :  { %v1505_v8 = vmul.f32 %v5729_v1, %v1504_v0  ;;  %v1690_v0 = vadd.f32 %v6431_v4, %v1670_v13 }
 0x488   :  { %v6745_v9 = vadd.f32 %v1506_v6, %v1505_v8  ;;  %v1590_v6 = vadd.f32 %v1589_v28, %v6426_v7 }
 0x489   :  { %v5731_v10 = vpop.eup %5730 }
 0x48a   :  { %v1680_v15 = vadd.f32 1.0, %v5731_v10  ;;  %v1732_v45 = vpop.f32.mrb[32].mxu0  ;;  %v1773_v41 = vpop.f32.mrb[44].mxu1 }
 0x48b   :  { %v1780_v11 = vrot.slane %v1732_v45, 2  ;;  %v1734_v60 = vpop.f32.mrb[33].mxu0  ;;  %v5144_v18 = vpop.f32.mrb[45].mxu1 }
 0x48c   :  { %5734 = vrcp.f32 %v1680_v15  ;;  %v1790_v19 = vrot.slane %v1734_v60, 2  ;;  %v1736_v20 = vpop.f32.mrb[34].mxu0  ;;  %v1776_v21 = vpop.f32.mrb[46].mxu1  ;;  %v6754_v60 = vld [vmem:[%s7635_s5] ss:$0 sm:$0xff] }
 0x48d   :  { %v1782_v22 = vadd.f32 %v1780_v11, %v6299_v38  ;;  %v1737_v24 = vpop.f32.mrb[35].mxu0  ;;  %v5145_v25 = vpop.f32.mrb[47].mxu1  ;;  %v1799_v4 = vadd.f32 %v6754_v60, %v1773_v41 }
 0x48e   :  { %v1792_v36 = vadd.f32 %v1790_v19, %v6306_v48  ;;  %v5733_v40 = vpop.eup %5732 }
 0x48f   :  { %v4719_v26 = vmul.f32 -1.442695, %v1782_v22  ;;  %v1687_v55 = vadd.f32 1.0, %v5733_v40  ;;  %v1801_v20 = vrot.slane %v1799_v4, 2  ;;  %v1809_v22 = vrot.slane %v6648_v43, 6 }
 0x490   :  { %v4720_v27 = vmul.f32 -1.442695, %v1792_v36 }
 0x491   :  { %5736 = vpow2.f32 %v4719_v26 }
 0x492   :  { %5738 = vpow2.f32 %v4720_v27  ;;  %v1898_v27 = vpack.c.bf16 %v6745_v9, %v6745_v9 }
 0x493   :  { %5740 = vrcp.f32 %v1687_v55  ;;  %v6789_v55 = vld [vmem:[#allocation2 + $0x4] ss:$12 sps:$4 sm:$0xff]  }
 0x496   :  { %v5735_v1 = vpop.eup %5734 }
 0x497   :  { %v1691_v8 = vmul.f32 %v5735_v1, %v1690_v0  ;;  %v6797_v1 = vld [vmem:[#allocation2] ss:$12 sps:$4 sm:$0xff]  }
 0x499   :  { %v1692_v10 = vadd.f32 %v1691_v8, %v1590_v6  ;;  %v6800_v6 = vld [vmem:[#allocation2 + $0x8] ss:$12 sps:$4 sm:$0xff]  }
 0x49a   :  { %v6803_v8 = vld [vmem:[#allocation2 + $0x1c] ss:$12 sps:$4 sm:$0xff]  }
 0x49b   :  { %v5737_v15 = vpop.eup %5736  ;;  %5742 = vtanh.f32 %v1692_v10  ;;  %v6810_v10 = vld [vmem:[#allocation2 + $0x18] ss:$12 sps:$4 sm:$0xff]  }
 0x49c   :  { %v5739_v38 = vpop.eup %5738  ;;  %v1786_v45 = vadd.f32 1.0, %v5737_v15  ;;  %v6813_v15 = vld [vmem:[#allocation2 + $0x20] ss:$12 sps:$4 sm:$0xff]  }
 0x49d   :  { %v1796_v11 = vadd.f32 1.0, %v5739_v38  ;;  %v5741_v48 = vpop.eup %5740  ;;  %v6816_v38 = vld [vmem:[#allocation2 + $0x34] ss:$12 sps:$4 sm:$0xff]  }
 0x49e   :  { %5744 = vrcp.f32 %v1786_v45  ;;  %v1694_v13 = vsub.f32 1.0, %v5741_v48  ;;  %v1696_v18 = vmul.f32 %v5741_v48, %v6594_v34  ;;  %v6820_v45 = vld [vmem:[#allocation2 + $0x30] ss:$12 sps:$4 sm:$0xff]   ;;  %v6826_v48 = vld [vmem:[#allocation2 + $0x4c] ss:$12 sps:$4 sm:$0xff]  }
 0x49f   :  { %5746 = vrcp.f32 %v1796_v11  ;;  %v6823_v11 = vld [vmem:[#allocation2 + $0x38] ss:$12 sps:$4 sm:$0xff]  }
 0x4a5   :  { %v5743_v28 = vpop.eup %5742 }
 0x4a6   :  { %v1695_v19 = vmul.f32 %v5743_v28, %v1694_v13  ;;  %v6832_v13 = vld [vmem:[#allocation2 + $0x48] ss:$12 sps:$4 sm:$0xff]   ;;  %v6835_v28 = vld [vmem:[#allocation2 + $0x50] ss:$12 sps:$4 sm:$0xff]  }
 0x4a8   :  { %v5745_v21 = vpop.eup %5744  ;;  %v6759_v24 = vadd.f32 %v1696_v18, %v1695_v19  ;;  %v6906_v19 = vld [vmem:[#allocation2 + $0x64] ss:$12 sps:$4 sm:$0xff]  }
 0x4a9   :  { %v5747_v25 = vpop.eup %5746  ;;  %v1803_v36 = vmul.f32 %v5745_v21, %v1801_v20  ;;  %7793 = vst [vmem:[#allocation26_spill] sm:$0xff] %v6906_v19  ;;  %v6912_v20 = vld [vmem:[#allocation2 + $0x60] ss:$12 sps:$4 sm:$0xff]   ;;  %v6915_v21 = vld [vmem:[#allocation2 + $0x68] ss:$12 sps:$4 sm:$0xff]  }
 0x4aa   :  { %v6763_v26 = vpack.c.bf16 %v6759_v24, %v6759_v24  ;;  %v1811_v40 = vmul.f32 %v5747_v25, %v1809_v22  ;;  %7794 = vst [vmem:[#allocation27_spill] sm:$0xff] %v6912_v20  ;;  %7795 = vst [vmem:[#allocation28_spill] sm:$0xff] %v6915_v21  ;;  %v6918_v22 = vld [vmem:[#allocation2 + $0x7c] ss:$12 sps:$4 sm:$0xff]  }
 0x4ab   :  { %v1804_v41 = vadd.f32 %v1803_v36, %v6316_v56  ;;  %v1806_v56 = vsub.f32 1.0, %v5747_v25  ;;  %7796 = vst [vmem:[#allocation29_spill] sm:$0xff] %v6918_v22  ;;  %v6925_v25 = vld [vmem:[#allocation2 + $0x78] ss:$12 sps:$4 sm:$0xff]   ;;  %v6928_v36 = vld [vmem:[#allocation2 + $0x80] ss:$12 sps:$4 sm:$0xff]  }
 0x4ac   :  { %4721 = vmatmul.mubr.msk.bf16.vlgmr.msra.gmra.mrb[36].mxu0 %vm436_vm3, %v6763_v26  ;;  %5155 = vmatmul.mubr.msk.bf16.vlgmr.msra.gmra.mrb[48].mxu1 %vm436_vm3, %v6763_v26  ;;  %7797 = vst [vmem:[#allocation30_spill] sm:$0xff] %v6925_v25  ;;  %7798 = vst [vmem:[#allocation31_spill] sm:$0xff] %v6928_v36 }
 0x4ad   :  { %5748 = vtanh.f32 %v1804_v41  ;;  %1903 = vmatpush1.bf16.msra.mxu0 %v6596_v29  ;;  %5159 = vmatpush3.bf16.msra.mxu1 %v6598_v42  ;;  %v6938_v41 = vld [vmem:[#allocation2 + $0x98] ss:$12 sps:$4 sm:$0xff]  }
 0x4ae   :  { %1904 = vmatprep.subr.bf16.mxu0 %v6604_v12  ;;  %5160 = vmatprep.subr.bf16.mxu1 %v7758_v63  ;;  %7801 = vst [vmem:[#allocation34_spill] sm:$0xff] %v6938_v41 }
 0x4af   :  { %1934 = vmatprep.mubr.bf16.mxu0 %v7759_v2  ;;  %5166 = vmatprep.mubr.msk.bf16.mxu1 %vm6130_vm0, %v7758_v63 }
 0x4b1   :  { %1905 = vmatpush1.bf16.msra.mxu0 %v6613_v47  ;;  %5161 = vmatpush3.bf16.msra.mxu1 %v6615_v46 }
 0x4b2   :  { %1906 = vmatprep.subr.bf16.mxu0 %v6619_v50  ;;  %5162 = vmatprep.subr.bf16.mxu1 %v7758_v63 }
 0x4b5   :  { %1907 = vmatpush1.bf16.msra.mxu0 %v6626_v31  ;;  %5163 = vmatpush3.bf16.msra.mxu1 %v6628_v39 }
 0x4b6   :  { %1908 = vmatprep.subr.bf16.mxu0 %v6632_v37  ;;  %5164 = vmatprep.subr.bf16.mxu1 %v7758_v63 }
 0x4b7   :  { %v5749_v34 = vpop.eup %5748 }
 0x4b8   :  { %v1807_v43 = vmul.f32 %v5749_v34, %v1806_v56  ;;  %v6941_v56 = vld [vmem:[#allocation2 + $0xac] ss:$12 sps:$4 sm:$0xff]   ;;  %v6945_v34 = vld [vmem:[#allocation2 + $0xa8] ss:$12 sps:$4 sm:$0xff]  }
 0x4b9   :  { %1909 = vmatpush1.bf16.msra.mxu0 %v6636_v30  ;;  %5165 = vmatpush3.bf16.msra.mxu1 %v6638_v35  ;;  %7802 = vst [vmem:[#allocation35_spill] sm:$0xff] %v6941_v56  ;;  %7803 = vst [vmem:[#allocation36_spill] sm:$0xff] %v6945_v34 }
 0x4ba   :  { %2011 = vmatprep.subr.bf16.mxu0 %v6789_v55  ;;  %5170 = vmatprep.subr.bf16.mxu1 %v7758_v63  ;;  %v6793_v0 = vadd.f32 %v1811_v40, %v1807_v43  ;;  %v6935_v40 = vld [vmem:[#allocation2 + $0x90] ss:$12 sps:$4 sm:$0xff]  }
 0x4bb   :  { %7800 = vst [vmem:[#allocation33_spill] sm:$0xff] %v6935_v40  ;;  %v6948_v43 = vld [vmem:[#allocation2 + $0xb0] ss:$12 sps:$4 sm:$0xff]  }
 0x4bc   :  { %4723 = vmatmul.mubr.msk.bf16.vlgmr.msra.gmra.mrb[36].mxu0 %vm436_vm3, %v1898_v27  ;;  %5167 = vmatmul.mubr.msk.bf16.vlgmr.msra.gmra.mrb[52].mxu1 %vm436_vm3, %v1898_v27  ;;  %v2005_v4 = vpack.c.bf16 %v6793_v0, %v6793_v0  ;;  %7804 = vst [vmem:[#allocation37_spill] sm:$0xff] %v6948_v43 }
 0x4bd   :  { %2012 = vmatpush1.bf16.msra.mxu0 %v6797_v1  ;;  %5171 = vmatpush3.bf16.msra.mxu1 %v6800_v6 }
 0x4be   :  { %2013 = vmatprep.subr.bf16.mxu0 %v6803_v8  ;;  %5172 = vmatprep.subr.bf16.mxu1 %v7758_v63  ;;  %v2007_v18 = vrot.slane %v2005_v4, 3 }
 0x4bf   :  { %2043 = vmatprep.mubr.bf16.mxu0 %v7759_v2  ;;  %5178 = vmatprep.mubr.msk.bf16.mxu1 %vm6130_vm0, %v7758_v63 }
 0x4c1   :  { %2014 = vmatpush1.bf16.msra.mxu0 %v6810_v10  ;;  %5173 = vmatpush3.bf16.msra.mxu1 %v6813_v15 }
 0x4c2   :  { %2015 = vmatprep.subr.bf16.mxu0 %v6816_v38  ;;  %5174 = vmatprep.subr.bf16.mxu1 %v7758_v63 }
 0x4c5   :  { %2016 = vmatpush1.bf16.msra.mxu0 %v6820_v45  ;;  %5175 = vmatpush3.bf16.msra.mxu1 %v6823_v11 }
 0x4c6   :  { %2017 = vmatprep.subr.bf16.mxu0 %v6826_v48  ;;  %5176 = vmatprep.subr.bf16.mxu1 %v7758_v63 }
 0x4c9   :  { %2018 = vmatpush1.bf16.msra.mxu0 %v6832_v13  ;;  %5177 = vmatpush3.bf16.msra.mxu1 %v6835_v28 }
 0x4ca   :  { %2092 = vmatprep.subr.bf16.mxu0 %v6463_v52  ;;  %5182 = vmatprep.subr.bf16.mxu1 %v7758_v63  ;;  %v6859_v52 = vld [vmem:[#allocation5 + $0x4] ss:$12 sps:$4 sm:$0xff]  }
 0x4cc   :  { %4727 = vmatmul.mubr.msk.bf16.vlgmr.msra.gmra.mrb[40].mxu0 %vm436_vm3, %v2007_v18  ;;  %5179 = vmatmul.mubr.msk.bf16.vlgmr.msra.gmra.mrb[56].mxu1 %vm436_vm3, %v2007_v18 }
 0x4cd   :  { %2093 = vmatpush1.bf16.msra.mxu0 %v6473_v62  ;;  %5183 = vmatpush3.bf16.msra.mxu1 %v6475_v57  ;;  %v6867_v62 = vld [vmem:[#allocation5] ss:$12 sps:$4 sm:$0xff]   ;;  %v6870_v57 = vld [vmem:[#allocation5 + $0x8] ss:$12 sps:$4 sm:$0xff]  }
 0x4ce   :  { %2094 = vmatprep.subr.bf16.mxu0 %v6477_v53  ;;  %5184 = vmatprep.subr.bf16.mxu1 %v7758_v63  ;;  %v6873_v53 = vld [vmem:[#allocation5 + $0x1c] ss:$12 sps:$4 sm:$0xff]  }
 0x4cf   :  { %2124 = vmatprep.mubr.bf16.mxu0 %v7759_v2  ;;  %5190 = vmatprep.mubr.msk.bf16.mxu1 %vm6130_vm0, %v7758_v63 }
 0x4d1   :  { %2095 = vmatpush1.bf16.msra.mxu0 %v6483_v5  ;;  %5185 = vmatpush3.bf16.msra.mxu1 %v6485_v16  ;;  %v6880_v5 = vld [vmem:[#allocation5 + $0x18] ss:$12 sps:$4 sm:$0xff]   ;;  %v6883_v16 = vld [vmem:[#allocation5 + $0x20] ss:$12 sps:$4 sm:$0xff]  }
 0x4d2   :  { %2096 = vmatprep.subr.bf16.mxu0 %v6489_v32  ;;  %5186 = vmatprep.subr.bf16.mxu1 %v7758_v63  ;;  %v6886_v32 = vld [vmem:[#allocation5 + $0x34] ss:$12 sps:$4 sm:$0xff]  }
 0x4d3   :  { %7787 = vst [vmem:[#allocation14_spill] sm:$0xff] %v6886_v32 }
 0x4d5   :  { %2097 = vmatpush1.bf16.msra.mxu0 %v6496_v49  ;;  %5187 = vmatpush3.bf16.msra.mxu1 %v6498_v44  ;;  %v6890_v49 = vld [vmem:[#allocation5 + $0x30] ss:$12 sps:$4 sm:$0xff]   ;;  %v6893_v44 = vld [vmem:[#allocation5 + $0x38] ss:$12 sps:$4 sm:$0xff]  }
 0x4d6   :  { %2098 = vmatprep.subr.bf16.mxu0 %v6502_v58  ;;  %5188 = vmatprep.subr.bf16.mxu1 %v7758_v63  ;;  %7788 = vst [vmem:[#allocation21_spill] sm:$0xff] %v6890_v49  ;;  %7789 = vst [vmem:[#allocation22_spill] sm:$0xff] %v6893_v44  ;;  %v6896_v58 = vld [vmem:[#allocation5 + $0x4c] ss:$12 sps:$4 sm:$0xff]  }
 0x4d7   :  { %7790 = vst [vmem:[#allocation23_spill] sm:$0xff] %v6896_v58 }
 0x4d9   :  { %2099 = vmatpush1.bf16.msra.mxu0 %v6506_v59  ;;  %5189 = vmatpush3.bf16.msra.mxu1 %v6508_v54  ;;  %v6900_v59 = vld [vmem:[#allocation5 + $0x48] ss:$12 sps:$4 sm:$0xff]   ;;  %v6903_v54 = vld [vmem:[#allocation5 + $0x50] ss:$12 sps:$4 sm:$0xff]  }
 0x4da   :  { %2195 = vmatprep.subr.bf16.mxu0 %v6859_v52  ;;  %5194 = vmatprep.subr.bf16.mxu1 %v7758_v63  ;;  %7791 = vst [vmem:[#allocation24_spill] sm:$0xff] %v6900_v59  ;;  %7792 = vst [vmem:[#allocation25_spill] sm:$0xff] %v6903_v54 }
 0x4dc   :  { %4729 = vmatmul.mubr.msk.bf16.vlgmr.msra.gmra.mrb[40].mxu0 %vm436_vm3, %v6763_v26  ;;  %5191 = vmatmul.mubr.msk.bf16.vlgmr.msra.gmra.mrb[60].mxu1 %vm436_vm3, %v6763_v26  ;;  %v6931_v26 = vld [vmem:[#allocation2 + $0x94] ss:$12 sps:$4 sm:$0xff]  }
 0x4dd   :  { %2196 = vmatpush1.bf16.msra.mxu0 %v6867_v62  ;;  %5195 = vmatpush3.bf16.msra.mxu1 %v6870_v57  ;;  %7799 = vst [vmem:[#allocation32_spill] sm:$0xff] %v6931_v26 }
 0x4de   :  { %2197 = vmatprep.subr.bf16.mxu0 %v6873_v53  ;;  %5196 = vmatprep.subr.bf16.mxu1 %v7758_v63 }
 0x4df   :  { %2227 = vmatprep.mubr.bf16.mxu0 %v7759_v2  ;;  %5202 = vmatprep.mubr.msk.bf16.mxu1 %vm6130_vm0, %v7758_v63 }
 0x4e1   :  { %2198 = vmatpush1.bf16.msra.mxu0 %v6880_v5  ;;  %5197 = vmatpush3.bf16.msra.mxu1 %v6883_v16 }
 0x4e2   :  { %2199 = vmatprep.subr.bf16.mxu0 %v6886_v32  ;;  %5198 = vmatprep.subr.bf16.mxu1 %v7758_v63 }
 0x4e5   :  { %2200 = vmatpush1.bf16.msra.mxu0 %v6890_v49  ;;  %5199 = vmatpush3.bf16.msra.mxu1 %v6893_v44 }
 0x4e6   :  { %2201 = vmatprep.subr.bf16.mxu0 %v6896_v58  ;;  %5200 = vmatprep.subr.bf16.mxu1 %v7758_v63 }
 0x4e9   :  { %2202 = vmatpush1.bf16.msra.mxu0 %v6900_v59  ;;  %5201 = vmatpush3.bf16.msra.mxu1 %v6903_v54 }
 0x4ea   :  { %2305 = vmatprep.subr.bf16.mxu0 %v6906_v19  ;;  %5206 = vmatprep.subr.bf16.mxu1 %v7758_v63 }
 0x4ec   :  { %4733 = vmatmul.mubr.msk.bf16.vlgmr.msra.gmra.mrb[44].mxu0 %vm436_vm3, %v2007_v18  ;;  %5203 = vmatmul.mubr.msk.bf16.vlgmr.msra.gmra.mrb[64].mxu1 %vm436_vm3, %v2007_v18 }
 0x4ed   :  { %2306 = vmatpush1.bf16.msra.mxu0 %v6912_v20  ;;  %5207 = vmatpush3.bf16.msra.mxu1 %v6915_v21 }
 0x4ee   :  { %2307 = vmatprep.subr.bf16.mxu0 %v6918_v22  ;;  %5208 = vmatprep.subr.bf16.mxu1 %v7758_v63 }
 0x4ef   :  { %2337 = vmatprep.mubr.bf16.mxu0 %v7759_v2  ;;  %5214 = vmatprep.mubr.msk.bf16.mxu1 %vm6130_vm0, %v7758_v63 }
 0x4f1   :  { %2308 = vmatpush1.bf16.msra.mxu0 %v6925_v25  ;;  %5209 = vmatpush3.bf16.msra.mxu1 %v6928_v36 }
 0x4f2   :  { %2309 = vmatprep.subr.bf16.mxu0 %v6931_v26  ;;  %5210 = vmatprep.subr.bf16.mxu1 %v7758_v63 }
 0x4f5   :  { %2310 = vmatpush1.bf16.msra.mxu0 %v6935_v40  ;;  %5211 = vmatpush3.bf16.msra.mxu1 %v6938_v41 }
 0x4f6   :  { %2311 = vmatprep.subr.bf16.mxu0 %v6941_v56  ;;  %5212 = vmatprep.subr.bf16.mxu1 %v7758_v63 }
 0x4f9   :  { %2312 = vmatpush1.bf16.msra.mxu0 %v6945_v34  ;;  %5213 = vmatpush3.bf16.msra.mxu1 %v6948_v43 }
 0x4fa   :  { %2390 = vmatprep.subr.bf16.mxu0 %v7783_v14  ;;  %5218 = vmatprep.subr.bf16.mxu1 %v7758_v63 }
 0x57f   :  { %v1892_v27 = vpop.f32.mrb[48].mxu1 }
 0x580   :  { %v5156_v4 = vpop.f32.mrb[49].mxu1 }
 0x581   :  { %v1895_v18 = vpop.f32.mrb[50].mxu1 }
 0x582   :  { %v5157_v41 = vpop.f32.mrb[51].mxu1 }
 0x58f   :  { %v1936_v40 = vpop.f32.mrb[36].mxu0  ;;  %v1977_v56 = vpop.f32.mrb[52].mxu1 }
 0x590   :  { %v5464_v26 = vadd.f32 %v1936_v40, %v6566_v3  ;;  %v1938_v36 = vpop.f32.mrb[37].mxu0  ;;  %v5168_v25 = vpop.f32.mrb[53].mxu1 }
 0x591   :  { %v1940_v22 = vpop.f32.mrb[38].mxu0  ;;  %v1980_v34 = vpop.f32.mrb[54].mxu1  ;;  %v5465_v43 = vadd.f32 %v1938_v36, %v7784_v23 }
 0x592   :  { %v4725_v21 = vmul.f32 -1.442695, %v5464_v26  ;;  %v1941_v20 = vpop.f32.mrb[39].mxu0  ;;  %v5169_v19 = vpop.f32.mrb[55].mxu1  ;;  %v1997_v22 = vadd.f32 %v6579_v33, %v1977_v56 }
 0x593   :  { %v4726_v14 = vmul.f32 -1.442695, %v5465_v43  ;;  %v1893_v20 = vadd.f32 %v1892_v27, %v7785_v61 }
 0x594   :  { %5750 = vpow2.f32 %v4725_v21 }
 0x595   :  { %5752 = vpow2.f32 %v4726_v14 }
 0x59e   :  { %v5751_v54 = vpop.eup %5750 }
 0x59f   :  { %v1987_v4 = vadd.f32 1.0, %v5751_v54  ;;  %v2086_v18 = vpop.f32.mrb[56].mxu1  ;;  %v5753_v40 = vpop.eup %5752 }
 0x5a0   :  { %v5180_v41 = vpop.f32.mrb[57].mxu1  ;;  %v1994_v3 = vadd.f32 1.0, %v5753_v40 }
 0x5a1   :  { %5754 = vrcp.f32 %v1987_v4  ;;  %v2089_v59 = vpop.f32.mrb[58].mxu1 }
 0x5a2   :  { %v5181_v58 = vpop.f32.mrb[59].mxu1  ;;  %5756 = vrcp.f32 %v1994_v3 }
 0x5ab   :  { %v5755_v25 = vpop.eup %5754 }
 0x5ac   :  { %v1998_v19 = vmul.f32 %v5755_v25, %v1997_v22  ;;  %v5757_v56 = vpop.eup %5756 }
 0x5ad   :  { %v2001_v40 = vsub.f32 1.0, %v5757_v56  ;;  %v2003_v22 = vmul.f32 %v5757_v56, %v6745_v9 }
 0x5ae   :  { %v1999_v36 = vadd.f32 %v1998_v19, %v1893_v20 }
 0x5af   :  { %v2126_v21 = vpop.f32.mrb[40].mxu0  ;;  %v2167_v26 = vpop.f32.mrb[60].mxu1 }
 0x5b0   :  { %5758 = vtanh.f32 %v1999_v36  ;;  %v5466_v54 = vadd.f32 %v2126_v21, %v7786_v17  ;;  %v2128_v34 = vpop.f32.mrb[41].mxu0  ;;  %v5192_v43 = vpop.f32.mrb[61].mxu1 }
 0x5b1   :  { %v2130_v14 = vpop.f32.mrb[42].mxu0  ;;  %v2170_v59 = vpop.f32.mrb[62].mxu1  ;;  %v5467_v33 = vadd.f32 %v2128_v34, %v6419_v51  ;;  %v7806_v34 = vld [vmem:[#allocation20_spill] sm:$0xff] }
 0x5b2   :  { %v4731_v58 = vmul.f32 -1.442695, %v5466_v54  ;;  %v2131_v4 = vpop.f32.mrb[43].mxu0  ;;  %v5193_v41 = vpop.f32.mrb[63].mxu1  ;;  %v7805_v54 = vld [vmem:[#allocation18_spill] sm:$0xff] }
 0x5b3   :  { %v4732_v27 = vmul.f32 -1.442695, %v5467_v33 }
 0x5b4   :  { %5760 = vpow2.f32 %v4731_v58 }
 0x5b5   :  { %5762 = vpow2.f32 %v4732_v27 }
 0x5ba   :  { %v5759_v3 = vpop.eup %5758 }
 0x5bb   :  { %v2002_v25 = vmul.f32 %v5759_v3, %v2001_v40  ;;  %v6967_v3 = vld [vmem:[%s7635_s5 + $0x1] ss:$0 sm:$0xff] }
 0x5bd   :  { %v6960_v20 = vadd.f32 %v2003_v22, %v2002_v25  ;;  %v2187_v22 = vadd.f32 %v6967_v3, %v2167_v26  ;;  %v2297_v26 = vrot.slane %v6793_v0, 6  ;;  %v7054_v0 = vld [vmem:[#allocation5 + $0x94] ss:$12 sps:$4 sm:$0xff]  }
 0x5be   :  { %v5761_v19 = vpop.eup %5760 }
 0x5bf   :  { %v2177_v36 = vadd.f32 1.0, %v5761_v19  ;;  %v2229_v21 = vpop.f32.mrb[44].mxu0  ;;  %v2270_v43 = vpop.f32.mrb[64].mxu1  ;;  %v2087_v19 = vadd.f32 %v2086_v18, %v6426_v7 }
 0x5c0   :  { %v2276_v14 = vadd.f32 %v2229_v21, %v7805_v54  ;;  %v2231_v59 = vpop.f32.mrb[45].mxu0  ;;  %v5204_v4 = vpop.f32.mrb[65].mxu1 }
 0x5c1   :  { %5764 = vrcp.f32 %v2177_v36  ;;  %v2283_v58 = vadd.f32 %v2231_v59, %v7806_v34  ;;  %v2233_v41 = vpop.f32.mrb[46].mxu0  ;;  %v2273_v33 = vpop.f32.mrb[66].mxu1 }
 0x5c2   :  { %v4735_v51 = vmul.f32 -1.442695, %v2276_v14  ;;  %v2234_v17 = vpop.f32.mrb[47].mxu0  ;;  %v5205_v9 = vpop.f32.mrb[67].mxu1  ;;  %v2290_v33 = vadd.f32 %v6754_v60, %v2270_v43  ;;  %v7058_v43 = vld [vmem:[#allocation5 + $0x90] ss:$12 sps:$4 sm:$0xff]  }
 0x5c3   :  { %v4736_v56 = vmul.f32 -1.442695, %v2283_v58  ;;  %v5763_v27 = vpop.eup %5762 }
 0x5c4   :  { %5766 = vpow2.f32 %v4735_v51  ;;  %v2184_v40 = vadd.f32 1.0, %v5763_v27 }
 0x5c5   :  { %5768 = vpow2.f32 %v4736_v56 }
 0x5c6   :  { %5770 = vrcp.f32 %v2184_v40 }
 0x5cb   :  { %v5765_v25 = vpop.eup %5764 }
 0x5cc   :  { %v2188_v36 = vmul.f32 %v5765_v25, %v2187_v22 }
 0x5ce   :  { %v5767_v21 = vpop.eup %5766  ;;  %v2189_v17 = vadd.f32 %v2188_v36, %v2087_v19  ;;  %v7807_v19 = vld [vmem:[#allocation19_spill] sm:$0xff] }
 0x5cf   :  { %v5769_v14 = vpop.eup %5768  ;;  %v2280_v59 = vadd.f32 1.0, %v5767_v21 }
 0x5d0   :  { %5772 = vtanh.f32 %v2189_v17  ;;  %v2287_v51 = vadd.f32 1.0, %v5769_v14  ;;  %v5771_v4 = vpop.eup %5770  ;;  %v7061_v17 = vld [vmem:[#allocation5 + $0x98] ss:$12 sps:$4 sm:$0xff]  }
 0x5d1   :  { %5774 = vrcp.f32 %v2280_v59  ;;  %v2191_v58 = vsub.f32 1.0, %v5771_v4  ;;  %v2193_v18 = vmul.f32 %v5771_v4, %v6759_v24  ;;  %v7064_v14 = vld [vmem:[#allocation5 + $0xac] ss:$12 sps:$4 sm:$0xff]   ;;  %v7068_v59 = vld [vmem:[#allocation5 + $0xa8] ss:$12 sps:$4 sm:$0xff]   ;;  %v7808_v4 = vld [vmem:[#allocation23_spill] sm:$0xff] }
 0x5d2   :  { %5776 = vrcp.f32 %v2287_v51  ;;  %v7071_v51 = vld [vmem:[#allocation5 + $0xb0] ss:$12 sps:$4 sm:$0xff]  }
 0x5da   :  { %v5773_v41 = vpop.eup %5772 }
 0x5db   :  { %v5775_v9 = vpop.eup %5774  ;;  %v2192_v56 = vmul.f32 %v5773_v41, %v2191_v58  ;;  %v7809_v58 = vld [vmem:[#allocation24_spill] sm:$0xff]  ;;  %v7810_v41 = vld [vmem:[#allocation25_spill] sm:$0xff] }
 0x5dc   :  { %v5777_v27 = vpop.eup %5776  ;;  %v2291_v40 = vmul.f32 %v5775_v9, %v2290_v33  ;;  %v7811_v33 = vld [vmem:[#allocation26_spill] sm:$0xff]  ;;  %v7812_v9 = vld [vmem:[#allocation27_spill] sm:$0xff] }
 0x5dd   :  { %v2299_v22 = vmul.f32 %v5777_v27, %v2297_v26  ;;  %v6974_v25 = vadd.f32 %v2193_v18, %v2192_v56  ;;  %v7813_v26 = vld [vmem:[#allocation28_spill] sm:$0xff]  ;;  %v7814_v18 = vld [vmem:[#allocation29_spill] sm:$0xff]  ;;  %v7815_v56 = vld [vmem:[#allocation30_spill] sm:$0xff] }
 0x5de   :  { %v2292_v36 = vadd.f32 %v2291_v40, %v7807_v19  ;;  %v7817_v40 = vld [vmem:[#allocation32_spill] sm:$0xff] }
 0x5df   :  { %v6979_v21 = vpack.c.bf16 %v6974_v25, %v6974_v25 }
 0x5e0   :  { %5778 = vtanh.f32 %v2292_v36  ;;  %v7819_v36 = vld [vmem:[#allocation34_spill] sm:$0xff] }
 0x5e1   :  { %4737 = vmatmul.mubr.msk.bf16.vlgmr.msra.gmra.mrb[48].mxu0 %vm436_vm3, %v6979_v21  ;;  %5215 = vmatmul.mubr.msk.bf16.vlgmr.msra.gmra.mrb[68].mxu1 %vm436_vm3, %v6979_v21 }
 0x5e2   :  { %2391 = vmatpush1.bf16.msra.mxu0 %v6596_v29  ;;  %5219 = vmatpush3.bf16.msra.mxu1 %v6598_v42  ;;  %v2294_v29 = vsub.f32 1.0, %v5777_v27  ;;  %v7816_v27 = vld [vmem:[#allocation31_spill] sm:$0xff] }
 0x5e3   :  { %2392 = vmatprep.subr.bf16.mxu0 %v6604_v12  ;;  %5220 = vmatprep.subr.bf16.mxu1 %v7758_v63 }
 0x5e4   :  { %2422 = vmatprep.mubr.bf16.mxu0 %v7759_v2  ;;  %5226 = vmatprep.mubr.msk.bf16.mxu1 %vm6130_vm0, %v7758_v63 }
 0x5e6   :  { %2393 = vmatpush1.bf16.msra.mxu0 %v6613_v47  ;;  %5221 = vmatpush3.bf16.msra.mxu1 %v6615_v46  ;;  %v2386_v47 = vpack.c.bf16 %v6960_v20, %v6960_v20 }
 0x5e7   :  { %2394 = vmatprep.subr.bf16.mxu0 %v6619_v50  ;;  %5222 = vmatprep.subr.bf16.mxu1 %v7758_v63  ;;  %v7029_v50 = vld [vmem:[#allocation5 + $0x64] ss:$12 sps:$4 sm:$0xff]  }
 0x5ea   :  { %v5779_v24 = vpop.eup %5778  ;;  %2395 = vmatpush1.bf16.msra.mxu0 %v6626_v31  ;;  %5223 = vmatpush3.bf16.msra.mxu1 %v6628_v39  ;;  %v7035_v31 = vld [vmem:[#allocation5 + $0x60] ss:$12 sps:$4 sm:$0xff]   ;;  %v7038_v39 = vld [vmem:[#allocation5 + $0x68] ss:$12 sps:$4 sm:$0xff]  }
 0x5eb   :  { %2396 = vmatprep.subr.bf16.mxu0 %v6632_v37  ;;  %5224 = vmatprep.subr.bf16.mxu1 %v7758_v63  ;;  %v2295_v42 = vmul.f32 %v5779_v24, %v2294_v29  ;;  %v7041_v37 = vld [vmem:[#allocation5 + $0x7c] ss:$12 sps:$4 sm:$0xff]   ;;  %v7822_v24 = vld [vmem:[#allocation37_spill] sm:$0xff] }
 0x5ec   :  { %v7821_v29 = vld [vmem:[#allocation36_spill] sm:$0xff] }
 0x5ed   :  { %v7000_v12 = vadd.f32 %v2299_v22, %v2295_v42  ;;  %v7818_v22 = vld [vmem:[#allocation33_spill] sm:$0xff] }
 0x5ee   :  { %2397 = vmatpush1.bf16.msra.mxu0 %v6636_v30  ;;  %5225 = vmatpush3.bf16.msra.mxu1 %v6638_v35  ;;  %v7048_v30 = vld [vmem:[#allocation5 + $0x78] ss:$12 sps:$4 sm:$0xff]   ;;  %v7051_v35 = vld [vmem:[#allocation5 + $0x80] ss:$12 sps:$4 sm:$0xff]  }
 0x5ef   :  { %2497 = vmatprep.subr.bf16.mxu0 %v6789_v55  ;;  %5230 = vmatprep.subr.bf16.mxu1 %v7758_v63  ;;  %v2493_v46 = vpack.c.bf16 %v7000_v12, %v7000_v12  ;;  %v7118_v42 = vld [vmem:[#allocation5 + $0xc4] ss:$12 sps:$4 sm:$0xff]  }
 0x5f0   :  { %7823 = vst [vmem:[#allocation40_spill] sm:$0xff] %v7118_v42 }
 0x5f1   :  { %4739 = vmatmul.mubr.msk.bf16.vlgmr.msra.gmra.mrb[48].mxu0 %vm436_vm3, %v2386_v47  ;;  %5227 = vmatmul.mubr.msk.bf16.vlgmr.msra.gmra.mrb[72].mxu1 %vm436_vm3, %v2386_v47 }
 0x5f2   :  { %2498 = vmatpush1.bf16.msra.mxu0 %v6797_v1  ;;  %5231 = vmatpush3.bf16.msra.mxu1 %v6800_v6 }
 0x5f3   :  { %2499 = vmatprep.subr.bf16.mxu0 %v6803_v8  ;;  %5232 = vmatprep.subr.bf16.mxu1 %v7758_v63 }
 0x5f4   :  { %2529 = vmatprep.mubr.bf16.mxu0 %v7759_v2  ;;  %5238 = vmatprep.mubr.msk.bf16.mxu1 %vm6130_vm0, %v7758_v63 }
 0x5f6   :  { %2500 = vmatpush1.bf16.msra.mxu0 %v6810_v10  ;;  %5233 = vmatpush3.bf16.msra.mxu1 %v6813_v15 }
 0x5f7   :  { %2501 = vmatprep.subr.bf16.mxu0 %v6816_v38  ;;  %5234 = vmatprep.subr.bf16.mxu1 %v7758_v63 }
 0x5fa   :  { %2502 = vmatpush1.bf16.msra.mxu0 %v6820_v45  ;;  %5235 = vmatpush3.bf16.msra.mxu1 %v6823_v11 }
 0x5fb   :  { %2503 = vmatprep.subr.bf16.mxu0 %v6826_v48  ;;  %5236 = vmatprep.subr.bf16.mxu1 %v7758_v63 }
 0x5fe   :  { %2504 = vmatpush1.bf16.msra.mxu0 %v6832_v13  ;;  %5237 = vmatpush3.bf16.msra.mxu1 %v6835_v28 }
 0x5ff   :  { %2578 = vmatprep.subr.bf16.mxu0 %v7029_v50  ;;  %5242 = vmatprep.subr.bf16.mxu1 %v7758_v63 }
 0x601   :  { %4743 = vmatmul.mubr.msk.bf16.vlgmr.msra.gmra.mrb[52].mxu0 %vm436_vm3, %v2493_v46  ;;  %5239 = vmatmul.mubr.msk.bf16.vlgmr.msra.gmra.mrb[76].mxu1 %vm436_vm3, %v2493_v46 }
 0x602   :  { %2579 = vmatpush1.bf16.msra.mxu0 %v7035_v31  ;;  %5243 = vmatpush3.bf16.msra.mxu1 %v7038_v39 }
 0x603   :  { %2580 = vmatprep.subr.bf16.mxu0 %v7041_v37  ;;  %5244 = vmatprep.subr.bf16.mxu1 %v7758_v63 }
 0x604   :  { %2610 = vmatprep.mubr.bf16.mxu0 %v7759_v2  ;;  %5250 = vmatprep.mubr.msk.bf16.mxu1 %vm6130_vm0, %v7758_v63 }
 0x606   :  { %2581 = vmatpush1.bf16.msra.mxu0 %v7048_v30  ;;  %5245 = vmatpush3.bf16.msra.mxu1 %v7051_v35 }
 0x607   :  { %2582 = vmatprep.subr.bf16.mxu0 %v7054_v0  ;;  %5246 = vmatprep.subr.bf16.mxu1 %v7758_v63 }
 0x60a   :  { %2583 = vmatpush1.bf16.msra.mxu0 %v7058_v43  ;;  %5247 = vmatpush3.bf16.msra.mxu1 %v7061_v17 }
 0x60b   :  { %2584 = vmatprep.subr.bf16.mxu0 %v7064_v14  ;;  %5248 = vmatprep.subr.bf16.mxu1 %v7758_v63 }
 0x60e   :  { %2585 = vmatpush1.bf16.msra.mxu0 %v7068_v59  ;;  %5249 = vmatpush3.bf16.msra.mxu1 %v7071_v51 }
 0x60f   :  { %2681 = vmatprep.subr.bf16.mxu0 %v6859_v52  ;;  %5254 = vmatprep.subr.bf16.mxu1 %v7758_v63 }
 0x611   :  { %4745 = vmatmul.mubr.msk.bf16.vlgmr.msra.gmra.mrb[52].mxu0 %vm436_vm3, %v6979_v21  ;;  %5251 = vmatmul.mubr.msk.bf16.vlgmr.msra.gmra.mrb[80].mxu1 %vm436_vm3, %v6979_v21  ;;  %v7820_v21 = vld [vmem:[#allocation35_spill] sm:$0xff] }
 0x612   :  { %2682 = vmatpush1.bf16.msra.mxu0 %v6867_v62  ;;  %5255 = vmatpush3.bf16.msra.mxu1 %v6870_v57 }
 0x613   :  { %2683 = vmatprep.subr.bf16.mxu0 %v6873_v53  ;;  %5256 = vmatprep.subr.bf16.mxu1 %v7758_v63 }
 0x614   :  { %2713 = vmatprep.mubr.bf16.mxu0 %v7759_v2  ;;  %5262 = vmatprep.mubr.msk.bf16.mxu1 %vm6130_vm0, %v7758_v63 }
 0x616   :  { %2684 = vmatpush1.bf16.msra.mxu0 %v6880_v5  ;;  %5257 = vmatpush3.bf16.msra.mxu1 %v6883_v16 }
 0x617   :  { %2685 = vmatprep.subr.bf16.mxu0 %v6886_v32  ;;  %5258 = vmatprep.subr.bf16.mxu1 %v7758_v63  ;;  %v7827_v32 = vld [vmem:[#allocation39_spill] sm:$0xff] }
 0x61a   :  { %2686 = vmatpush1.bf16.msra.mxu0 %v6890_v49  ;;  %5259 = vmatpush3.bf16.msra.mxu1 %v6893_v44 }
 0x61b   :  { %2687 = vmatprep.subr.bf16.mxu0 %v7808_v4  ;;  %5260 = vmatprep.subr.bf16.mxu1 %v7758_v63 }
 0x61e   :  { %2688 = vmatpush1.bf16.msra.mxu0 %v7809_v58  ;;  %5261 = vmatpush3.bf16.msra.mxu1 %v7810_v41 }
 0x61f   :  { %2800 = vmatprep.subr.bf16.mxu0 %v7811_v33  ;;  %5266 = vmatprep.subr.bf16.mxu1 %v7758_v63 }
 0x621   :  { %4749 = vmatmul.mubr.msk.bf16.vlgmr.msra.gmra.mrb[56].mxu0 %vm436_vm3, %v2493_v46  ;;  %5263 = vmatmul.mubr.msk.bf16.vlgmr.msra.gmra.mrb[84].mxu1 %vm436_vm3, %v2493_v46 }
 0x622   :  { %2801 = vmatpush1.bf16.msra.mxu0 %v7812_v9  ;;  %5267 = vmatpush3.bf16.msra.mxu1 %v7813_v26 }
 0x623   :  { %2802 = vmatprep.subr.bf16.mxu0 %v7814_v18  ;;  %5268 = vmatprep.subr.bf16.mxu1 %v7758_v63 }
 0x624   :  { %2832 = vmatprep.mubr.bf16.mxu0 %v7759_v2  ;;  %5274 = vmatprep.mubr.msk.bf16.mxu1 %vm6130_vm0, %v7758_v63 }
 0x626   :  { %2803 = vmatpush1.bf16.msra.mxu0 %v7815_v56  ;;  %5269 = vmatpush3.bf16.msra.mxu1 %v7816_v27  ;;  %v7824_v56 = vld [vmem:[#allocation41_spill] sm:$0xff] }
 0x627   :  { %2804 = vmatprep.subr.bf16.mxu0 %v7817_v40  ;;  %5270 = vmatprep.subr.bf16.mxu1 %v7758_v63 }
 0x62a   :  { %2805 = vmatpush1.bf16.msra.mxu0 %v7818_v22  ;;  %5271 = vmatpush3.bf16.msra.mxu1 %v7819_v36 }
 0x62b   :  { %2806 = vmatprep.subr.bf16.mxu0 %v7820_v21  ;;  %5272 = vmatprep.subr.bf16.mxu1 %v7758_v63 }
 0x62e   :  { %2807 = vmatpush1.bf16.msra.mxu0 %v7821_v29  ;;  %5273 = vmatpush3.bf16.msra.mxu1 %v7822_v24 }
 0x62f   :  { %2885 = vmatprep.subr.bf16.mxu0 %v7118_v42  ;;  %5278 = vmatprep.subr.bf16.mxu1 %v7758_v63 }
 0x6b4   :  { %v2380_v47 = vpop.f32.mrb[68].mxu1 }
 0x6b5   :  { %v5216_v46 = vpop.f32.mrb[69].mxu1 }
 0x6b6   :  { %v2383_v40 = vpop.f32.mrb[70].mxu1 }
 0x6b7   :  { %v5217_v22 = vpop.f32.mrb[71].mxu1 }
 0x6c4   :  { %v2424_v27 = vpop.f32.mrb[48].mxu0  ;;  %v2465_v36 = vpop.f32.mrb[72].mxu1 }
 0x6c5   :  { %v5468_v21 = vadd.f32 %v2424_v27, %v7824_v56  ;;  %v2426_v18 = vpop.f32.mrb[49].mxu0  ;;  %v5228_v26 = vpop.f32.mrb[73].mxu1 }
 0x6c6   :  { %v2428_v9 = vpop.f32.mrb[50].mxu0  ;;  %v2468_v29 = vpop.f32.mrb[74].mxu1  ;;  %v5469_v58 = vadd.f32 %v2426_v18, %v7784_v23 }
 0x6c7   :  { %v4741_v33 = vmul.f32 -1.442695, %v5468_v21  ;;  %v2429_v24 = vpop.f32.mrb[51].mxu0  ;;  %v5229_v41 = vpop.f32.mrb[75].mxu1  ;;  %v7127_v9 = vld [vmem:[%s7635_s5 + $0x2] ss:$0 sm:$0xff] }
 0x6c8   :  { %v4742_v42 = vmul.f32 -1.442695, %v5469_v58  ;;  %7825 = vst [vmem:[#allocation43_spill] sm:$0xff] %v7127_v9  ;;  %v2485_v41 = vadd.f32 %v7127_v9, %v2465_v36  ;;  %v2381_v58 = vadd.f32 %v2380_v47, %v7785_v61 }
 0x6c9   :  { %5780 = vpow2.f32 %v4741_v33 }
 0x6ca   :  { %5782 = vpow2.f32 %v4742_v42 }
 0x6d3   :  { %v5781_v4 = vpop.eup %5780 }
 0x6d4   :  { %v2475_v46 = vadd.f32 1.0, %v5781_v4  ;;  %v2572_v40 = vpop.f32.mrb[76].mxu1  ;;  %v5783_v27 = vpop.eup %5782 }
 0x6d5   :  { %v5240_v22 = vpop.f32.mrb[77].mxu1  ;;  %v2482_v56 = vadd.f32 1.0, %v5783_v27 }
 0x6d6   :  { %5784 = vrcp.f32 %v2475_v46  ;;  %v2575_v44 = vpop.f32.mrb[78].mxu1 }
 0x6d7   :  { %v5241_v49 = vpop.f32.mrb[79].mxu1  ;;  %5786 = vrcp.f32 %v2482_v56  ;;  %v7826_v44 = vld [vmem:[#allocation38_spill] sm:$0xff] }
 0x6e0   :  { %v5785_v26 = vpop.eup %5784 }
 0x6e1   :  { %v2486_v33 = vmul.f32 %v5785_v26, %v2485_v41  ;;  %v5787_v9 = vpop.eup %5786 }
 0x6e2   :  { %v2489_v41 = vsub.f32 1.0, %v5787_v9  ;;  %v2491_v26 = vmul.f32 %v5787_v9, %v6960_v20 }
 0x6e3   :  { %v2487_v4 = vadd.f32 %v2486_v33, %v2381_v58 }
 0x6e4   :  { %v2612_v18 = vpop.f32.mrb[52].mxu0  ;;  %v2653_v21 = vpop.f32.mrb[80].mxu1 }
 0x6e5   :  { %5788 = vtanh.f32 %v2487_v4  ;;  %v5470_v49 = vadd.f32 %v2612_v18, %v7826_v44  ;;  %v2614_v29 = vpop.f32.mrb[53].mxu0  ;;  %v5252_v24 = vpop.f32.mrb[81].mxu1 }
 0x6e6   :  { %v2616_v42 = vpop.f32.mrb[54].mxu0  ;;  %v2656_v46 = vpop.f32.mrb[82].mxu1  ;;  %v5471_v36 = vadd.f32 %v2614_v29, %v7827_v32 }
 0x6e7   :  { %v4747_v22 = vmul.f32 -1.442695, %v5470_v49  ;;  %v2617_v27 = vpop.f32.mrb[55].mxu0  ;;  %v5253_v23 = vpop.f32.mrb[83].mxu1 }
 0x6e8   :  { %v4748_v47 = vmul.f32 -1.442695, %v5471_v36 }
 0x6e9   :  { %5790 = vpow2.f32 %v4747_v22 }
 0x6ea   :  { %5792 = vpow2.f32 %v4748_v47 }
 0x6ef   :  { %v5789_v56 = vpop.eup %5788 }
 0x6f0   :  { %v2490_v58 = vmul.f32 %v5789_v56, %v2489_v41 }
 0x6f2   :  { %v7134_v33 = vadd.f32 %v2491_v26, %v2490_v58  ;;  %v2673_v26 = vadd.f32 %v6967_v3, %v2653_v21 }
 0x6f3   :  { %v5791_v4 = vpop.eup %5790 }
 0x6f4   :  { %v2663_v18 = vadd.f32 1.0, %v5791_v4  ;;  %v2715_v24 = vpop.f32.mrb[56].mxu0  ;;  %v2756_v42 = vpop.f32.mrb[84].mxu1  ;;  %v2573_v4 = vadd.f32 %v2572_v40, %v6426_v7 }
 0x6f5   :  { %v2763_v49 = vrot.slane %v2715_v24, 6  ;;  %v2717_v46 = vpop.f32.mrb[57].mxu0  ;;  %v5264_v23 = vpop.f32.mrb[85].mxu1 }
 0x6f6   :  { %5794 = vrcp.f32 %v2663_v18  ;;  %v2773_v29 = vrot.slane %v2717_v46, 6  ;;  %v2719_v22 = vpop.f32.mrb[58].mxu0  ;;  %v2759_v27 = vpop.f32.mrb[86].mxu1 }
 0x6f7   :  { %v2765_v36 = vadd.f32 %v2763_v49, %v7805_v54  ;;  %v2720_v32 = vpop.f32.mrb[59].mxu0  ;;  %v5265_v44 = vpop.f32.mrb[87].mxu1 }
 0x6f8   :  { %v2775_v20 = vadd.f32 %v2773_v29, %v7806_v34  ;;  %v5793_v47 = vpop.eup %5792  ;;  %v2782_v29 = vadd.f32 %v6754_v60, %v2756_v42  ;;  %v7160_v42 = vld [vmem:[#allocation5 + $0xdc] ss:$12 sps:$4 sm:$0xff]  }
 0x6f9   :  { %v4751_v9 = vmul.f32 -1.442695, %v2765_v36  ;;  %v2670_v56 = vadd.f32 1.0, %v5793_v47 }
 0x6fa   :  { %v4752_v41 = vmul.f32 -1.442695, %v2775_v20  ;;  %v2784_v20 = vrot.slane %v2782_v29, 6 }
 0x6fb   :  { %5796 = vpow2.f32 %v4751_v9  ;;  %v2792_v9 = vrot.slane %v7000_v12, 6  ;;  %v7157_v12 = vld [vmem:[#allocation5 + $0xc8] ss:$12 sps:$4 sm:$0xff]  }
 0x6fc   :  { %5798 = vpow2.f32 %v4752_v41 }
 0x6fd   :  { %5800 = vrcp.f32 %v2670_v56 }
 0x700   :  { %v5795_v58 = vpop.eup %5794 }
 0x701   :  { %v2674_v18 = vmul.f32 %v5795_v58, %v2673_v26 }
 0x703   :  { %v2675_v24 = vadd.f32 %v2674_v18, %v2573_v4  ;;  %v7167_v4 = vld [vmem:[#allocation5 + $0xd8] ss:$12 sps:$4 sm:$0xff]   ;;  %v7170_v18 = vld [vmem:[#allocation5 + $0xe0] ss:$12 sps:$4 sm:$0xff]  }
 0x705   :  { %v5797_v46 = vpop.eup %5796  ;;  %5802 = vtanh.f32 %v2675_v24  ;;  %v7173_v24 = vld [vmem:[#allocation5 + $0xf4] ss:$12 sps:$4 sm:$0xff]  }
 0x706   :  { %v5799_v32 = vpop.eup %5798  ;;  %v2769_v44 = vadd.f32 1.0, %v5797_v46  ;;  %v7177_v46 = vld [vmem:[#allocation5 + $0xf0] ss:$12 sps:$4 sm:$0xff]  }
 0x707   :  { %v2779_v49 = vadd.f32 1.0, %v5799_v32  ;;  %v5801_v23 = vpop.eup %5800  ;;  %v7180_v32 = vld [vmem:[#allocation5 + $0xf8] ss:$12 sps:$4 sm:$0xff]  }
 0x708   :  { %5804 = vrcp.f32 %v2769_v44  ;;  %v2677_v22 = vsub.f32 1.0, %v5801_v23  ;;  %v2679_v21 = vmul.f32 %v5801_v23, %v6974_v25  ;;  %v7154_v25 = vld [vmem:[#allocation5 + $0xc0] ss:$12 sps:$4 sm:$0xff]  }
 0x709   :  { %5806 = vrcp.f32 %v2779_v49  ;;  %v7183_v49 = vld [vmem:[#allocation5 + $0x10c] ss:$12 sps:$4 sm:$0xff]  }
 0x70f   :  { %v5803_v27 = vpop.eup %5802 }
 0x710   :  { %v2678_v36 = vmul.f32 %v5803_v27, %v2677_v22  ;;  %v7187_v22 = vld [vmem:[#allocation5 + $0x108] ss:$12 sps:$4 sm:$0xff]   ;;  %v7190_v27 = vld [vmem:[#allocation5 + $0x110] ss:$12 sps:$4 sm:$0xff]  }
 0x712   :  { %v5805_v40 = vpop.eup %5804  ;;  %v7143_v47 = vadd.f32 %v2679_v21, %v2678_v36  ;;  %v2881_v21 = vpack.c.bf16 %v7134_v33, %v7134_v33 }
 0x713   :  { %v5807_v41 = vpop.eup %5806  ;;  %v2786_v56 = vmul.f32 %v5805_v40, %v2784_v20  ;;  %v7844_v20 = vld [vmem:[#allocation36_spill] sm:$0xff]  ;;  %v7845_v40 = vld [vmem:[#allocation37_spill] sm:$0xff] }
 0x714   :  { %v7147_v26 = vpack.c.bf16 %v7143_v47, %v7143_v47  ;;  %v2794_v58 = vmul.f32 %v5807_v41, %v2792_v9  ;;  %v2789_v44 = vsub.f32 1.0, %v5807_v41  ;;  %v7846_v9 = vld [vmem:[#allocation40_spill] sm:$0xff] }
 0x715   :  { %v2787_v60 = vadd.f32 %v2786_v56, %v7807_v19 }
 0x716   :  { %4753 = vmatmul.mubr.msk.bf16.vlgmr.msra.gmra.mrb[60].mxu0 %vm436_vm3, %v7147_v26  ;;  %5275 = vmatmul.mubr.msk.bf16.vlgmr.msra.gmra.mrb[88].mxu1 %vm436_vm3, %v7147_v26 }
 0x717   :  { %5808 = vtanh.f32 %v2787_v60  ;;  %2886 = vmatpush1.bf16.msra.mxu0 %v7154_v25  ;;  %5279 = vmatpush3.bf16.msra.mxu1 %v7157_v12 }
 0x718   :  { %2887 = vmatprep.subr.bf16.mxu0 %v7160_v42  ;;  %5280 = vmatprep.subr.bf16.mxu1 %v7758_v63 }
 0x719   :  { %2917 = vmatprep.mubr.bf16.mxu0 %v7759_v2  ;;  %5286 = vmatprep.mubr.msk.bf16.mxu1 %vm6130_vm0, %v7758_v63 }
 0x71b   :  { %2888 = vmatpush1.bf16.msra.mxu0 %v7167_v4  ;;  %5281 = vmatpush3.bf16.msra.mxu1 %v7170_v18 }
 0x71c   :  { %2889 = vmatprep.subr.bf16.mxu0 %v7173_v24  ;;  %5282 = vmatprep.subr.bf16.mxu1 %v7758_v63 }
 0x71f   :  { %2890 = vmatpush1.bf16.msra.mxu0 %v7177_v46  ;;  %5283 = vmatpush3.bf16.msra.mxu1 %v7180_v32 }
 0x720   :  { %2891 = vmatprep.subr.bf16.mxu0 %v7183_v49  ;;  %5284 = vmatprep.subr.bf16.mxu1 %v7758_v63 }
 0x721   :  { %v5809_v23 = vpop.eup %5808 }
 0x722   :  { %v2790_v29 = vmul.f32 %v5809_v23, %v2789_v44  ;;  %v7847_v23 = vld [vmem:[#allocation41_spill] sm:$0xff] }
 0x723   :  { %2892 = vmatpush1.bf16.msra.mxu0 %v7187_v22  ;;  %5285 = vmatpush3.bf16.msra.mxu1 %v7190_v27 }
 0x724   :  { %2994 = vmatprep.subr.bf16.mxu0 %v6789_v55  ;;  %5290 = vmatprep.subr.bf16.mxu1 %v7758_v63  ;;  %v7197_v36 = vadd.f32 %v2794_v58, %v2790_v29 }
 0x726   :  { %4755 = vmatmul.mubr.msk.bf16.vlgmr.msra.gmra.mrb[60].mxu0 %vm436_vm3, %v2881_v21  ;;  %5287 = vmatmul.mubr.msk.bf16.vlgmr.msra.gmra.mrb[92].mxu1 %vm436_vm3, %v2881_v21  ;;  %v2988_v55 = vpack.c.bf16 %v7197_v36, %v7197_v36 }
 0x727   :  { %2995 = vmatpush1.bf16.msra.mxu0 %v6797_v1  ;;  %5291 = vmatpush3.bf16.msra.mxu1 %v6800_v6  ;;  %v7828_v6 = vld [vmem:[#allocation14_spill] sm:$0xff] }
 0x728   :  { %2996 = vmatprep.subr.bf16.mxu0 %v6803_v8  ;;  %5292 = vmatprep.subr.bf16.mxu1 %v7758_v63  ;;  %v2990_v1 = vrot.slane %v2988_v55, 1  ;;  %v7829_v8 = vld [vmem:[#allocation21_spill] sm:$0xff] }
 0x729   :  { %3026 = vmatprep.mubr.bf16.mxu0 %v7759_v2  ;;  %5298 = vmatprep.mubr.msk.bf16.mxu1 %vm6130_vm0, %v7758_v63 }
 0x72b   :  { %2997 = vmatpush1.bf16.msra.mxu0 %v6810_v10  ;;  %5293 = vmatpush3.bf16.msra.mxu1 %v6813_v15  ;;  %v7830_v10 = vld [vmem:[#allocation22_spill] sm:$0xff]  ;;  %v7831_v15 = vld [vmem:[#allocation23_spill] sm:$0xff] }
 0x72c   :  { %2998 = vmatprep.subr.bf16.mxu0 %v6816_v38  ;;  %5294 = vmatprep.subr.bf16.mxu1 %v7758_v63  ;;  %v7832_v38 = vld [vmem:[#allocation24_spill] sm:$0xff] }
 0x72f   :  { %2999 = vmatpush1.bf16.msra.mxu0 %v6820_v45  ;;  %5295 = vmatpush3.bf16.msra.mxu1 %v6823_v11  ;;  %v7833_v45 = vld [vmem:[#allocation25_spill] sm:$0xff]  ;;  %v7834_v11 = vld [vmem:[#allocation26_spill] sm:$0xff] }
 0x730   :  { %3000 = vmatprep.subr.bf16.mxu0 %v6826_v48  ;;  %5296 = vmatprep.subr.bf16.mxu1 %v7758_v63  ;;  %v7835_v48 = vld [vmem:[#allocation27_spill] sm:$0xff] }
 0x733   :  { %3001 = vmatpush1.bf16.msra.mxu0 %v6832_v13  ;;  %5297 = vmatpush3.bf16.msra.mxu1 %v6835_v28  ;;  %v7836_v13 = vld [vmem:[#allocation28_spill] sm:$0xff]  ;;  %v7837_v28 = vld [vmem:[#allocation29_spill] sm:$0xff] }
 0x734   :  { %3075 = vmatprep.subr.bf16.mxu0 %v7029_v50  ;;  %5302 = vmatprep.subr.bf16.mxu1 %v7758_v63 }
 0x736   :  { %4759 = vmatmul.mubr.msk.bf16.vlgmr.msra.gmra.mrb[64].mxu0 %vm436_vm3, %v2990_v1  ;;  %5299 = vmatmul.mubr.msk.bf16.vlgmr.msra.gmra.mrb[96].mxu1 %vm436_vm3, %v2990_v1 }
 0x737   :  { %3076 = vmatpush1.bf16.msra.mxu0 %v7035_v31  ;;  %5303 = vmatpush3.bf16.msra.mxu1 %v7038_v39 }
 0x738   :  { %3077 = vmatprep.subr.bf16.mxu0 %v7041_v37  ;;  %5304 = vmatprep.subr.bf16.mxu1 %v7758_v63 }
 0x739   :  { %3107 = vmatprep.mubr.bf16.mxu0 %v7759_v2  ;;  %5310 = vmatprep.mubr.msk.bf16.mxu1 %vm6130_vm0, %v7758_v63 }
 0x73b   :  { %3078 = vmatpush1.bf16.msra.mxu0 %v7048_v30  ;;  %5305 = vmatpush3.bf16.msra.mxu1 %v7051_v35 }
 0x73c   :  { %3079 = vmatprep.subr.bf16.mxu0 %v7054_v0  ;;  %5306 = vmatprep.subr.bf16.mxu1 %v7758_v63 }
 0x73f   :  { %3080 = vmatpush1.bf16.msra.mxu0 %v7058_v43  ;;  %5307 = vmatpush3.bf16.msra.mxu1 %v7061_v17 }
 0x740   :  { %3081 = vmatprep.subr.bf16.mxu0 %v7064_v14  ;;  %5308 = vmatprep.subr.bf16.mxu1 %v7758_v63 }
 0x743   :  { %3082 = vmatpush1.bf16.msra.mxu0 %v7068_v59  ;;  %5309 = vmatpush3.bf16.msra.mxu1 %v7071_v51 }
 0x744   :  { %3178 = vmatprep.subr.bf16.mxu0 %v6859_v52  ;;  %5314 = vmatprep.subr.bf16.mxu1 %v7758_v63  ;;  %v7838_v52 = vld [vmem:[#allocation30_spill] sm:$0xff] }
 0x746   :  { %4761 = vmatmul.mubr.msk.bf16.vlgmr.msra.gmra.mrb[64].mxu0 %vm436_vm3, %v7147_v26  ;;  %5311 = vmatmul.mubr.msk.bf16.vlgmr.msra.gmra.mrb[100].mxu1 %vm436_vm3, %v7147_v26 }
 0x747   :  { %3179 = vmatpush1.bf16.msra.mxu0 %v6867_v62  ;;  %5315 = vmatpush3.bf16.msra.mxu1 %v6870_v57  ;;  %v7839_v62 = vld [vmem:[#allocation31_spill] sm:$0xff]  ;;  %v7840_v57 = vld [vmem:[#allocation32_spill] sm:$0xff] }
 0x748   :  { %3180 = vmatprep.subr.bf16.mxu0 %v6873_v53  ;;  %5316 = vmatprep.subr.bf16.mxu1 %v7758_v63  ;;  %v7841_v53 = vld [vmem:[#allocation33_spill] sm:$0xff] }
 0x749   :  { %3210 = vmatprep.mubr.bf16.mxu0 %v7759_v2  ;;  %5322 = vmatprep.mubr.msk.bf16.mxu1 %vm6130_vm0, %v7758_v63 }
 0x74b   :  { %3181 = vmatpush1.bf16.msra.mxu0 %v6880_v5  ;;  %5317 = vmatpush3.bf16.msra.mxu1 %v6883_v16  ;;  %v7842_v5 = vld [vmem:[#allocation34_spill] sm:$0xff]  ;;  %v7843_v16 = vld [vmem:[#allocation35_spill] sm:$0xff] }
 0x74c   :  { %3182 = vmatprep.subr.bf16.mxu0 %v7828_v6  ;;  %5318 = vmatprep.subr.bf16.mxu1 %v7758_v63 }
 0x74f   :  { %3183 = vmatpush1.bf16.msra.mxu0 %v7829_v8  ;;  %5319 = vmatpush3.bf16.msra.mxu1 %v7830_v10 }
 0x750   :  { %3184 = vmatprep.subr.bf16.mxu0 %v7831_v15  ;;  %5320 = vmatprep.subr.bf16.mxu1 %v7758_v63 }
 0x753   :  { %3185 = vmatpush1.bf16.msra.mxu0 %v7832_v38  ;;  %5321 = vmatpush3.bf16.msra.mxu1 %v7833_v45  ;;  %v7848_v38 = vld [vmem:[#allocation42_spill] sm:$0xff] }
 0x754   :  { %3297 = vmatprep.subr.bf16.mxu0 %v7834_v11  ;;  %5326 = vmatprep.subr.bf16.mxu1 %v7758_v63 }
 0x756   :  { %4765 = vmatmul.mubr.msk.bf16.vlgmr.msra.gmra.mrb[68].mxu0 %vm436_vm3, %v2990_v1  ;;  %5323 = vmatmul.mubr.msk.bf16.vlgmr.msra.gmra.mrb[104].mxu1 %vm436_vm3, %v2990_v1 }
 0x757   :  { %3298 = vmatpush1.bf16.msra.mxu0 %v7835_v48  ;;  %5327 = vmatpush3.bf16.msra.mxu1 %v7836_v13 }
 0x758   :  { %3299 = vmatprep.subr.bf16.mxu0 %v7837_v28  ;;  %5328 = vmatprep.subr.bf16.mxu1 %v7758_v63 }
 0x759   :  { %3329 = vmatprep.mubr.bf16.mxu0 %v7759_v2  ;;  %5334 = vmatprep.mubr.msk.bf16.mxu1 %vm6130_vm0, %v7758_v63 }
 0x75b   :  { %3300 = vmatpush1.bf16.msra.mxu0 %v7838_v52  ;;  %5329 = vmatpush3.bf16.msra.mxu1 %v7839_v62 }
 0x75c   :  { %3301 = vmatprep.subr.bf16.mxu0 %v7840_v57  ;;  %5330 = vmatprep.subr.bf16.mxu1 %v7758_v63 }
 0x75f   :  { %3302 = vmatpush1.bf16.msra.mxu0 %v7841_v53  ;;  %5331 = vmatpush3.bf16.msra.mxu1 %v7842_v5 }
 0x760   :  { %3303 = vmatprep.subr.bf16.mxu0 %v7843_v16  ;;  %5332 = vmatprep.subr.bf16.mxu1 %v7758_v63  ;;  %v7849_v16 = vld [vmem:[#allocation43_spill] sm:$0xff] }
 0x763   :  { %3304 = vmatpush1.bf16.msra.mxu0 %v7844_v20  ;;  %5333 = vmatpush3.bf16.msra.mxu1 %v7845_v40 }
 0x764   :  { %3382 = vmatprep.subr.bf16.mxu0 %v7846_v9  ;;  %5338 = vmatprep.subr.bf16.mxu1 %v7758_v63 }
 0x7e9   :  { %v2875_v41 = vpop.f32.mrb[88].mxu1 }
 0x7ea   :  { %v5276_v56 = vpop.f32.mrb[89].mxu1 }
 0x7eb   :  { %v2878_v26 = vpop.f32.mrb[90].mxu1  ;;  %v2876_v56 = vadd.f32 %v2875_v41, %v7785_v61 }
 0x7ec   :  { %v5277_v58 = vpop.f32.mrb[91].mxu1 }
 0x7f9   :  { %v2919_v60 = vpop.f32.mrb[60].mxu0  ;;  %v2960_v44 = vpop.f32.mrb[92].mxu1 }
 0x7fa   :  { %v5472_v29 = vadd.f32 %v2919_v60, %v7847_v23  ;;  %v2921_v21 = vpop.f32.mrb[61].mxu0  ;;  %v5288_v55 = vpop.f32.mrb[93].mxu1  ;;  %v2980_v20 = vadd.f32 %v7849_v16, %v2960_v44 }
 0x7fb   :  { %v2923_v1 = vpop.f32.mrb[62].mxu0  ;;  %v2963_v6 = vpop.f32.mrb[94].mxu1  ;;  %v5473_v45 = vadd.f32 %v2921_v21, %v7848_v38  ;;  %v7850_v21 = vld [vmem:[#allocation38_spill] sm:$0xff] }
 0x7fc   :  { %v4757_v8 = vmul.f32 -1.442695, %v5472_v29  ;;  %v2924_v10 = vpop.f32.mrb[63].mxu0  ;;  %v5289_v15 = vpop.f32.mrb[95].mxu1 }
 0x7fd   :  { %v4758_v11 = vmul.f32 -1.442695, %v5473_v45 }
 0x7fe   :  { %5810 = vpow2.f32 %v4757_v8 }
 0x7ff   :  { %5812 = vpow2.f32 %v4758_v11 }
 0x808   :  { %v5811_v48 = vpop.eup %5810 }
 0x809   :  { %v2970_v13 = vadd.f32 1.0, %v5811_v48  ;;  %v3069_v28 = vpop.f32.mrb[96].mxu1  ;;  %v5813_v53 = vpop.eup %5812  ;;  %v7851_v48 = vld [vmem:[#allocation39_spill] sm:$0xff] }
 0x80a   :  { %v5300_v52 = vpop.f32.mrb[97].mxu1  ;;  %v2977_v5 = vadd.f32 1.0, %v5813_v53 }
 0x80b   :  { %5814 = vrcp.f32 %v2970_v13  ;;  %v3072_v62 = vpop.f32.mrb[98].mxu1 }
 0x80c   :  { %v5301_v57 = vpop.f32.mrb[99].mxu1  ;;  %5816 = vrcp.f32 %v2977_v5 }
 0x815   :  { %v5815_v40 = vpop.eup %5814 }
 0x816   :  { %v2981_v26 = vmul.f32 %v5815_v40, %v2980_v20  ;;  %v5817_v13 = vpop.eup %5816 }
 0x817   :  { %v2984_v52 = vsub.f32 1.0, %v5817_v13  ;;  %v2986_v57 = vmul.f32 %v5817_v13, %v7134_v33 }
 0x818   :  { %v2982_v58 = vadd.f32 %v2981_v26, %v2876_v56 }
 0x819   :  { %v3109_v60 = vpop.f32.mrb[64].mxu0  ;;  %v3150_v29 = vpop.f32.mrb[100].mxu1 }
 0x81a   :  { %5818 = vtanh.f32 %v2982_v58  ;;  %v5474_v55 = vadd.f32 %v3109_v60, %v7850_v21  ;;  %v3111_v1 = vpop.f32.mrb[65].mxu0  ;;  %v5312_v6 = vpop.f32.mrb[101].mxu1 }
 0x81b   :  { %v3113_v8 = vpop.f32.mrb[66].mxu0  ;;  %v3153_v10 = vpop.f32.mrb[102].mxu1  ;;  %v5475_v44 = vadd.f32 %v3111_v1, %v7851_v48 }
 0x81c   :  { %v4763_v15 = vmul.f32 -1.442695, %v5474_v55  ;;  %v3114_v45 = vpop.f32.mrb[67].mxu0  ;;  %v5313_v11 = vpop.f32.mrb[103].mxu1 }
 0x81d   :  { %v4764_v41 = vmul.f32 -1.442695, %v5475_v44 }
 0x81e   :  { %5820 = vpow2.f32 %v4763_v15 }
 0x81f   :  { %5822 = vpow2.f32 %v4764_v41 }
 0x824   :  { %v5819_v62 = vpop.eup %5818 }
 0x825   :  { %v2985_v53 = vmul.f32 %v5819_v62, %v2984_v52  ;;  %v3170_v52 = vadd.f32 %v6967_v3, %v3150_v29 }
 0x827   :  { %v7294_v5 = vadd.f32 %v2986_v57, %v2985_v53  ;;  %v3070_v57 = vadd.f32 %v3069_v28, %v6426_v7 }
 0x828   :  { %v5821_v20 = vpop.eup %5820 }
 0x829   :  { %v3160_v40 = vadd.f32 1.0, %v5821_v20  ;;  %v3212_v56 = vpop.f32.mrb[68].mxu0  ;;  %v3253_v26 = vpop.f32.mrb[104].mxu1 }
 0x82a   :  { %v3260_v58 = vrot.slane %v3212_v56, 4  ;;  %v3214_v60 = vpop.f32.mrb[69].mxu0  ;;  %v5324_v55 = vpop.f32.mrb[105].mxu1 }
 0x82b   :  { %5824 = vrcp.f32 %v3160_v40  ;;  %v3270_v1 = vrot.slane %v3214_v60, 4  ;;  %v3216_v6 = vpop.f32.mrb[70].mxu0  ;;  %v3256_v8 = vpop.f32.mrb[106].mxu1 }
 0x82c   :  { %v3262_v10 = vadd.f32 %v3260_v58, %v7805_v54  ;;  %v3217_v15 = vpop.f32.mrb[71].mxu0  ;;  %v5325_v45 = vpop.f32.mrb[107].mxu1 }
 0x82d   :  { %v3272_v33 = vadd.f32 %v3270_v1, %v7806_v34  ;;  %v5823_v44 = vpop.eup %5822  ;;  %v7303_v1 = vld [vmem:[%s7635_s5] ss:$0 sm:$0xff]  ;;  %v3289_v45 = vrot.slane %v7197_v36, 6 }
 0x82e   :  { %v4767_v11 = vmul.f32 -1.442695, %v3262_v10  ;;  %v3167_v41 = vadd.f32 1.0, %v5823_v44  ;;  %v3279_v3 = vadd.f32 %v7303_v1, %v3253_v26 }
 0x82f   :  { %v4768_v13 = vmul.f32 -1.442695, %v3272_v33 }
 0x830   :  { %5826 = vpow2.f32 %v4767_v11  ;;  %v3281_v10 = vrot.slane %v3279_v3, 4  ;;  %v7369_v3 = vld [vmem:[#allocation2 + $0x30] ss:$12 sps:$4 sm:$0xff]  }
 0x831   :  { %5828 = vpow2.f32 %v4768_v13 }
 0x832   :  { %5830 = vrcp.f32 %v3167_v41 }
 0x835   :  { %v5825_v62 = vpop.eup %5824 }
 0x836   :  { %v3171_v53 = vmul.f32 %v5825_v62, %v3170_v52  ;;  %v3378_v62 = vpack.c.bf16 %v7294_v5, %v7294_v5 }
 0x838   :  { %v3172_v20 = vadd.f32 %v3171_v53, %v3070_v57  ;;  %v7338_v57 = vld [vmem:[#allocation2 + $0x4] ss:$12 sps:$4 sm:$0xff]  }
 0x83a   :  { %v5827_v40 = vpop.eup %5826  ;;  %5832 = vtanh.f32 %v3172_v20  ;;  %v7346_v20 = vld [vmem:[#allocation2] ss:$12 sps:$4 sm:$0xff]  }
 0x83b   :  { %v5829_v56 = vpop.eup %5828  ;;  %v3266_v58 = vadd.f32 1.0, %v5827_v40  ;;  %v7349_v40 = vld [vmem:[#allocation2 + $0x8] ss:$12 sps:$4 sm:$0xff]  }
 0x83c   :  { %v3276_v60 = vadd.f32 1.0, %v5829_v56  ;;  %v5831_v55 = vpop.eup %5830  ;;  %v7352_v56 = vld [vmem:[#allocation2 + $0x1c] ss:$12 sps:$4 sm:$0xff]  }
 0x83d   :  { %5834 = vrcp.f32 %v3266_v58  ;;  %v3174_v29 = vsub.f32 1.0, %v5831_v55  ;;  %v3176_v6 = vmul.f32 %v5831_v55, %v7143_v47  ;;  %v7359_v58 = vld [vmem:[#allocation2 + $0x18] ss:$12 sps:$4 sm:$0xff]   ;;  %v7365_v55 = vld [vmem:[#allocation2 + $0x34] ss:$12 sps:$4 sm:$0xff]  }
 0x83e   :  { %5836 = vrcp.f32 %v3276_v60  ;;  %v7362_v60 = vld [vmem:[#allocation2 + $0x20] ss:$12 sps:$4 sm:$0xff]  }
 0x844   :  { %v5833_v28 = vpop.eup %5832 }
 0x845   :  { %v3175_v8 = vmul.f32 %v5833_v28, %v3174_v29  ;;  %v7372_v29 = vld [vmem:[#allocation2 + $0x38] ss:$12 sps:$4 sm:$0xff]  }
 0x846   :  { %v7375_v28 = vld [vmem:[#allocation2 + $0x4c] ss:$12 sps:$4 sm:$0xff]  }
 0x847   :  { %v5835_v15 = vpop.eup %5834  ;;  %v7308_v33 = vadd.f32 %v3176_v6, %v3175_v8  ;;  %v7381_v8 = vld [vmem:[#allocation2 + $0x48] ss:$12 sps:$4 sm:$0xff]  }
 0x848   :  { %v5837_v11 = vpop.eup %5836  ;;  %v3283_v44 = vmul.f32 %v5835_v15, %v3281_v10  ;;  %v7384_v10 = vld [vmem:[#allocation2 + $0x50] ss:$12 sps:$4 sm:$0xff]  }
 0x849   :  { %v7312_v13 = vpack.c.bf16 %v7308_v33, %v7308_v33  ;;  %v3291_v41 = vmul.f32 %v5837_v11, %v3289_v45  ;;  %v3286_v47 = vsub.f32 1.0, %v5837_v11  ;;  %v7419_v45 = vld [vmem:[#allocation2 + $0x64] ss:$12 sps:$4 sm:$0xff]   ;;  %v7425_v11 = vld [vmem:[#allocation2 + $0x60] ss:$12 sps:$4 sm:$0xff]  }
 0x84a   :  { %v3284_v26 = vadd.f32 %v3283_v44, %v7807_v19  ;;  %v7428_v44 = vld [vmem:[#allocation2 + $0x68] ss:$12 sps:$4 sm:$0xff]  }
 0x84b   :  { %4769 = vmatmul.mubr.msk.bf16.vlgmr.msra.gmra.mrb[72].mxu0 %vm436_vm3, %v7312_v13  ;;  %5335 = vmatmul.mubr.msk.bf16.vlgmr.msra.gmra.mrb[108].mxu1 %vm436_vm3, %v7312_v13 }
 0x84c   :  { %5838 = vtanh.f32 %v3284_v26  ;;  %3383 = vmatpush1.bf16.msra.mxu0 %v7154_v25  ;;  %5339 = vmatpush3.bf16.msra.mxu1 %v7157_v12  ;;  %v7441_v26 = vld [vmem:[#allocation2 + $0x80] ss:$12 sps:$4 sm:$0xff]  }
 0x84d   :  { %3384 = vmatprep.subr.bf16.mxu0 %v7160_v42  ;;  %5340 = vmatprep.subr.bf16.mxu1 %v7758_v63 }
 0x84e   :  { %3414 = vmatprep.mubr.bf16.mxu0 %v7759_v2  ;;  %5346 = vmatprep.mubr.msk.bf16.mxu1 %vm6130_vm0, %v7758_v63 }
 0x850   :  { %3385 = vmatpush1.bf16.msra.mxu0 %v7167_v4  ;;  %5341 = vmatpush3.bf16.msra.mxu1 %v7170_v18 }
 0x851   :  { %3386 = vmatprep.subr.bf16.mxu0 %v7173_v24  ;;  %5342 = vmatprep.subr.bf16.mxu1 %v7758_v63 }
 0x854   :  { %3387 = vmatpush1.bf16.msra.mxu0 %v7177_v46  ;;  %5343 = vmatpush3.bf16.msra.mxu1 %v7180_v32 }
 0x855   :  { %3388 = vmatprep.subr.bf16.mxu0 %v7183_v49  ;;  %5344 = vmatprep.subr.bf16.mxu1 %v7758_v63 }
 0x856   :  { %v5839_v36 = vpop.eup %5838 }
 0x857   :  { %v3287_v52 = vmul.f32 %v5839_v36, %v3286_v47  ;;  %v7444_v47 = vld [vmem:[#allocation2 + $0x94] ss:$12 sps:$4 sm:$0xff]   ;;  %v7448_v36 = vld [vmem:[#allocation2 + $0x90] ss:$12 sps:$4 sm:$0xff]  }
 0x858   :  { %3389 = vmatpush1.bf16.msra.mxu0 %v7187_v22  ;;  %5345 = vmatpush3.bf16.msra.mxu1 %v7190_v27  ;;  %7852 = vst [vmem:[#allocation18_spill] sm:$0xff] %v7444_v47  ;;  %7853 = vst [vmem:[#allocation20_spill] sm:$0xff] %v7448_v36 }
 0x859   :  { %3491 = vmatprep.subr.bf16.mxu0 %v7338_v57  ;;  %5350 = vmatprep.subr.bf16.mxu1 %v7758_v63  ;;  %v7342_v53 = vadd.f32 %v3291_v41, %v3287_v52  ;;  %v7438_v41 = vld [vmem:[#allocation2 + $0x78] ss:$12 sps:$4 sm:$0xff]  }
 0x85a   :  { %v7451_v52 = vld [vmem:[#allocation2 + $0x98] ss:$12 sps:$4 sm:$0xff]  }
 0x85b   :  { %4771 = vmatmul.mubr.msk.bf16.vlgmr.msra.gmra.mrb[72].mxu0 %vm436_vm3, %v3378_v62  ;;  %5347 = vmatmul.mubr.msk.bf16.vlgmr.msra.gmra.mrb[112].mxu1 %vm436_vm3, %v3378_v62  ;;  %v3485_v6 = vpack.c.bf16 %v7342_v53, %v7342_v53  ;;  %7854 = vst [vmem:[#allocation19_spill] sm:$0xff] %v7451_v52  ;;  %v7454_v62 = vld [vmem:[#allocation2 + $0xac] ss:$12 sps:$4 sm:$0xff]  }
 0x85c   :  { %3492 = vmatpush1.bf16.msra.mxu0 %v7346_v20  ;;  %5351 = vmatpush3.bf16.msra.mxu1 %v7349_v40  ;;  %7855 = vst [vmem:[#allocation14_spill] sm:$0xff] %v7454_v62 }
 0x85d   :  { %3493 = vmatprep.subr.bf16.mxu0 %v7352_v56  ;;  %5352 = vmatprep.subr.bf16.mxu1 %v7758_v63  ;;  %v3487_v15 = vrot.slane %v3485_v6, 2  ;;  %v7458_v6 = vld [vmem:[#allocation2 + $0xa8] ss:$12 sps:$4 sm:$0xff]  }
 0x85e   :  { %3523 = vmatprep.mubr.bf16.mxu0 %v7759_v2  ;;  %5358 = vmatprep.mubr.msk.bf16.mxu1 %vm6130_vm0, %v7758_v63  ;;  %7856 = vst [vmem:[#allocation21_spill] sm:$0xff] %v7458_v6 }
 0x860   :  { %3494 = vmatpush1.bf16.msra.mxu0 %v7359_v58  ;;  %5353 = vmatpush3.bf16.msra.mxu1 %v7362_v60 }
 0x861   :  { %3495 = vmatprep.subr.bf16.mxu0 %v7365_v55  ;;  %5354 = vmatprep.subr.bf16.mxu1 %v7758_v63 }
 0x864   :  { %3496 = vmatpush1.bf16.msra.mxu0 %v7369_v3  ;;  %5355 = vmatpush3.bf16.msra.mxu1 %v7372_v29 }
 0x865   :  { %3497 = vmatprep.subr.bf16.mxu0 %v7375_v28  ;;  %5356 = vmatprep.subr.bf16.mxu1 %v7758_v63 }
 0x868   :  { %3498 = vmatpush1.bf16.msra.mxu0 %v7381_v8  ;;  %5357 = vmatpush3.bf16.msra.mxu1 %v7384_v10 }
 0x869   :  { %3572 = vmatprep.subr.bf16.mxu0 %v7029_v50  ;;  %5362 = vmatprep.subr.bf16.mxu1 %v7758_v63  ;;  %v5976_v50 = vld [vmem:[#allocation5 + $0x4] ss:$12 sps:$4 sm:$0xff]  }
 0x86b   :  { %4775 = vmatmul.mubr.msk.bf16.vlgmr.msra.gmra.mrb[76].mxu0 %vm436_vm3, %v3487_v15  ;;  %5359 = vmatmul.mubr.msk.bf16.vlgmr.msra.gmra.mrb[116].mxu1 %vm436_vm3, %v3487_v15 }
 0x86c   :  { %3573 = vmatpush1.bf16.msra.mxu0 %v7035_v31  ;;  %5363 = vmatpush3.bf16.msra.mxu1 %v7038_v39  ;;  %v5977_v31 = vld [vmem:[#allocation5] ss:$12 sps:$4 sm:$0xff]   ;;  %v5978_v39 = vld [vmem:[#allocation5 + $0x8] ss:$12 sps:$4 sm:$0xff]  }
 0x86d   :  { %3574 = vmatprep.subr.bf16.mxu0 %v7041_v37  ;;  %5364 = vmatprep.subr.bf16.mxu1 %v7758_v63  ;;  %v5979_v37 = vld [vmem:[#allocation5 + $0x1c] ss:$12 sps:$4 sm:$0xff]  }
 0x86e   :  { %3604 = vmatprep.mubr.bf16.mxu0 %v7759_v2  ;;  %5370 = vmatprep.mubr.msk.bf16.mxu1 %vm6130_vm0, %v7758_v63 }
 0x870   :  { %3575 = vmatpush1.bf16.msra.mxu0 %v7048_v30  ;;  %5365 = vmatpush3.bf16.msra.mxu1 %v7051_v35  ;;  %v5980_v30 = vld [vmem:[#allocation5 + $0x18] ss:$12 sps:$4 sm:$0xff]   ;;  %v5981_v35 = vld [vmem:[#allocation5 + $0x20] ss:$12 sps:$4 sm:$0xff]  }
 0x871   :  { %3576 = vmatprep.subr.bf16.mxu0 %v7054_v0  ;;  %5366 = vmatprep.subr.bf16.mxu1 %v7758_v63  ;;  %v5982_v0 = vld [vmem:[#allocation5 + $0x34] ss:$12 sps:$4 sm:$0xff]  }
 0x874   :  { %3577 = vmatpush1.bf16.msra.mxu0 %v7058_v43  ;;  %5367 = vmatpush3.bf16.msra.mxu1 %v7061_v17  ;;  %v5983_v43 = vld [vmem:[#allocation5 + $0x30] ss:$12 sps:$4 sm:$0xff]   ;;  %v5984_v17 = vld [vmem:[#allocation5 + $0x38] ss:$12 sps:$4 sm:$0xff]  }
 0x875   :  { %3578 = vmatprep.subr.bf16.mxu0 %v7064_v14  ;;  %5368 = vmatprep.subr.bf16.mxu1 %v7758_v63  ;;  %v5985_v14 = vld [vmem:[#allocation5 + $0x4c] ss:$12 sps:$4 sm:$0xff]  }
 0x878   :  { %3579 = vmatpush1.bf16.msra.mxu0 %v7068_v59  ;;  %5369 = vmatpush3.bf16.msra.mxu1 %v7071_v51  ;;  %v5986_v59 = vld [vmem:[#allocation5 + $0x48] ss:$12 sps:$4 sm:$0xff]   ;;  %v5987_v51 = vld [vmem:[#allocation5 + $0x50] ss:$12 sps:$4 sm:$0xff]  }
 0x879   :  { %3675 = vmatprep.subr.bf16.mxu0 %v5976_v50  ;;  %5374 = vmatprep.subr.bf16.mxu1 %v7758_v63 }
 0x87b   :  { %4777 = vmatmul.mubr.msk.bf16.vlgmr.msra.gmra.mrb[76].mxu0 %vm436_vm3, %v7312_v13  ;;  %5371 = vmatmul.mubr.msk.bf16.vlgmr.msra.gmra.mrb[120].mxu1 %vm436_vm3, %v7312_v13  ;;  %v7431_v13 = vld [vmem:[#allocation2 + $0x7c] ss:$12 sps:$4 sm:$0xff]  }
 0x87c   :  { %3676 = vmatpush1.bf16.msra.mxu0 %v5977_v31  ;;  %5375 = vmatpush3.bf16.msra.mxu1 %v5978_v39 }
 0x87d   :  { %3677 = vmatprep.subr.bf16.mxu0 %v5979_v37  ;;  %5376 = vmatprep.subr.bf16.mxu1 %v7758_v63 }
 0x87e   :  { %3707 = vmatprep.mubr.bf16.mxu0 %v7759_v2  ;;  %5382 = vmatprep.mubr.msk.bf16.mxu1 %vm6130_vm0, %v7758_v63 }
 0x880   :  { %3678 = vmatpush1.bf16.msra.mxu0 %v5980_v30  ;;  %5377 = vmatpush3.bf16.msra.mxu1 %v5981_v35 }
 0x881   :  { %3679 = vmatprep.subr.bf16.mxu0 %v5982_v0  ;;  %5378 = vmatprep.subr.bf16.mxu1 %v7758_v63 }
 0x884   :  { %3680 = vmatpush1.bf16.msra.mxu0 %v5983_v43  ;;  %5379 = vmatpush3.bf16.msra.mxu1 %v5984_v17 }
 0x885   :  { %3681 = vmatprep.subr.bf16.mxu0 %v5985_v14  ;;  %5380 = vmatprep.subr.bf16.mxu1 %v7758_v63 }
 0x888   :  { %3682 = vmatpush1.bf16.msra.mxu0 %v5986_v59  ;;  %5381 = vmatpush3.bf16.msra.mxu1 %v5987_v51 }
 0x889   :  { %3794 = vmatprep.subr.bf16.mxu0 %v7419_v45  ;;  %5386 = vmatprep.subr.bf16.mxu1 %v7758_v63 }
 0x88b   :  { %4781 = vmatmul.mubr.msk.bf16.vlgmr.msra.gmra.mrb[80].mxu0 %vm436_vm3, %v3487_v15  ;;  %5383 = vmatmul.mubr.msk.bf16.vlgmr.msra.gmra.mrb[124].mxu1 %vm436_vm3, %v3487_v15  ;;  %v7461_v15 = vld [vmem:[#allocation2 + $0xb0] ss:$12 sps:$4 sm:$0xff]  }
 0x88c   :  { %3795 = vmatpush1.bf16.msra.mxu0 %v7425_v11  ;;  %5387 = vmatpush3.bf16.msra.mxu1 %v7428_v44  ;;  %7857 = vst [vmem:[#allocation22_spill] sm:$0xff] %v7461_v15 }
 0x88d   :  { %3796 = vmatprep.subr.bf16.mxu0 %v7431_v13  ;;  %5388 = vmatprep.subr.bf16.mxu1 %v7758_v63 }
 0x88e   :  { %3826 = vmatprep.mubr.bf16.mxu0 %v7759_v2  ;;  %5394 = vmatprep.mubr.msk.bf16.mxu1 %vm6130_vm0, %v7758_v63 }
 0x890   :  { %3797 = vmatpush1.bf16.msra.mxu0 %v7438_v41  ;;  %5389 = vmatpush3.bf16.msra.mxu1 %v7441_v26 }
 0x891   :  { %3798 = vmatprep.subr.bf16.mxu0 %v7444_v47  ;;  %5390 = vmatprep.subr.bf16.mxu1 %v7758_v63 }
 0x894   :  { %3799 = vmatpush1.bf16.msra.mxu0 %v7448_v36  ;;  %5391 = vmatpush3.bf16.msra.mxu1 %v7451_v52 }
 0x895   :  { %3800 = vmatprep.subr.bf16.mxu0 %v7454_v62  ;;  %5392 = vmatprep.subr.bf16.mxu1 %v7758_v63 }
 0x898   :  { %3801 = vmatpush1.bf16.msra.mxu0 %v7458_v6  ;;  %5393 = vmatpush3.bf16.msra.mxu1 %v7461_v15 }
 0x899   :  { %3879 = vmatprep.subr.bf16.mxu0 %v7846_v9  ;;  %5398 = vmatprep.subr.bf16.mxu1 %v7758_v63 }
 0x91e   :  { %v3372_v50 = vpop.f32.mrb[108].mxu1 }
 0x91f   :  { %v5336_v31 = vpop.f32.mrb[109].mxu1 }
 0x920   :  { %v3375_v39 = vpop.f32.mrb[110].mxu1 }
 0x921   :  { %v5337_v37 = vpop.f32.mrb[111].mxu1 }
 0x92e   :  { %v3416_v30 = vpop.f32.mrb[72].mxu0  ;;  %v3457_v35 = vpop.f32.mrb[112].mxu1 }
 0x92f   :  { %v5476_v0 = vadd.f32 %v3416_v30, %v7847_v23  ;;  %v3418_v43 = vpop.f32.mrb[73].mxu0  ;;  %v5348_v17 = vpop.f32.mrb[113].mxu1 }
 0x930   :  { %v3420_v14 = vpop.f32.mrb[74].mxu0  ;;  %v3460_v59 = vpop.f32.mrb[114].mxu1  ;;  %v5477_v15 = vadd.f32 %v3418_v43, %v7848_v38  ;;  %v3477_v17 = vadd.f32 %v7849_v16, %v3457_v35 }
 0x931   :  { %v4773_v51 = vmul.f32 -1.442695, %v5476_v0  ;;  %v3421_v6 = vpop.f32.mrb[75].mxu0  ;;  %v5349_v62 = vpop.f32.mrb[115].mxu1 }
 0x932   :  { %v4774_v9 = vmul.f32 -1.442695, %v5477_v15  ;;  %v3373_v6 = vadd.f32 %v3372_v50, %v7785_v61 }
 0x933   :  { %5840 = vpow2.f32 %v4773_v51 }
 0x934   :  { %5842 = vpow2.f32 %v4774_v9 }
 0x93d   :  { %v5841_v52 = vpop.eup %5840 }
 0x93e   :  { %v3467_v31 = vadd.f32 1.0, %v5841_v52  ;;  %v3566_v39 = vpop.f32.mrb[116].mxu1  ;;  %v5843_v30 = vpop.eup %5842 }
 0x93f   :  { %v5360_v37 = vpop.f32.mrb[117].mxu1  ;;  %v3474_v23 = vadd.f32 1.0, %v5843_v30 }
 0x940   :  { %5844 = vrcp.f32 %v3467_v31  ;;  %v3569_v36 = vpop.f32.mrb[118].mxu1 }
 0x941   :  { %v5361_v47 = vpop.f32.mrb[119].mxu1  ;;  %5846 = vrcp.f32 %v3474_v23 }
 0x94a   :  { %v5845_v14 = vpop.eup %5844 }
 0x94b   :  { %v3478_v62 = vmul.f32 %v5845_v14, %v3477_v17  ;;  %v5847_v35 = vpop.eup %5846 }
 0x94c   :  { %v3481_v30 = vsub.f32 1.0, %v5847_v35  ;;  %v3483_v17 = vmul.f32 %v5847_v35, %v7294_v5 }
 0x94d   :  { %v3479_v0 = vadd.f32 %v3478_v62, %v3373_v6 }
 0x94e   :  { %v3606_v43 = vpop.f32.mrb[76].mxu0  ;;  %v3647_v15 = vpop.f32.mrb[120].mxu1 }
 0x94f   :  { %5848 = vtanh.f32 %v3479_v0  ;;  %v5478_v52 = vadd.f32 %v3606_v43, %v7850_v21  ;;  %v3608_v59 = vpop.f32.mrb[77].mxu0  ;;  %v5372_v51 = vpop.f32.mrb[121].mxu1 }
 0x950   :  { %v3610_v9 = vpop.f32.mrb[78].mxu0  ;;  %v3650_v36 = vpop.f32.mrb[122].mxu1  ;;  %v5479_v16 = vadd.f32 %v3608_v59, %v7851_v48 }
 0x951   :  { %v4779_v47 = vmul.f32 -1.442695, %v5478_v52  ;;  %v3611_v31 = vpop.f32.mrb[79].mxu0  ;;  %v5373_v37 = vpop.f32.mrb[123].mxu1 }
 0x952   :  { %v4780_v50 = vmul.f32 -1.442695, %v5479_v16 }
 0x953   :  { %5850 = vpow2.f32 %v4779_v47 }
 0x954   :  { %5852 = vpow2.f32 %v4780_v50 }
 0x959   :  { %v5849_v23 = vpop.eup %5848 }
 0x95a   :  { %v3482_v14 = vmul.f32 %v5849_v23, %v3481_v30 }
 0x95c   :  { %v7473_v6 = vadd.f32 %v3483_v17, %v3482_v14  ;;  %v7480_v17 = vld [vmem:[%s7635_s5 + $0x1] ss:$0 sm:$0xff] }
 0x95d   :  { %v5851_v62 = vpop.eup %5850  ;;  %v3667_v14 = vadd.f32 %v7480_v17, %v3647_v15 }
 0x95e   :  { %v3657_v0 = vadd.f32 1.0, %v5851_v62  ;;  %v3709_v43 = vpop.f32.mrb[80].mxu0  ;;  %v3750_v51 = vpop.f32.mrb[124].mxu1 }
 0x95f   :  { %v3757_v52 = vrot.slane %v3709_v43, 2  ;;  %v3711_v9 = vpop.f32.mrb[81].mxu0  ;;  %v5384_v36 = vpop.f32.mrb[125].mxu1 }
 0x960   :  { %5854 = vrcp.f32 %v3657_v0  ;;  %v3767_v59 = vrot.slane %v3711_v9, 2  ;;  %v3713_v47 = vpop.f32.mrb[82].mxu0  ;;  %v3753_v31 = vpop.f32.mrb[126].mxu1 }
 0x961   :  { %v3759_v37 = vadd.f32 %v3757_v52, %v7805_v54  ;;  %v3714_v16 = vpop.f32.mrb[83].mxu0  ;;  %v5385_v48 = vpop.f32.mrb[127].mxu1  ;;  %v3567_v54 = vadd.f32 %v3566_v39, %v6426_v7 }
 0x962   :  { %v3769_v5 = vadd.f32 %v3767_v59, %v7806_v34  ;;  %v5853_v50 = vpop.eup %5852  ;;  %v3776_v59 = vadd.f32 %v7303_v1, %v3750_v51  ;;  %v7864_v51 = vld [vmem:[#allocation41_spill] sm:$0xff] }
 0x963   :  { %v4783_v35 = vmul.f32 -1.442695, %v3759_v37  ;;  %v3664_v23 = vadd.f32 1.0, %v5853_v50 }
 0x964   :  { %v4784_v30 = vmul.f32 -1.442695, %v3769_v5  ;;  %v3778_v16 = vrot.slane %v3776_v59, 2  ;;  %v3786_v5 = vrot.slane %v7342_v53, 6  ;;  %v6008_v53 = vld [vmem:[#allocation5 + $0x90] ss:$12 sps:$4 sm:$0xff]  }
 0x965   :  { %5856 = vpow2.f32 %v4783_v35 }
 0x966   :  { %5858 = vpow2.f32 %v4784_v30 }
 0x967   :  { %5860 = vrcp.f32 %v3664_v23 }
 0x96a   :  { %v5855_v62 = vpop.eup %5854 }
 0x96b   :  { %v3668_v0 = vmul.f32 %v5855_v62, %v3667_v14 }
 0x96d   :  { %v3669_v48 = vadd.f32 %v3668_v0, %v3567_v54 }
 0x96f   :  { %v5857_v34 = vpop.eup %5856  ;;  %5862 = vtanh.f32 %v3669_v48 }
 0x970   :  { %v5859_v43 = vpop.eup %5858  ;;  %v3763_v52 = vadd.f32 1.0, %v5857_v34 }
 0x971   :  { %v3773_v9 = vadd.f32 1.0, %v5859_v43  ;;  %v5861_v36 = vpop.eup %5860 }
 0x972   :  { %5864 = vrcp.f32 %v3763_v52  ;;  %v3671_v47 = vsub.f32 1.0, %v5861_v36  ;;  %v3673_v15 = vmul.f32 %v5861_v36, %v7308_v33  ;;  %v6006_v33 = vld [vmem:[#allocation5 + $0x80] ss:$12 sps:$4 sm:$0xff]  }
 0x973   :  { %5866 = vrcp.f32 %v3773_v9 }
 0x979   :  { %v5863_v31 = vpop.eup %5862 }
 0x97a   :  { %v3672_v37 = vmul.f32 %v5863_v31, %v3671_v47 }
 0x97c   :  { %v5865_v39 = vpop.eup %5864  ;;  %v7487_v35 = vadd.f32 %v3673_v15, %v3672_v37 }
 0x97d   :  { %v5867_v50 = vpop.eup %5866  ;;  %v3780_v30 = vmul.f32 %v5865_v39, %v3778_v16 }
 0x97e   :  { %v7491_v23 = vpack.c.bf16 %v7487_v35, %v7487_v35  ;;  %v3788_v14 = vmul.f32 %v5867_v50, %v3786_v5 }
 0x97f   :  { %v3781_v1 = vadd.f32 %v3780_v30, %v7807_v19  ;;  %v3783_v19 = vsub.f32 1.0, %v5867_v50  ;;  %v7576_v30 = vld [vmem:[%s7635_s5 + $0x2] ss:$0 sm:$0xff] }
 0x980   :  { %4785 = vmatmul.mubr.msk.bf16.vlgmr.msra.gmra.mrb[84].mxu0 %vm436_vm3, %v7491_v23  ;;  %5395 = vmatmul.mubr.msk.bf16.vlgmr.msra.gmra.mrb[128].mxu1 %vm436_vm3, %v7491_v23 }
 0x981   :  { %5868 = vtanh.f32 %v3781_v1  ;;  %3880 = vmatpush1.bf16.msra.mxu0 %v7154_v25  ;;  %5399 = vmatpush3.bf16.msra.mxu1 %v7157_v12 }
 0x982   :  { %3881 = vmatprep.subr.bf16.mxu0 %v7160_v42  ;;  %5400 = vmatprep.subr.bf16.mxu1 %v7758_v63  ;;  %v3875_v42 = vpack.c.bf16 %v7473_v6, %v7473_v6 }
 0x983   :  { %3911 = vmatprep.mubr.bf16.mxu0 %v7759_v2  ;;  %5406 = vmatprep.mubr.msk.bf16.mxu1 %vm6130_vm0, %v7758_v63 }
 0x985   :  { %3882 = vmatpush1.bf16.msra.mxu0 %v7167_v4  ;;  %5401 = vmatpush3.bf16.msra.mxu1 %v7170_v18 }
 0x986   :  { %3883 = vmatprep.subr.bf16.mxu0 %v7173_v24  ;;  %5402 = vmatprep.subr.bf16.mxu1 %v7758_v63 }
 0x989   :  { %3884 = vmatpush1.bf16.msra.mxu0 %v7177_v46  ;;  %5403 = vmatpush3.bf16.msra.mxu1 %v7180_v32  ;;  %v6001_v46 = vld [vmem:[#allocation5 + $0x64] ss:$12 sps:$4 sm:$0xff]   ;;  %v6002_v32 = vld [vmem:[#allocation5 + $0x60] ss:$12 sps:$4 sm:$0xff]  }
 0x98a   :  { %3885 = vmatprep.subr.bf16.mxu0 %v7183_v49  ;;  %5404 = vmatprep.subr.bf16.mxu1 %v7758_v63  ;;  %v6003_v49 = vld [vmem:[#allocation5 + $0x68] ss:$12 sps:$4 sm:$0xff]  }
 0x98b   :  { %v5869_v25 = vpop.eup %5868 }
 0x98c   :  { %v3784_v12 = vmul.f32 %v5869_v25, %v3783_v19 }
 0x98d   :  { %3886 = vmatpush1.bf16.msra.mxu0 %v7187_v22  ;;  %5405 = vmatpush3.bf16.msra.mxu1 %v7190_v27  ;;  %v6004_v22 = vld [vmem:[#allocation5 + $0x7c] ss:$12 sps:$4 sm:$0xff]   ;;  %v6005_v27 = vld [vmem:[#allocation5 + $0x78] ss:$12 sps:$4 sm:$0xff]  }
 0x98e   :  { %3988 = vmatprep.subr.bf16.mxu0 %v7338_v57  ;;  %5410 = vmatprep.subr.bf16.mxu1 %v7758_v63  ;;  %v3789_v4 = vadd.f32 %v3788_v14, %v3784_v12  ;;  %v6007_v57 = vld [vmem:[#allocation5 + $0x94] ss:$12 sps:$4 sm:$0xff]  }
 0x990   :  { %4787 = vmatmul.mubr.msk.bf16.vlgmr.msra.gmra.mrb[84].mxu0 %vm436_vm3, %v3875_v42  ;;  %5407 = vmatmul.mubr.msk.bf16.vlgmr.msra.gmra.mrb[132].mxu1 %vm436_vm3, %v3875_v42  ;;  %v3982_v18 = vpack.c.bf16 %v3789_v4, %v3789_v4 }
 0x991   :  { %3989 = vmatpush1.bf16.msra.mxu0 %v7346_v20  ;;  %5411 = vmatpush3.bf16.msra.mxu1 %v7349_v40  ;;  %v6009_v20 = vld [vmem:[#allocation5 + $0x98] ss:$12 sps:$4 sm:$0xff]  }
 0x992   :  { %3990 = vmatprep.subr.bf16.mxu0 %v7352_v56  ;;  %5412 = vmatprep.subr.bf16.mxu1 %v7758_v63  ;;  %v3984_v24 = vrot.slane %v3982_v18, 3  ;;  %v6010_v40 = vld [vmem:[#allocation5 + $0xac] ss:$12 sps:$4 sm:$0xff]   ;;  %v6011_v56 = vld [vmem:[#allocation5 + $0xa8] ss:$12 sps:$4 sm:$0xff]  }
 0x993   :  { %4020 = vmatprep.mubr.bf16.mxu0 %v7759_v2  ;;  %5418 = vmatprep.mubr.msk.bf16.mxu1 %vm6130_vm0, %v7758_v63 }
 0x995   :  { %3991 = vmatpush1.bf16.msra.mxu0 %v7359_v58  ;;  %5413 = vmatpush3.bf16.msra.mxu1 %v7362_v60  ;;  %v6012_v58 = vld [vmem:[#allocation5 + $0xb0] ss:$12 sps:$4 sm:$0xff]  }
 0x996   :  { %3992 = vmatprep.subr.bf16.mxu0 %v7365_v55  ;;  %5414 = vmatprep.subr.bf16.mxu1 %v7758_v63  ;;  %v7858_v60 = vld [vmem:[#allocation18_spill] sm:$0xff]  ;;  %v7859_v55 = vld [vmem:[#allocation20_spill] sm:$0xff] }
 0x999   :  { %3993 = vmatpush1.bf16.msra.mxu0 %v7369_v3  ;;  %5415 = vmatpush3.bf16.msra.mxu1 %v7372_v29  ;;  %v7860_v3 = vld [vmem:[#allocation19_spill] sm:$0xff]  ;;  %v7861_v29 = vld [vmem:[#allocation14_spill] sm:$0xff] }
 0x99a   :  { %3994 = vmatprep.subr.bf16.mxu0 %v7375_v28  ;;  %5416 = vmatprep.subr.bf16.mxu1 %v7758_v63  ;;  %v7862_v28 = vld [vmem:[#allocation21_spill] sm:$0xff] }
 0x99d   :  { %3995 = vmatpush1.bf16.msra.mxu0 %v7381_v8  ;;  %5417 = vmatpush3.bf16.msra.mxu1 %v7384_v10  ;;  %v7863_v8 = vld [vmem:[#allocation22_spill] sm:$0xff]  ;;  %v6013_v10 = vld [vmem:[#allocation5 + $0xc4] ss:$12 sps:$4 sm:$0xff]  }
 0x99e   :  { %4069 = vmatprep.subr.bf16.mxu0 %v6001_v46  ;;  %5422 = vmatprep.subr.bf16.mxu1 %v7758_v63 }
 0x9a0   :  { %4791 = vmatmul.mubr.msk.bf16.vlgmr.msra.gmra.mrb[88].mxu0 %vm436_vm3, %v3984_v24  ;;  %5419 = vmatmul.mubr.msk.bf16.vlgmr.msra.gmra.mrb[136].mxu1 %vm436_vm3, %v3984_v24 }
 0x9a1   :  { %4070 = vmatpush1.bf16.msra.mxu0 %v6002_v32  ;;  %5423 = vmatpush3.bf16.msra.mxu1 %v6003_v49 }
 0x9a2   :  { %4071 = vmatprep.subr.bf16.mxu0 %v6004_v22  ;;  %5424 = vmatprep.subr.bf16.mxu1 %v7758_v63 }
 0x9a3   :  { %4101 = vmatprep.mubr.bf16.mxu0 %v7759_v2  ;;  %5430 = vmatprep.mubr.msk.bf16.mxu1 %vm6130_vm0, %v7758_v63 }
 0x9a5   :  { %4072 = vmatpush1.bf16.msra.mxu0 %v6005_v27  ;;  %5425 = vmatpush3.bf16.msra.mxu1 %v6006_v33  ;;  %v7865_v33 = vld [vmem:[#allocation39_spill] sm:$0xff] }
 0x9a6   :  { %4073 = vmatprep.subr.bf16.mxu0 %v6007_v57  ;;  %5426 = vmatprep.subr.bf16.mxu1 %v7758_v63 }
 0x9a9   :  { %4074 = vmatpush1.bf16.msra.mxu0 %v6008_v53  ;;  %5427 = vmatpush3.bf16.msra.mxu1 %v6009_v20 }
 0x9aa   :  { %4075 = vmatprep.subr.bf16.mxu0 %v6010_v40  ;;  %5428 = vmatprep.subr.bf16.mxu1 %v7758_v63 }
 0x9ad   :  { %4076 = vmatpush1.bf16.msra.mxu0 %v6011_v56  ;;  %5429 = vmatpush3.bf16.msra.mxu1 %v6012_v58 }
 0x9ae   :  { %4176 = vmatprep.subr.bf16.mxu0 %v7419_v45  ;;  %5434 = vmatprep.subr.bf16.mxu1 %v7758_v63 }
 0x9b0   :  { %4793 = vmatmul.mubr.msk.bf16.vlgmr.msra.gmra.mrb[88].mxu0 %vm436_vm3, %v7491_v23  ;;  %5431 = vmatmul.mubr.msk.bf16.vlgmr.msra.gmra.mrb[140].mxu1 %vm436_vm3, %v7491_v23 }
 0x9b1   :  { %4177 = vmatpush1.bf16.msra.mxu0 %v7425_v11  ;;  %5435 = vmatpush3.bf16.msra.mxu1 %v7428_v44 }
 0x9b2   :  { %4178 = vmatprep.subr.bf16.mxu0 %v7431_v13  ;;  %5436 = vmatprep.subr.bf16.mxu1 %v7758_v63 }
 0x9b3   :  { %4208 = vmatprep.mubr.bf16.mxu0 %v7759_v2  ;;  %5442 = vmatprep.mubr.msk.bf16.mxu1 %vm6130_vm0, %v7758_v63 }
 0x9b5   :  { %4179 = vmatpush1.bf16.msra.mxu0 %v7438_v41  ;;  %5437 = vmatpush3.bf16.msra.mxu1 %v7441_v26 }
 0x9b6   :  { %4180 = vmatprep.subr.bf16.mxu0 %v7858_v60  ;;  %5438 = vmatprep.subr.bf16.mxu1 %v7758_v63 }
 0x9b9   :  { %4181 = vmatpush1.bf16.msra.mxu0 %v7859_v55  ;;  %5439 = vmatpush3.bf16.msra.mxu1 %v7860_v3 }
 0x9ba   :  { %4182 = vmatprep.subr.bf16.mxu0 %v7861_v29  ;;  %5440 = vmatprep.subr.bf16.mxu1 %v7758_v63 }
 0x9bd   :  { %4183 = vmatpush1.bf16.msra.mxu0 %v7862_v28  ;;  %5441 = vmatpush3.bf16.msra.mxu1 %v7863_v8 }
 0x9be   :  { %4261 = vmatprep.subr.bf16.mxu0 %v6013_v10  ;;  %5446 = vmatprep.subr.bf16.mxu1 %v7758_v63 }
 0xa53   :  { %v3869_v45 = vpop.f32.mrb[128].mxu1 }
 0xa54   :  { %v5396_v11 = vpop.f32.mrb[129].mxu1  ;;  %v3870_v1 = vadd.f32 %v3869_v45, %v7785_v61 }
 0xa55   :  { %v3872_v44 = vpop.f32.mrb[130].mxu1 }
 0xa56   :  { %v5397_v13 = vpop.f32.mrb[131].mxu1 }
 0xa63   :  { %v3913_v41 = vpop.f32.mrb[84].mxu0  ;;  %v3954_v26 = vpop.f32.mrb[132].mxu1 }
 0xa64   :  { %v5480_v62 = vadd.f32 %v3913_v41, %v7864_v51  ;;  %v3915_v54 = vpop.f32.mrb[85].mxu0  ;;  %v5408_v0 = vpop.f32.mrb[133].mxu1  ;;  %v3974_v23 = vadd.f32 %v7576_v30, %v3954_v26 }
 0xa65   :  { %v3917_v48 = vpop.f32.mrb[86].mxu0  ;;  %v3957_v34 = vpop.f32.mrb[134].mxu1  ;;  %v5481_v36 = vadd.f32 %v3915_v54, %v7848_v38 }
 0xa66   :  { %v4789_v43 = vmul.f32 -1.442695, %v5480_v62  ;;  %v3918_v52 = vpop.f32.mrb[87].mxu0  ;;  %v5409_v9 = vpop.f32.mrb[135].mxu1  ;;  %v6016_v48 = vld [vmem:[#allocation5 + $0xc8] ss:$12 sps:$4 sm:$0xff]  }
 0xa67   :  { %v4790_v59 = vmul.f32 -1.442695, %v5481_v36  ;;  %v6019_v34 = vld [vmem:[#allocation5 + $0xe0] ss:$12 sps:$4 sm:$0xff]   ;;  %v6021_v52 = vld [vmem:[#allocation5 + $0xf0] ss:$12 sps:$4 sm:$0xff]  }
 0xa68   :  { %5870 = vpow2.f32 %v4789_v43  ;;  %v6020_v43 = vld [vmem:[#allocation5 + $0xf4] ss:$12 sps:$4 sm:$0xff]   ;;  %v6022_v9 = vld [vmem:[#allocation5 + $0xf8] ss:$12 sps:$4 sm:$0xff]  }
 0xa69   :  { %5872 = vpow2.f32 %v4790_v59  ;;  %v6023_v36 = vld [vmem:[#allocation5 + $0x10c] ss:$12 sps:$4 sm:$0xff]   ;;  %v6024_v59 = vld [vmem:[#allocation5 + $0x108] ss:$12 sps:$4 sm:$0xff]  }
 0xa72   :  { %v5871_v47 = vpop.eup %5870 }
 0xa73   :  { %v3964_v31 = vadd.f32 1.0, %v5871_v47  ;;  %v4063_v15 = vpop.f32.mrb[136].mxu1  ;;  %v5873_v5 = vpop.eup %5872  ;;  %v6025_v47 = vld [vmem:[#allocation5 + $0x110] ss:$12 sps:$4 sm:$0xff]  }
 0xa74   :  { %v5420_v37 = vpop.f32.mrb[137].mxu1  ;;  %v3971_v50 = vadd.f32 1.0, %v5873_v5  ;;  %v4064_v45 = vadd.f32 %v4063_v15, %v6426_v7  ;;  %v6017_v7 = vld [vmem:[#allocation5 + $0xdc] ss:$12 sps:$4 sm:$0xff]   ;;  %v5638_v15 = vld [vmem:[#allocation7 + $0x4] ss:$16 sps:$4 sm:$0xff]  }
 0xa75   :  { %5874 = vrcp.f32 %v3964_v31  ;;  %v4066_v16 = vpop.f32.mrb[138].mxu1  ;;  %v5641_v37 = vld [vmem:[#allocation7 + $0xc] ss:$16 sps:$4 sm:$0xff]  }
 0xa76   :  { %v5421_v39 = vpop.f32.mrb[139].mxu1  ;;  %5876 = vrcp.f32 %v3971_v50  ;;  %v5636_v16 = vld [vmem:[#allocation7] ss:$16 sps:$4 sm:$0xff]   ;;  %v5647_v5 = vld [vmem:[#allocation7 + $0x2c] ss:$16 sps:$4 sm:$0xff]  }
 0xa77   :  { %v5639_v39 = vld [vmem:[#allocation7 + $0x8] ss:$16 sps:$4 sm:$0xff]   ;;  %v5642_v50 = vld [vmem:[#allocation7 + $0x20] ss:$16 sps:$4 sm:$0xff]  }
 0xa7f   :  { %v5875_v14 = vpop.eup %5874 }
 0xa80   :  { %v3975_v19 = vmul.f32 %v5875_v14, %v3974_v23  ;;  %v5877_v53 = vpop.eup %5876  ;;  %v5645_v23 = vld [vmem:[#allocation7 + $0x28] ss:$16 sps:$4 sm:$0xff]   ;;  %v5650_v14 = vld [vmem:[#allocation7 + $0x44] ss:$16 sps:$4 sm:$0xff]  }
 0xa81   :  { %v3978_v40 = vsub.f32 1.0, %v5877_v53  ;;  %v3980_v58 = vmul.f32 %v5877_v53, %v7473_v6 }
 0xa82   :  { %v3976_v25 = vadd.f32 %v3975_v19, %v3870_v1  ;;  %v5653_v1 = vld [vmem:[#allocation7 + $0x4c] ss:$16 sps:$4 sm:$0xff]   ;;  %v5648_v19 = vld [vmem:[#allocation7 + $0x40] ss:$16 sps:$4 sm:$0xff]  }
 0xa83   :  { %v4103_v12 = vpop.f32.mrb[88].mxu0  ;;  %v4144_v42 = vpop.f32.mrb[140].mxu1 }
 0xa84   :  { %5878 = vtanh.f32 %v3976_v25  ;;  %v5482_v4 = vadd.f32 %v4103_v12, %v7850_v21  ;;  %v4105_v18 = vpop.f32.mrb[89].mxu0  ;;  %v5432_v24 = vpop.f32.mrb[141].mxu1  ;;  %v4164_v8 = vadd.f32 %v7480_v17, %v4144_v42  ;;  %v6015_v17 = vld [vmem:[#allocation5 + $0xc0] ss:$12 sps:$4 sm:$0xff]   ;;  %v5656_v25 = vld [vmem:[#allocation7 + $0x64] ss:$16 sps:$4 sm:$0xff]  }
 0xa85   :  { %v4107_v46 = vpop.f32.mrb[90].mxu0  ;;  %v4147_v32 = vpop.f32.mrb[142].mxu1  ;;  %v5483_v57 = vadd.f32 %v4105_v18, %v7865_v33  ;;  %v5659_v12 = vld [vmem:[#allocation7 + $0x6c] ss:$16 sps:$4 sm:$0xff]   ;;  %v5654_v42 = vld [vmem:[#allocation7 + $0x60] ss:$16 sps:$4 sm:$0xff]  }
 0xa86   :  { %v4795_v49 = vmul.f32 -1.442695, %v5482_v4  ;;  %v4108_v22 = vpop.f32.mrb[91].mxu0  ;;  %v5433_v27 = vpop.f32.mrb[143].mxu1  ;;  %v5657_v4 = vld [vmem:[#allocation7 + $0x68] ss:$16 sps:$4 sm:$0xff]  }
 0xa87   :  { %v4796_v20 = vmul.f32 -1.442695, %v5483_v57 }
 0xa88   :  { %5880 = vpow2.f32 %v4795_v49 }
 0xa89   :  { %5882 = vpow2.f32 %v4796_v20 }
 0xa8e   :  { %v5879_v56 = vpop.eup %5878 }
 0xa8f   :  { %v3979_v60 = vmul.f32 %v5879_v56, %v3978_v40 }
 0xa91   :  { %v7583_v55 = vadd.f32 %v3980_v58, %v3979_v60 }
 0xa92   :  { %v5881_v21 = vpop.eup %5880 }
 0xa93   :  { %v4154_v3 = vadd.f32 1.0, %v5881_v21  ;;  %v5883_v29 = vpop.eup %5882  ;;  %v4257_v31 = vpack.c.bf16 %v7583_v55, %v7583_v55 }
 0xa94   :  { %v4161_v28 = vadd.f32 1.0, %v5883_v29 }
 0xa95   :  { %5884 = vrcp.f32 %v4154_v3 }
 0xa96   :  { %5886 = vrcp.f32 %v4161_v28 }
 0xa9f   :  { %v5885_v10 = vpop.eup %5884 }
 0xaa0   :  { %v4165_v11 = vmul.f32 %v5885_v10, %v4164_v8  ;;  %v5887_v13 = vpop.eup %5886 }
 0xaa1   :  { %v4168_v6 = vsub.f32 1.0, %v5887_v13  ;;  %v4170_v62 = vmul.f32 %v5887_v13, %v7487_v35  ;;  %v6018_v35 = vld [vmem:[#allocation5 + $0xd8] ss:$12 sps:$4 sm:$0xff]  }
 0xaa2   :  { %v4166_v44 = vadd.f32 %v4165_v11, %v4064_v45 }
 0xaa4   :  { %5888 = vtanh.f32 %v4166_v44 }
 0xaae   :  { %v5889_v41 = vpop.eup %5888 }
 0xaaf   :  { %v4169_v26 = vmul.f32 %v5889_v41, %v4168_v6 }
 0xab1   :  { %v4171_v54 = vadd.f32 %v4170_v62, %v4169_v26 }
 0xab3   :  { %v4172_v0 = vpack.c.bf16 %v4171_v54, %v4171_v54 }
 0xab5   :  { %4797 = vmatmul.mubr.msk.bf16.vlgmr.msra.gmra.mrb[92].mxu0 %vm436_vm3, %v4172_v0  ;;  %5443 = vmatmul.mubr.msk.bf16.vlgmr.msra.gmra.mrb[144].mxu1 %vm436_vm3, %v4172_v0 }
 0xab6   :  { %4262 = vmatpush1.bf16.msra.mxu0 %v6015_v17  ;;  %5447 = vmatpush3.bf16.msra.mxu1 %v6016_v48 }
 0xab7   :  { %4263 = vmatprep.subr.bf16.mxu0 %v6017_v7  ;;  %5448 = vmatprep.subr.bf16.mxu1 %v7758_v63  ;;  %v7867_v7 = vld [vmem:[#allocation15_spill] sm:$0xff] }
 0xab8   :  { %4293 = vmatprep.mubr.bf16.mxu0 %v7759_v2  ;;  %5454 = vmatprep.mubr.msk.bf16.mxu1 %vm6130_vm0, %v7758_v63 }
 0xaba   :  { %4264 = vmatpush1.bf16.msra.mxu0 %v6018_v35  ;;  %5449 = vmatpush3.bf16.msra.mxu1 %v6019_v34  ;;  %v7868_v34 = vld [vmem:[#allocation16_spill] sm:$0xff] }
 0xabb   :  { %4265 = vmatprep.subr.bf16.mxu0 %v6020_v43  ;;  %5450 = vmatprep.subr.bf16.mxu1 %v7758_v63 }
 0xabe   :  { %4266 = vmatpush1.bf16.msra.mxu0 %v6021_v52  ;;  %5451 = vmatpush3.bf16.msra.mxu1 %v6022_v9 }
 0xabf   :  { %4267 = vmatprep.subr.bf16.mxu0 %v6023_v36  ;;  %5452 = vmatprep.subr.bf16.mxu1 %v7758_v63  ;;  %v5644_v63 = vld [vmem:[#allocation7 + $0x24] ss:$16 sps:$4 sm:$0xff]  }
 0xac2   :  { %4268 = vmatpush1.bf16.msra.mxu0 %v6024_v59  ;;  %5453 = vmatpush3.bf16.msra.mxu1 %v6025_v47 }
 0xac3   :  { %4489 = vmatprep.subr.bf16.mxu0 %v5638_v15  ;;  %4530 = vmatprep.subr.bf16.mxu1 %v5641_v37 }
 0xac5   :  { %4799 = vmatmul.mubr.msk.bf16.vlgmr.msra.gmra.mrb[92].mxu0 %vm436_vm3, %v4257_v31  ;;  %5455 = vmatmul.mubr.msk.bf16.vlgmr.msra.gmra.mrb[148].mxu1 %vm436_vm3, %v4257_v31 }
 0xac6   :  { %4521 = vmatprep.mubr.bf16.mxu0 %v7759_v2  ;;  %4562 = vmatprep.mubr.bf16.mxu1 %v7759_v2  ;;  %v5651_v2 = vld [vmem:[#allocation7 + $0x48] ss:$16 sps:$4 sm:$0xff]  }
 0xac7   :  { %4490 = vmatpush1.bf16.msra.mxu0 %v5636_v16  ;;  %4531 = vmatpush1.bf16.msra.mxu1 %v5639_v39 }
 0xac8   :  { %4491 = vmatprep.subr.bf16.mxu0 %v5644_v63  ;;  %4532 = vmatprep.subr.bf16.mxu1 %v5647_v5 }
 0xacb   :  { %4492 = vmatpush1.bf16.msra.mxu0 %v5642_v50  ;;  %4533 = vmatpush1.bf16.msra.mxu1 %v5645_v23 }
 0xacc   :  { %4493 = vmatprep.subr.bf16.mxu0 %v5650_v14  ;;  %4534 = vmatprep.subr.bf16.mxu1 %v5653_v1 }
 0xacf   :  { %4494 = vmatpush1.bf16.msra.mxu0 %v5648_v19  ;;  %4535 = vmatpush1.bf16.msra.mxu1 %v5651_v2  ;;  %v7870_v19 = vld [vmem:[#allocation13_spill] sm:$0xff] }
 0xad0   :  { %4495 = vmatprep.subr.bf16.mxu0 %v5656_v25  ;;  %4536 = vmatprep.subr.bf16.mxu1 %v5659_v12 }
 0xad3   :  { %4496 = vmatpush1.bf16.msra.mxu0 %v5654_v42  ;;  %4537 = vmatpush1.bf16.msra.mxu1 %v5657_v4 }
 0xb88   :  { %v4251_v18 = vpop.f32.mrb[144].mxu1 }
 0xb89   :  { %v5444_v24 = vpop.f32.mrb[145].mxu1  ;;  %v4252_v45 = vadd.f32 %v4251_v18, %v7785_v61  ;;  %v4384_v61 = vld [vmem:[%s7637_s7] sm:$0xf]  ;;  %s6131_s7 = smov [#allocation8]  }
 0xb8a   :  { %v4254_v46 = vpop.f32.mrb[146].mxu1  ;;  %v4389_v35 = vrot.slane %v4384_v61, %v7867_v7  ;;  %v4397_v43 = vrot.slane %v4384_v61, %v7868_v34  ;;  %s4600_s21 = sshll.u32 %s6131_s7, 4  ;;  %s4601_s21 = int_to_ptr.vmem [resolvable:$true] %s4600_s21 }
 0xb8b   :  { %v5445_v32 = vpop.f32.mrb[147].mxu1  ;;  %s6092_s22 = scalar_lea.vmem %s4601_s21, 128  ;;  %p6097_p11 = scmp.lt.s32.totalorder %s4601_s21, %s4601_s21 }
 0xb8c   :  { %p6093_p10 = scmp.ne.s32.totalorder %s4601_s21, %s6092_s22  ;;  %p6098_p12 = scmp.lt.s32.totalorder %s6092_s22, %s6092_s22 }
 0xb8e   :  { %p6099_p13 = por %p6098_p12, %p6097_p11 }
 0xb90   :  { %p6100_p0 = pnand %p6099_p13, %p6093_p10 }
 0xb98   :  { %v4295_v49 = vpop.f32.mrb[92].mxu0  ;;  %v4336_v22 = vpop.f32.mrb[148].mxu1 }
 0xb99   :  { %v5484_v27 = vadd.f32 %v4295_v49, %v7864_v51  ;;  %v4297_v33 = vpop.f32.mrb[93].mxu0  ;;  %v5456_v57 = vpop.f32.mrb[149].mxu1  ;;  %v4356_v10 = vadd.f32 %v7576_v30, %v4336_v22  ;;  %v7866_v30 = vld [vmem:[#allocation12_spill] sm:$0xff] }
 0xb9a   :  { %v4299_v53 = vpop.f32.mrb[94].mxu0  ;;  %v4339_v20 = vpop.f32.mrb[150].mxu1  ;;  %v5485_v60 = vadd.f32 %v4297_v33, %v7848_v38  ;;  %v4400_v48 = vsub.s32 3, %v7866_v30 }
 0xb9b   :  { %v4801_v40 = vmul.f32 -1.442695, %v5484_v27  ;;  %v4300_v56 = vpop.f32.mrb[95].mxu0  ;;  %v5457_v58 = vpop.f32.mrb[151].mxu1 }
 0xb9c   :  { %v4802_v21 = vmul.f32 -1.442695, %v5485_v60  ;;  %v4401_v9 = vrot.slane %v4384_v61, %v4400_v48 }
 0xb9d   :  { %5890 = vpow2.f32 %v4801_v40 }
 0xb9e   :  { %5892 = vpow2.f32 %v4802_v21 }
 0xba7   :  { %v5891_v3 = vpop.eup %5890 }
 0xba8   :  { %v4346_v29 = vadd.f32 1.0, %v5891_v3  ;;  %v5893_v28 = vpop.eup %5892 }
 0xba9   :  { %v4353_v8 = vadd.f32 1.0, %v5893_v28 }
 0xbaa   :  { %5894 = vrcp.f32 %v4346_v29 }
 0xbab   :  { %5896 = vrcp.f32 %v4353_v8 }
 0xbb4   :  { %v5895_v51 = vpop.eup %5894 }
 0xbb5   :  { %v4357_v11 = vmul.f32 %v5895_v51, %v4356_v10  ;;  %v5897_v13 = vpop.eup %5896 }
 0xbb6   :  { %v4360_v6 = vsub.f32 1.0, %v5897_v13  ;;  %v4362_v26 = vmul.f32 %v5897_v13, %v7583_v55  ;;  %v7869_v55 = vld [vmem:[#allocation17_spill] sm:$0xff] }
 0xbb7   :  { %v4358_v44 = vadd.f32 %v4357_v11, %v4252_v45  ;;  %v4393_v52 = vrot.slane %v4384_v61, %v7869_v55 }
 0xbb9   :  { %5898 = vtanh.f32 %v4358_v44 }
 0xbc3   :  { %v5899_v38 = vpop.eup %5898 }
 0xbc4   :  { %v4361_v41 = vmul.f32 %v5899_v38, %v4360_v6 }
 0xbc6   :  { %v4363_v62 = vadd.f32 %v4362_v26, %v4361_v41 }
 0xbc8   :  { %vm4364_vm4 = vcmp.gt.f32.partialorder %v4363_v62, 0.0  ;;  %v4365_v54 = vmul.f32 0.01, %v4363_v62 }
 0xbca   :  { %v4366_v0 = vsel %vm4364_vm4, %v4363_v62, %v4365_v54 }
 0xbcb   :  { %v4367_v17 = vpack.c.bf16 %v4366_v0, %v4366_v0 }
 0xbcd   :  { %4819 = vmatmul.mubr.msk.bf16.vlgmr.msra.gmra.mrb[96].mxu0 %vm436_vm3, %v4367_v17  ;;  %4820 = vmatmul.mubr.msk.bf16.vlgmr.msra.gmra.mrb[152].mxu1 %vm436_vm3, %v4367_v17 }
 0xca0   :  { %v4523_v36 = vpop.f32.mrb[96].mxu0  ;;  %v4564_v59 = vpop.f32.mrb[152].mxu1 }
 0xca1   :  { %v4524_v47 = vadd.f32 %v4523_v36, %v4389_v35  ;;  %v4565_v31 = vadd.f32 %v4564_v59, %v4397_v43  ;;  %v4525_v15 = vpop.f32.mrb[97].mxu0  ;;  %v4566_v37 = vpop.f32.mrb[153].mxu1 }
 0xca2   :  { %v4526_v16 = vadd.f32 %v4525_v15, %v4393_v52  ;;  %v4567_v39 = vadd.f32 %v4566_v37, %v4401_v9  ;;  %v4527_v63 = vpop.f32.mrb[98].mxu0  ;;  %v4568_v5 = vpop.f32.mrb[154].mxu1 }
 0xca3   :  { %v4528_v50 = vpop.f32.mrb[99].mxu0  ;;  %v4569_v23 = vpop.f32.mrb[155].mxu1 }
 0xca4   :  { %v4575_v14 = vcombine.low %v4524_v47, %v4526_v16  ;;  %v4576_v1 = vcombine.low %v4565_v31, %v4567_v39 }
 0xca6   :  { %v4583_v2 = vrot.slane %v4575_v14, %v7870_v19  ;;  %v4590_v25 = vrot.slane %v4576_v1, %v7870_v19 }
 0xca8   :  { %v4591_v12 = vcombine.low %v4583_v2, %v4590_v25 }
 0xcaa   :  { %4593 = vst [vmem:[#allocation8] sm:$0xff] %v4591_v12 }
 0xcab   :  { %6103 = shalt.err (!%p6100_p0)
}
 0xcac   :  { %s6104_s1 = scalar_lea.hbm %s7638_s8, 128 }
 0xcad   :  { %p6105_p1 = scmp.ne.s32.totalorder %s7638_s8, %s6104_s1  ;;  %p6108_p2 = scmp.lt.u32.totalorder %s6104_s1, %s7638_s8 }
 0xcaf   :  { %p6110_p3 = pnand %p6108_p2, %p6105_p1 }
 0xcb1   :  { %6113 = shalt.err (!%p6110_p3)
}
 0xcb2   :  { %4603 = dma.vmem_to_hbm [thread:$0]  %s4601_s21, 128, %s7638_s8, [#allocation4]  }
 0xcb3   :  { %6118 = dma.done.wait [#allocation4], 128  }
 0xcb4   :  { %6119 = vsyncadd [#allocation4], 4294967168 }
 0xcb5   :  { %4607 = vsyncpa [#allocation3], 1 }
 0xcb6   :  { %4608 = vsyncpa [#allocation6], 1 }
 0xcb7   :  { %4609 = vsyncpa [#allocation4], 1 }

</bundles_post_ra>
